<compile_context>
chip_gen: v7x
topology: tpu7x:2x2x1
jax: 0.10.0
libtpu: 0.0.40
codegen_flags: <defaults>
</compile_context>

<pallas_src>
import jax
import jax.numpy as jnp
from jax import lax
from jax.experimental import pallas as pl
from jax.experimental.pallas import tpu as pltpu


def seq2seq_kernel(enc_x_ref, len_mask_ref, tgt_contrib_ref, tf_ref,
                   e_whh_ref, e_b_ref, d_whh_ref, d_b_ref,
                   demb_wih_ref, fc_w_ref, fc_b_ref,
                   out_ref, x_sc):
    S, B, G = enc_x_ref.shape          # G = 4H
    T = tgt_contrib_ref.shape[0]
    Vp = fc_w_ref.shape[1]             # target vocab padded to a multiple of 128
    H = e_whh_ref.shape[0]

    # ---- hoisted loop invariants (weights, broadcast biases, argmax iota) ----
    e_whh = e_whh_ref[...]                                     # [H, 4H]  bf16
    d_whh = d_whh_ref[...]                                     # [H, 4H]  bf16
    demb_wih = demb_wih_ref[...]                               # [Vp, 4H] bf16
    fc_w = fc_w_ref[...]                                       # [H, Vp]  bf16
    e_b = jnp.broadcast_to(e_b_ref[...], (B, G))               # [B, 4H]  f32
    d_b = jnp.broadcast_to(d_b_ref[...], (B, G))               # [B, 4H]  f32
    fc_b = jnp.broadcast_to(fc_b_ref[...], (B, Vp))            # [B, Vp]  f32
    iota = lax.broadcasted_iota(jnp.int32, (B, Vp), 1)

    def gate_act(gates, c):
        # gate order (i, f, o, g): one sigmoid over the first 3H lanes, one tanh over the last H.
        # NOTE: with toy H=32 the gate blocks are not 128-lane aligned (XLU lane rotates on the
        # slices); keep H a multiple of 128 in production shapes so those vanish.
        sig = jax.nn.sigmoid(gates[:, :3 * H])
        i_g = sig[:, :H]
        f_g = sig[:, H:2 * H]
        o_g = sig[:, 2 * H:]
        g_g = jnp.tanh(gates[:, 3 * H:])
        c_new = f_g * c + i_g * g_g
        h_new = o_g * jnp.tanh(c_new)
        return h_new, c_new

    # ---- encoder: packed-sequence semantics (state frozen once t >= src_len[b]) ----
    h = jnp.zeros((B, H), jnp.float32)
    c = jnp.zeros((B, H), jnp.float32)
    for t in range(S):                                         # static trip count, fully unrolled
        gates = (enc_x_ref[t]                                  # precomputed x @ wih (gathered)
                 + jnp.dot(h.astype(jnp.bfloat16), e_whh,
                           preferred_element_type=jnp.float32)
                 + e_b)
        h_new, c_new = gate_act(gates, c)
        m = len_mask_ref[t] != 0                               # [B, 1] bool: t < src_len[b]
        h = jnp.where(m, h_new, h)
        c = jnp.where(m, c_new, c)

    # outputs[:, 0] is never written in the torch loop -> stays zero
    out_ref[0] = jnp.zeros((B, Vp), jnp.float32)

    # ---- decoder: split dots; greedy path only when not teacher forcing ----
    # x_sc holds the current step's input contribution (emb[input] @ wih), staged through VMEM.
    x_sc[...] = tgt_contrib_ref[0]                             # input = tgt[:, 0]
    for t in range(1, T):                                      # static trip count, fully unrolled
        gates = (x_sc[...]
                 + jnp.dot(h.astype(jnp.bfloat16), d_whh,
                           preferred_element_type=jnp.float32)
                 + d_b)
        h, c = gate_act(gates, c)
        logits = jnp.dot(h.astype(jnp.bfloat16), fc_w,
                         preferred_element_type=jnp.float32) + fc_b
        out_ref[t] = logits                                    # lane-dense [B, Vp] store

        if t < T - 1:                                          # last step's next input is unused
            # default: teacher-forced contribution (cheap VMEM copy, no argmax dependence)
            x_sc[...] = tgt_contrib_ref[t]

            @pl.when(tf_ref[t] == 0)
            def _():
                # greedy token: first-max-index argmax -> one-hot -> gate contribution
                max_val = jnp.max(logits, axis=-1, keepdims=True)
                top1_idx = jnp.min(jnp.where(logits == max_val, iota, Vp),
                                   axis=-1, keepdims=True)
                top1_oh = (iota == top1_idx).astype(jnp.bfloat16)
                x_sc[...] = jnp.dot(top1_oh, demb_wih,
                                    preferred_element_type=jnp.float32)


def _perm_gates(w):
    """Permute PyTorch gate order (i, f, g, o) -> (i, f, o, g) along the last axis."""
    h4 = w.shape[-1]
    H = h4 // 4
    return jnp.concatenate([w[..., :2 * H], w[..., 3 * H:], w[..., 2 * H:3 * H]], axis=-1)


@jax.jit
def seq2seq_forward(params, src, src_len, tgt, tf_mask):
    """Mirrors Seq2Seq.forward. src [B,S], tgt [B,T] int32; tf_mask [T] int32."""
    B, S = src.shape
    T = tgt.shape[1]
    H = params["enc_whh"].shape[0]
    Vt = params["dec_emb"].shape[0]
    G = 4 * H

    LANE = 128
    B_pad = ((B + 7) // 8) * 8                        # full sublane groups
    Vp = ((Vt + LANE - 1) // LANE) * LANE             # lane-dense logits / one-hots

    # ---- batch padding (padded rows are masked in the encoder and sliced from the output) ----
    pad_b = B_pad - B
    src_p = jnp.pad(src, ((0, pad_b), (0, 0)))
    tgt_p = jnp.pad(tgt, ((0, pad_b), (0, 0)))
    src_len_p = jnp.pad(src_len, (0, pad_b))

    # ---- gate reorder (i,f,g,o) -> (i,f,o,g) ----
    enc_wih = _perm_gates(params["enc_wih"])
    enc_whh = _perm_gates(params["enc_whh"])
    enc_b = _perm_gates(params["enc_b"])
    dec_wih = _perm_gates(params["dec_wih"])
    dec_whh = _perm_gates(params["dec_whh"])
    dec_b = _perm_gates(params["dec_b"])

    # ---- fuse embedding @ wih; input contributions precomputed as gathers by token id ----
    enc_emb_wih = params["enc_emb"] @ enc_wih                          # [Vs, 4H]
    enc_x = jnp.transpose(enc_emb_wih[src_p], (1, 0, 2))               # [S, B_pad, 4H] f32

    dec_emb_wih = params["dec_emb"] @ dec_wih                          # [Vt, 4H] f32
    tgt_contrib = jnp.transpose(dec_emb_wih[tgt_p], (1, 0, 2))         # [T, B_pad, 4H] f32
    demb_wih = (jnp.zeros((Vp, G), jnp.float32).at[:Vt].set(dec_emb_wih)
                .astype(jnp.bfloat16))                                 # [Vp, 4H] bf16 (greedy path)

    # bf16 matmul operands; greedy argmax may flip near-ties vs an f32 reference (accepted here)
    fc_w = jnp.zeros((H, Vp), jnp.float32).at[:, :Vt].set(params["fc_w"]).astype(jnp.bfloat16)
    # padded vocab lanes get a huge negative bias (applied in f32) so argmax never selects them
    fc_b = jnp.full((1, Vp), -1e30, jnp.float32).at[:, :Vt].set(params["fc_b"])

    e_whh_bf = enc_whh.astype(jnp.bfloat16)
    d_whh_bf = dec_whh.astype(jnp.bfloat16)

    len_mask = (jnp.arange(S)[:, None] < src_len_p[None, :]).astype(jnp.int32)[:, :, None]

    vmem = pl.BlockSpec(memory_space=pltpu.MemorySpace.VMEM)
    smem = pl.BlockSpec(memory_space=pltpu.MemorySpace.SMEM)

    # explicit VMEM budget sized from the actual buffers (no-op at toy shapes)
    f32b, bf16b, i32b = 4, 2, 4
    vmem_bytes = (S * B_pad * G * f32b + S * B_pad * i32b              # enc_x, len_mask
                  + T * B_pad * G * f32b                               # tgt_contrib
                  + 2 * H * G * bf16b + 2 * G * f32b                   # whh's, biases
                  + Vp * G * bf16b + H * Vp * bf16b + Vp * f32b        # demb_wih, fc_w, fc_b
                  + T * B_pad * Vp * f32b + B_pad * G * f32b)          # out, x scratch
    vmem_limit = int(min(max(2 * vmem_bytes + (4 << 20), 16 << 20), 96 << 20))

    # TODO(synk): for v7x (64 MiB VMEM) at realistic vocab/seq, move the output to
    #             memory_space=pl.ANY and DMA each step's [B,Vp] logits row with
    #             pltpu.make_async_copy, and gather dec_emb_wih / fc_w rows per token
    #             instead of keeping them fully VMEM-resident.
    # TODO(synk): add a batch-tile grid axis with dimension_semantics=("parallel",) once
    #             B_pad >= 16 so each v7x TensorCore gets a full sublane group; keep batch in
    #             the M dimension up to the MXU height before sharding.
    out_tm = pl.pallas_call(
        seq2seq_kernel,
        out_shape=jax.ShapeDtypeStruct((T, B_pad, Vp), jnp.float32),
        in_specs=[vmem, vmem, vmem, smem,
                  vmem, vmem, vmem, vmem, vmem, vmem, vmem],
        out_specs=vmem,
        scratch_shapes=[pltpu.VMEM((B_pad, G), jnp.float32)],
        compiler_params=pltpu.CompilerParams(vmem_limit_bytes=vmem_limit),
    )(enc_x, len_mask, tgt_contrib, tf_mask,
      e_whh_bf, enc_b, d_whh_bf, dec_b, demb_wih, fc_w, fc_b)

    # back to PyTorch layout [B, max_len, Vt]
    return jnp.transpose(out_tm, (1, 0, 2))[:B, :, :Vt]


def init_params(key, vs, vt, emb, hid):
    ks = jax.random.split(key, 10)
    n = lambda k, shape: (jax.random.normal(k, shape, jnp.float32) * 0.1)
    return {
        "enc_emb": n(ks[0], (vs, emb)),
        "enc_wih": n(ks[1], (emb, 4 * hid)),
        "enc_whh": n(ks[2], (hid, 4 * hid)),
        "enc_b":   n(ks[3], (1, 4 * hid)),
        "dec_emb": n(ks[4], (vt, emb)),
        "dec_wih": n(ks[5], (emb, 4 * hid)),
        "dec_whh": n(ks[6], (hid, 4 * hid)),
        "dec_b":   n(ks[7], (1, 4 * hid)),
        "fc_w":    n(ks[8], (hid, vt)),
        "fc_b":    n(ks[9], (1, vt)),
    }


if __name__ == "__main__":
    B, S, T = 4, 8, 8          # batch, src len, tgt len (max_len)
    Vs, Vt, E, H = 32, 32, 16, 32

    key = jax.random.PRNGKey(0)
    kp, ksrc, ktgt, ktf = jax.random.split(key, 4)

    params = init_params(kp, Vs, Vt, E, H)
    src = jax.random.randint(ksrc, (B, S), 0, Vs, dtype=jnp.int32)
    tgt = jax.random.randint(ktgt, (B, T), 0, Vt, dtype=jnp.int32)
    src_len = jnp.array([8, 5, 8, 3], dtype=jnp.int32)

    # per-step teacher-forcing decisions, mirroring `torch.rand(1).item() < 0.5`
    teacher_forcing_ratio = 0.5
    tf_mask = (jax.random.uniform(ktf, (T,)) < teacher_forcing_ratio).astype(jnp.int32)

    out = seq2seq_forward(params, src, src_len, tgt, tf_mask)
    out = jax.block_until_ready(out)

    assert out.shape == (B, T, Vt)
    assert bool(jnp.all(out[:, 0, :] == 0.0))   # t=0 row is never written, as in torch
    print("KERNEL_OK")
</pallas_src>

<mosaic_0001>
module attributes {stable_mosaic.version = 11 : i64} {
  func.func @seq2seq_kernel(%arg0: memref<8x8x128xf32, #tpu.memory_space<vmem>>, %arg1: memref<8x8x1xi32, #tpu.memory_space<vmem>>, %arg2: memref<8x8x128xf32, #tpu.memory_space<vmem>>, %arg3: memref<8xi32, #tpu.memory_space<smem>>, %arg4: memref<32x128xbf16, #tpu.memory_space<vmem>>, %arg5: memref<1x128xf32, #tpu.memory_space<vmem>>, %arg6: memref<32x128xbf16, #tpu.memory_space<vmem>>, %arg7: memref<1x128xf32, #tpu.memory_space<vmem>>, %arg8: memref<128x128xbf16, #tpu.memory_space<vmem>>, %arg9: memref<32x128xbf16, #tpu.memory_space<vmem>>, %arg10: memref<1x128xf32, #tpu.memory_space<vmem>>, %arg11: memref<8x8x128xf32, #tpu.memory_space<vmem>>, %arg12: memref<8x128xf32, #tpu.memory_space<vmem>>) attributes {dimension_semantics = [], scalar_prefetch = 0 : i64, scratch_operands = 1 : i64, tpu.core_type = #tpu.core_type<tc>} {
    %c0 = arith.constant 0 : index
    %c0_0 = arith.constant 0 : index
    %0 = vector.load %arg4[%c0, %c0_0] : memref<32x128xbf16, #tpu.memory_space<vmem>>, vector<32x128xbf16>
    %c0_1 = arith.constant 0 : index
    %c0_2 = arith.constant 0 : index
    %1 = vector.load %arg6[%c0_1, %c0_2] : memref<32x128xbf16, #tpu.memory_space<vmem>>, vector<32x128xbf16>
    %c0_3 = arith.constant 0 : index
    %c0_4 = arith.constant 0 : index
    %2 = vector.load %arg8[%c0_3, %c0_4] : memref<128x128xbf16, #tpu.memory_space<vmem>>, vector<128x128xbf16>
    %c0_5 = arith.constant 0 : index
    %c0_6 = arith.constant 0 : index
    %3 = vector.load %arg9[%c0_5, %c0_6] : memref<32x128xbf16, #tpu.memory_space<vmem>>, vector<32x128xbf16>
    %c0_7 = arith.constant 0 : index
    %c0_8 = arith.constant 0 : index
    %4 = vector.load %arg5[%c0_7, %c0_8] : memref<1x128xf32, #tpu.memory_space<vmem>>, vector<1x128xf32>
    %5 = vector.shape_cast %4 : vector<1x128xf32> to vector<1x128xf32>
    %6 = vector.broadcast %5 : vector<1x128xf32> to vector<8x128xf32>
    %c0_9 = arith.constant 0 : index
    %c0_10 = arith.constant 0 : index
    %7 = vector.load %arg7[%c0_9, %c0_10] : memref<1x128xf32, #tpu.memory_space<vmem>>, vector<1x128xf32>
    %8 = vector.shape_cast %7 : vector<1x128xf32> to vector<1x128xf32>
    %9 = vector.broadcast %8 : vector<1x128xf32> to vector<8x128xf32>
    %c0_11 = arith.constant 0 : index
    %c0_12 = arith.constant 0 : index
    %10 = vector.load %arg10[%c0_11, %c0_12] : memref<1x128xf32, #tpu.memory_space<vmem>>, vector<1x128xf32>
    %11 = vector.shape_cast %10 : vector<1x128xf32> to vector<1x128xf32>
    %12 = vector.broadcast %11 : vector<1x128xf32> to vector<8x128xf32>
    %13 = tpu.iota {dimensions = array<i32: 1>} : vector<8x128xi32>
    %cst = arith.constant 0.000000e+00 : f32
    %14 = vector.broadcast %cst : f32 to vector<8x32xf32>
    %cst_13 = arith.constant 0.000000e+00 : f32
    %15 = vector.broadcast %cst_13 : f32 to vector<8x32xf32>
    %c0_14 = arith.constant 0 : index
    %c0_15 = arith.constant 0 : index
    %c0_16 = arith.constant 0 : index
    %16 = vector.load %arg0[%c0_14, %c0_15, %c0_16] : memref<8x8x128xf32, #tpu.memory_space<vmem>>, vector<1x8x128xf32>
    %17 = vector.shape_cast %16 : vector<1x8x128xf32> to vector<8x128xf32>
    %18 = arith.truncf %14 : vector<8x32xf32> to vector<8x32xbf16>
    %cst_17 = arith.constant dense<0.000000e+00> : vector<8x128xf32>
    %19 = tpu.matmul %18, %0, %cst_17 {dimension_numbers = #tpu.dot_dimension_numbers<[1], [0], [0], [1], [0, 0, 1, 1], [], []>} : vector<8x32xbf16>, vector<32x128xbf16>, vector<8x128xf32> -> vector<8x128xf32>
    %20 = arith.addf %17, %19 : vector<8x128xf32>
    %21 = arith.addf %20, %6 : vector<8x128xf32>
    %22 = vector.extract_strided_slice %21 {offsets = [0, 0], sizes = [8, 96], strides = [1, 1]} : vector<8x128xf32> to vector<8x96xf32>
    %23 = arith.negf %22 : vector<8x96xf32>
    %24 = math.exp %23 : vector<8x96xf32>
    %cst_18 = arith.constant 1.000000e+00 : f32
    %25 = vector.broadcast %cst_18 : f32 to vector<8x96xf32>
    %26 = arith.addf %25, %24 : vector<8x96xf32>
    %27 = arith.divf %25, %26 : vector<8x96xf32>
    %28 = vector.extract_strided_slice %27 {offsets = [0, 0], sizes = [8, 32], strides = [1, 1]} : vector<8x96xf32> to vector<8x32xf32>
    %29 = vector.extract_strided_slice %27 {offsets = [0, 32], sizes = [8, 32], strides = [1, 1]} : vector<8x96xf32> to vector<8x32xf32>
    %30 = vector.extract_strided_slice %27 {offsets = [0, 64], sizes = [8, 32], strides = [1, 1]} : vector<8x96xf32> to vector<8x32xf32>
    %31 = vector.extract_strided_slice %21 {offsets = [0, 96], sizes = [8, 32], strides = [1, 1]} : vector<8x128xf32> to vector<8x32xf32>
    %32 = math.tanh %31 : vector<8x32xf32>
    %33 = arith.mulf %29, %15 : vector<8x32xf32>
    %34 = arith.mulf %28, %32 : vector<8x32xf32>
    %35 = arith.addf %33, %34 : vector<8x32xf32>
    %36 = math.tanh %35 : vector<8x32xf32>
    %37 = arith.mulf %30, %36 : vector<8x32xf32>
    %c0_19 = arith.constant 0 : index
    %c0_20 = arith.constant 0 : index
    %c0_21 = arith.constant 0 : index
    %38 = vector.load %arg1[%c0_19, %c0_20, %c0_21] : memref<8x8x1xi32, #tpu.memory_space<vmem>>, vector<1x8x1xi32>
    %39 = vector.shape_cast %38 : vector<1x8x1xi32> to vector<8x1xi32>
    %c0_i32 = arith.constant 0 : i32
    %40 = vector.broadcast %c0_i32 : i32 to vector<8x1xi32>
    %41 = arith.cmpi ne, %39, %40 : vector<8x1xi32>
    %42 = vector.shape_cast %41 : vector<8x1xi1> to vector<8x1xi1>
    %43 = vector.broadcast %42 : vector<8x1xi1> to vector<8x32xi1>
    %44 = arith.select %43, %37, %14 : vector<8x32xi1>, vector<8x32xf32>
    %45 = vector.shape_cast %41 : vector<8x1xi1> to vector<8x1xi1>
    %46 = vector.broadcast %45 : vector<8x1xi1> to vector<8x32xi1>
    %47 = arith.select %46, %35, %15 : vector<8x32xi1>, vector<8x32xf32>
    %c1 = arith.constant 1 : index
    %c0_22 = arith.constant 0 : index
    %c0_23 = arith.constant 0 : index
    %48 = vector.load %arg0[%c1, %c0_22, %c0_23] : memref<8x8x128xf32, #tpu.memory_space<vmem>>, vector<1x8x128xf32>
    %49 = vector.shape_cast %48 : vector<1x8x128xf32> to vector<8x128xf32>
    %50 = arith.truncf %44 : vector<8x32xf32> to vector<8x32xbf16>
    %cst_24 = arith.constant dense<0.000000e+00> : vector<8x128xf32>
    %51 = tpu.matmul %50, %0, %cst_24 {dimension_numbers = #tpu.dot_dimension_numbers<[1], [0], [0], [1], [0, 0, 1, 1], [], []>} : vector<8x32xbf16>, vector<32x128xbf16>, vector<8x128xf32> -> vector<8x128xf32>
    %52 = arith.addf %49, %51 : vector<8x128xf32>
    %53 = arith.addf %52, %6 : vector<8x128xf32>
    %54 = vector.extract_strided_slice %53 {offsets = [0, 0], sizes = [8, 96], strides = [1, 1]} : vector<8x128xf32> to vector<8x96xf32>
    %55 = arith.negf %54 : vector<8x96xf32>
    %56 = math.exp %55 : vector<8x96xf32>
    %cst_25 = arith.constant 1.000000e+00 : f32
    %57 = vector.broadcast %cst_25 : f32 to vector<8x96xf32>
    %58 = arith.addf %57, %56 : vector<8x96xf32>
    %59 = arith.divf %57, %58 : vector<8x96xf32>
    %60 = vector.extract_strided_slice %59 {offsets = [0, 0], sizes = [8, 32], strides = [1, 1]} : vector<8x96xf32> to vector<8x32xf32>
    %61 = vector.extract_strided_slice %59 {offsets = [0, 32], sizes = [8, 32], strides = [1, 1]} : vector<8x96xf32> to vector<8x32xf32>
    %62 = vector.extract_strided_slice %59 {offsets = [0, 64], sizes = [8, 32], strides = [1, 1]} : vector<8x96xf32> to vector<8x32xf32>
    %63 = vector.extract_strided_slice %53 {offsets = [0, 96], sizes = [8, 32], strides = [1, 1]} : vector<8x128xf32> to vector<8x32xf32>
    %64 = math.tanh %63 : vector<8x32xf32>
    %65 = arith.mulf %61, %47 : vector<8x32xf32>
    %66 = arith.mulf %60, %64 : vector<8x32xf32>
    %67 = arith.addf %65, %66 : vector<8x32xf32>
    %68 = math.tanh %67 : vector<8x32xf32>
    %69 = arith.mulf %62, %68 : vector<8x32xf32>
    %c1_26 = arith.constant 1 : index
    %c0_27 = arith.constant 0 : index
    %c0_28 = arith.constant 0 : index
    %70 = vector.load %arg1[%c1_26, %c0_27, %c0_28] : memref<8x8x1xi32, #tpu.memory_space<vmem>>, vector<1x8x1xi32>
    %71 = vector.shape_cast %70 : vector<1x8x1xi32> to vector<8x1xi32>
    %c0_i32_29 = arith.constant 0 : i32
    %72 = vector.broadcast %c0_i32_29 : i32 to vector<8x1xi32>
    %73 = arith.cmpi ne, %71, %72 : vector<8x1xi32>
    %74 = vector.shape_cast %73 : vector<8x1xi1> to vector<8x1xi1>
    %75 = vector.broadcast %74 : vector<8x1xi1> to vector<8x32xi1>
    %76 = arith.select %75, %69, %44 : vector<8x32xi1>, vector<8x32xf32>
    %77 = vector.shape_cast %73 : vector<8x1xi1> to vector<8x1xi1>
    %78 = vector.broadcast %77 : vector<8x1xi1> to vector<8x32xi1>
    %79 = arith.select %78, %67, %47 : vector<8x32xi1>, vector<8x32xf32>
    %c2 = arith.constant 2 : index
    %c0_30 = arith.constant 0 : index
    %c0_31 = arith.constant 0 : index
    %80 = vector.load %arg0[%c2, %c0_30, %c0_31] : memref<8x8x128xf32, #tpu.memory_space<vmem>>, vector<1x8x128xf32>
    %81 = vector.shape_cast %80 : vector<1x8x128xf32> to vector<8x128xf32>
    %82 = arith.truncf %76 : vector<8x32xf32> to vector<8x32xbf16>
    %cst_32 = arith.constant dense<0.000000e+00> : vector<8x128xf32>
    %83 = tpu.matmul %82, %0, %cst_32 {dimension_numbers = #tpu.dot_dimension_numbers<[1], [0], [0], [1], [0, 0, 1, 1], [], []>} : vector<8x32xbf16>, vector<32x128xbf16>, vector<8x128xf32> -> vector<8x128xf32>
    %84 = arith.addf %81, %83 : vector<8x128xf32>
    %85 = arith.addf %84, %6 : vector<8x128xf32>
    %86 = vector.extract_strided_slice %85 {offsets = [0, 0], sizes = [8, 96], strides = [1, 1]} : vector<8x128xf32> to vector<8x96xf32>
    %87 = arith.negf %86 : vector<8x96xf32>
    %88 = math.exp %87 : vector<8x96xf32>
    %cst_33 = arith.constant 1.000000e+00 : f32
    %89 = vector.broadcast %cst_33 : f32 to vector<8x96xf32>
    %90 = arith.addf %89, %88 : vector<8x96xf32>
    %91 = arith.divf %89, %90 : vector<8x96xf32>
    %92 = vector.extract_strided_slice %91 {offsets = [0, 0], sizes = [8, 32], strides = [1, 1]} : vector<8x96xf32> to vector<8x32xf32>
    %93 = vector.extract_strided_slice %91 {offsets = [0, 32], sizes = [8, 32], strides = [1, 1]} : vector<8x96xf32> to vector<8x32xf32>
    %94 = vector.extract_strided_slice %91 {offsets = [0, 64], sizes = [8, 32], strides = [1, 1]} : vector<8x96xf32> to vector<8x32xf32>
    %95 = vector.extract_strided_slice %85 {offsets = [0, 96], sizes = [8, 32], strides = [1, 1]} : vector<8x128xf32> to vector<8x32xf32>
    %96 = math.tanh %95 : vector<8x32xf32>
    %97 = arith.mulf %93, %79 : vector<8x32xf32>
    %98 = arith.mulf %92, %96 : vector<8x32xf32>
    %99 = arith.addf %97, %98 : vector<8x32xf32>
    %100 = math.tanh %99 : vector<8x32xf32>
    %101 = arith.mulf %94, %100 : vector<8x32xf32>
    %c2_34 = arith.constant 2 : index
    %c0_35 = arith.constant 0 : index
    %c0_36 = arith.constant 0 : index
    %102 = vector.load %arg1[%c2_34, %c0_35, %c0_36] : memref<8x8x1xi32, #tpu.memory_space<vmem>>, vector<1x8x1xi32>
    %103 = vector.shape_cast %102 : vector<1x8x1xi32> to vector<8x1xi32>
    %c0_i32_37 = arith.constant 0 : i32
    %104 = vector.broadcast %c0_i32_37 : i32 to vector<8x1xi32>
    %105 = arith.cmpi ne, %103, %104 : vector<8x1xi32>
    %106 = vector.shape_cast %105 : vector<8x1xi1> to vector<8x1xi1>
    %107 = vector.broadcast %106 : vector<8x1xi1> to vector<8x32xi1>
    %108 = arith.select %107, %101, %76 : vector<8x32xi1>, vector<8x32xf32>
    %109 = vector.shape_cast %105 : vector<8x1xi1> to vector<8x1xi1>
    %110 = vector.broadcast %109 : vector<8x1xi1> to vector<8x32xi1>
    %111 = arith.select %110, %99, %79 : vector<8x32xi1>, vector<8x32xf32>
    %c3 = arith.constant 3 : index
    %c0_38 = arith.constant 0 : index
    %c0_39 = arith.constant 0 : index
    %112 = vector.load %arg0[%c3, %c0_38, %c0_39] : memref<8x8x128xf32, #tpu.memory_space<vmem>>, vector<1x8x128xf32>
    %113 = vector.shape_cast %112 : vector<1x8x128xf32> to vector<8x128xf32>
    %114 = arith.truncf %108 : vector<8x32xf32> to vector<8x32xbf16>
    %cst_40 = arith.constant dense<0.000000e+00> : vector<8x128xf32>
    %115 = tpu.matmul %114, %0, %cst_40 {dimension_numbers = #tpu.dot_dimension_numbers<[1], [0], [0], [1], [0, 0, 1, 1], [], []>} : vector<8x32xbf16>, vector<32x128xbf16>, vector<8x128xf32> -> vector<8x128xf32>
    %116 = arith.addf %113, %115 : vector<8x128xf32>
    %117 = arith.addf %116, %6 : vector<8x128xf32>
    %118 = vector.extract_strided_slice %117 {offsets = [0, 0], sizes = [8, 96], strides = [1, 1]} : vector<8x128xf32> to vector<8x96xf32>
    %119 = arith.negf %118 : vector<8x96xf32>
    %120 = math.exp %119 : vector<8x96xf32>
    %cst_41 = arith.constant 1.000000e+00 : f32
    %121 = vector.broadcast %cst_41 : f32 to vector<8x96xf32>
    %122 = arith.addf %121, %120 : vector<8x96xf32>
    %123 = arith.divf %121, %122 : vector<8x96xf32>
    %124 = vector.extract_strided_slice %123 {offsets = [0, 0], sizes = [8, 32], strides = [1, 1]} : vector<8x96xf32> to vector<8x32xf32>
    %125 = vector.extract_strided_slice %123 {offsets = [0, 32], sizes = [8, 32], strides = [1, 1]} : vector<8x96xf32> to vector<8x32xf32>
    %126 = vector.extract_strided_slice %123 {offsets = [0, 64], sizes = [8, 32], strides = [1, 1]} : vector<8x96xf32> to vector<8x32xf32>
    %127 = vector.extract_strided_slice %117 {offsets = [0, 96], sizes = [8, 32], strides = [1, 1]} : vector<8x128xf32> to vector<8x32xf32>
    %128 = math.tanh %127 : vector<8x32xf32>
    %129 = arith.mulf %125, %111 : vector<8x32xf32>
    %130 = arith.mulf %124, %128 : vector<8x32xf32>
    %131 = arith.addf %129, %130 : vector<8x32xf32>
    %132 = math.tanh %131 : vector<8x32xf32>
    %133 = arith.mulf %126, %132 : vector<8x32xf32>
    %c3_42 = arith.constant 3 : index
    %c0_43 = arith.constant 0 : index
    %c0_44 = arith.constant 0 : index
    %134 = vector.load %arg1[%c3_42, %c0_43, %c0_44] : memref<8x8x1xi32, #tpu.memory_space<vmem>>, vector<1x8x1xi32>
    %135 = vector.shape_cast %134 : vector<1x8x1xi32> to vector<8x1xi32>
    %c0_i32_45 = arith.constant 0 : i32
    %136 = vector.broadcast %c0_i32_45 : i32 to vector<8x1xi32>
    %137 = arith.cmpi ne, %135, %136 : vector<8x1xi32>
    %138 = vector.shape_cast %137 : vector<8x1xi1> to vector<8x1xi1>
    %139 = vector.broadcast %138 : vector<8x1xi1> to vector<8x32xi1>
    %140 = arith.select %139, %133, %108 : vector<8x32xi1>, vector<8x32xf32>
    %141 = vector.shape_cast %137 : vector<8x1xi1> to vector<8x1xi1>
    %142 = vector.broadcast %141 : vector<8x1xi1> to vector<8x32xi1>
    %143 = arith.select %142, %131, %111 : vector<8x32xi1>, vector<8x32xf32>
    %c4 = arith.constant 4 : index
    %c0_46 = arith.constant 0 : index
    %c0_47 = arith.constant 0 : index
    %144 = vector.load %arg0[%c4, %c0_46, %c0_47] : memref<8x8x128xf32, #tpu.memory_space<vmem>>, vector<1x8x128xf32>
    %145 = vector.shape_cast %144 : vector<1x8x128xf32> to vector<8x128xf32>
    %146 = arith.truncf %140 : vector<8x32xf32> to vector<8x32xbf16>
    %cst_48 = arith.constant dense<0.000000e+00> : vector<8x128xf32>
    %147 = tpu.matmul %146, %0, %cst_48 {dimension_numbers = #tpu.dot_dimension_numbers<[1], [0], [0], [1], [0, 0, 1, 1], [], []>} : vector<8x32xbf16>, vector<32x128xbf16>, vector<8x128xf32> -> vector<8x128xf32>
    %148 = arith.addf %145, %147 : vector<8x128xf32>
    %149 = arith.addf %148, %6 : vector<8x128xf32>
    %150 = vector.extract_strided_slice %149 {offsets = [0, 0], sizes = [8, 96], strides = [1, 1]} : vector<8x128xf32> to vector<8x96xf32>
    %151 = arith.negf %150 : vector<8x96xf32>
    %152 = math.exp %151 : vector<8x96xf32>
    %cst_49 = arith.constant 1.000000e+00 : f32
    %153 = vector.broadcast %cst_49 : f32 to vector<8x96xf32>
    %154 = arith.addf %153, %152 : vector<8x96xf32>
    %155 = arith.divf %153, %154 : vector<8x96xf32>
    %156 = vector.extract_strided_slice %155 {offsets = [0, 0], sizes = [8, 32], strides = [1, 1]} : vector<8x96xf32> to vector<8x32xf32>
    %157 = vector.extract_strided_slice %155 {offsets = [0, 32], sizes = [8, 32], strides = [1, 1]} : vector<8x96xf32> to vector<8x32xf32>
    %158 = vector.extract_strided_slice %155 {offsets = [0, 64], sizes = [8, 32], strides = [1, 1]} : vector<8x96xf32> to vector<8x32xf32>
    %159 = vector.extract_strided_slice %149 {offsets = [0, 96], sizes = [8, 32], strides = [1, 1]} : vector<8x128xf32> to vector<8x32xf32>
    %160 = math.tanh %159 : vector<8x32xf32>
    %161 = arith.mulf %157, %143 : vector<8x32xf32>
    %162 = arith.mulf %156, %160 : vector<8x32xf32>
    %163 = arith.addf %161, %162 : vector<8x32xf32>
    %164 = math.tanh %163 : vector<8x32xf32>
    %165 = arith.mulf %158, %164 : vector<8x32xf32>
    %c4_50 = arith.constant 4 : index
    %c0_51 = arith.constant 0 : index
    %c0_52 = arith.constant 0 : index
    %166 = vector.load %arg1[%c4_50, %c0_51, %c0_52] : memref<8x8x1xi32, #tpu.memory_space<vmem>>, vector<1x8x1xi32>
    %167 = vector.shape_cast %166 : vector<1x8x1xi32> to vector<8x1xi32>
    %c0_i32_53 = arith.constant 0 : i32
    %168 = vector.broadcast %c0_i32_53 : i32 to vector<8x1xi32>
    %169 = arith.cmpi ne, %167, %168 : vector<8x1xi32>
    %170 = vector.shape_cast %169 : vector<8x1xi1> to vector<8x1xi1>
    %171 = vector.broadcast %170 : vector<8x1xi1> to vector<8x32xi1>
    %172 = arith.select %171, %165, %140 : vector<8x32xi1>, vector<8x32xf32>
    %173 = vector.shape_cast %169 : vector<8x1xi1> to vector<8x1xi1>
    %174 = vector.broadcast %173 : vector<8x1xi1> to vector<8x32xi1>
    %175 = arith.select %174, %163, %143 : vector<8x32xi1>, vector<8x32xf32>
    %c5 = arith.constant 5 : index
    %c0_54 = arith.constant 0 : index
    %c0_55 = arith.constant 0 : index
    %176 = vector.load %arg0[%c5, %c0_54, %c0_55] : memref<8x8x128xf32, #tpu.memory_space<vmem>>, vector<1x8x128xf32>
    %177 = vector.shape_cast %176 : vector<1x8x128xf32> to vector<8x128xf32>
    %178 = arith.truncf %172 : vector<8x32xf32> to vector<8x32xbf16>
    %cst_56 = arith.constant dense<0.000000e+00> : vector<8x128xf32>
    %179 = tpu.matmul %178, %0, %cst_56 {dimension_numbers = #tpu.dot_dimension_numbers<[1], [0], [0], [1], [0, 0, 1, 1], [], []>} : vector<8x32xbf16>, vector<32x128xbf16>, vector<8x128xf32> -> vector<8x128xf32>
    %180 = arith.addf %177, %179 : vector<8x128xf32>
    %181 = arith.addf %180, %6 : vector<8x128xf32>
    %182 = vector.extract_strided_slice %181 {offsets = [0, 0], sizes = [8, 96], strides = [1, 1]} : vector<8x128xf32> to vector<8x96xf32>
    %183 = arith.negf %182 : vector<8x96xf32>
    %184 = math.exp %183 : vector<8x96xf32>
    %cst_57 = arith.constant 1.000000e+00 : f32
    %185 = vector.broadcast %cst_57 : f32 to vector<8x96xf32>
    %186 = arith.addf %185, %184 : vector<8x96xf32>
    %187 = arith.divf %185, %186 : vector<8x96xf32>
    %188 = vector.extract_strided_slice %187 {offsets = [0, 0], sizes = [8, 32], strides = [1, 1]} : vector<8x96xf32> to vector<8x32xf32>
    %189 = vector.extract_strided_slice %187 {offsets = [0, 32], sizes = [8, 32], strides = [1, 1]} : vector<8x96xf32> to vector<8x32xf32>
    %190 = vector.extract_strided_slice %187 {offsets = [0, 64], sizes = [8, 32], strides = [1, 1]} : vector<8x96xf32> to vector<8x32xf32>
    %191 = vector.extract_strided_slice %181 {offsets = [0, 96], sizes = [8, 32], strides = [1, 1]} : vector<8x128xf32> to vector<8x32xf32>
    %192 = math.tanh %191 : vector<8x32xf32>
    %193 = arith.mulf %189, %175 : vector<8x32xf32>
    %194 = arith.mulf %188, %192 : vector<8x32xf32>
    %195 = arith.addf %193, %194 : vector<8x32xf32>
    %196 = math.tanh %195 : vector<8x32xf32>
    %197 = arith.mulf %190, %196 : vector<8x32xf32>
    %c5_58 = arith.constant 5 : index
    %c0_59 = arith.constant 0 : index
    %c0_60 = arith.constant 0 : index
    %198 = vector.load %arg1[%c5_58, %c0_59, %c0_60] : memref<8x8x1xi32, #tpu.memory_space<vmem>>, vector<1x8x1xi32>
    %199 = vector.shape_cast %198 : vector<1x8x1xi32> to vector<8x1xi32>
    %c0_i32_61 = arith.constant 0 : i32
    %200 = vector.broadcast %c0_i32_61 : i32 to vector<8x1xi32>
    %201 = arith.cmpi ne, %199, %200 : vector<8x1xi32>
    %202 = vector.shape_cast %201 : vector<8x1xi1> to vector<8x1xi1>
    %203 = vector.broadcast %202 : vector<8x1xi1> to vector<8x32xi1>
    %204 = arith.select %203, %197, %172 : vector<8x32xi1>, vector<8x32xf32>
    %205 = vector.shape_cast %201 : vector<8x1xi1> to vector<8x1xi1>
    %206 = vector.broadcast %205 : vector<8x1xi1> to vector<8x32xi1>
    %207 = arith.select %206, %195, %175 : vector<8x32xi1>, vector<8x32xf32>
    %c6 = arith.constant 6 : index
    %c0_62 = arith.constant 0 : index
    %c0_63 = arith.constant 0 : index
    %208 = vector.load %arg0[%c6, %c0_62, %c0_63] : memref<8x8x128xf32, #tpu.memory_space<vmem>>, vector<1x8x128xf32>
    %209 = vector.shape_cast %208 : vector<1x8x128xf32> to vector<8x128xf32>
    %210 = arith.truncf %204 : vector<8x32xf32> to vector<8x32xbf16>
    %cst_64 = arith.constant dense<0.000000e+00> : vector<8x128xf32>
    %211 = tpu.matmul %210, %0, %cst_64 {dimension_numbers = #tpu.dot_dimension_numbers<[1], [0], [0], [1], [0, 0, 1, 1], [], []>} : vector<8x32xbf16>, vector<32x128xbf16>, vector<8x128xf32> -> vector<8x128xf32>
    %212 = arith.addf %209, %211 : vector<8x128xf32>
    %213 = arith.addf %212, %6 : vector<8x128xf32>
    %214 = vector.extract_strided_slice %213 {offsets = [0, 0], sizes = [8, 96], strides = [1, 1]} : vector<8x128xf32> to vector<8x96xf32>
    %215 = arith.negf %214 : vector<8x96xf32>
    %216 = math.exp %215 : vector<8x96xf32>
    %cst_65 = arith.constant 1.000000e+00 : f32
    %217 = vector.broadcast %cst_65 : f32 to vector<8x96xf32>
    %218 = arith.addf %217, %216 : vector<8x96xf32>
    %219 = arith.divf %217, %218 : vector<8x96xf32>
    %220 = vector.extract_strided_slice %219 {offsets = [0, 0], sizes = [8, 32], strides = [1, 1]} : vector<8x96xf32> to vector<8x32xf32>
    %221 = vector.extract_strided_slice %219 {offsets = [0, 32], sizes = [8, 32], strides = [1, 1]} : vector<8x96xf32> to vector<8x32xf32>
    %222 = vector.extract_strided_slice %219 {offsets = [0, 64], sizes = [8, 32], strides = [1, 1]} : vector<8x96xf32> to vector<8x32xf32>
    %223 = vector.extract_strided_slice %213 {offsets = [0, 96], sizes = [8, 32], strides = [1, 1]} : vector<8x128xf32> to vector<8x32xf32>
    %224 = math.tanh %223 : vector<8x32xf32>
    %225 = arith.mulf %221, %207 : vector<8x32xf32>
    %226 = arith.mulf %220, %224 : vector<8x32xf32>
    %227 = arith.addf %225, %226 : vector<8x32xf32>
    %228 = math.tanh %227 : vector<8x32xf32>
    %229 = arith.mulf %222, %228 : vector<8x32xf32>
    %c6_66 = arith.constant 6 : index
    %c0_67 = arith.constant 0 : index
    %c0_68 = arith.constant 0 : index
    %230 = vector.load %arg1[%c6_66, %c0_67, %c0_68] : memref<8x8x1xi32, #tpu.memory_space<vmem>>, vector<1x8x1xi32>
    %231 = vector.shape_cast %230 : vector<1x8x1xi32> to vector<8x1xi32>
    %c0_i32_69 = arith.constant 0 : i32
    %232 = vector.broadcast %c0_i32_69 : i32 to vector<8x1xi32>
    %233 = arith.cmpi ne, %231, %232 : vector<8x1xi32>
    %234 = vector.shape_cast %233 : vector<8x1xi1> to vector<8x1xi1>
    %235 = vector.broadcast %234 : vector<8x1xi1> to vector<8x32xi1>
    %236 = arith.select %235, %229, %204 : vector<8x32xi1>, vector<8x32xf32>
    %237 = vector.shape_cast %233 : vector<8x1xi1> to vector<8x1xi1>
    %238 = vector.broadcast %237 : vector<8x1xi1> to vector<8x32xi1>
    %239 = arith.select %238, %227, %207 : vector<8x32xi1>, vector<8x32xf32>
    %c7 = arith.constant 7 : index
    %c0_70 = arith.constant 0 : index
    %c0_71 = arith.constant 0 : index
    %240 = vector.load %arg0[%c7, %c0_70, %c0_71] : memref<8x8x128xf32, #tpu.memory_space<vmem>>, vector<1x8x128xf32>
    %241 = vector.shape_cast %240 : vector<1x8x128xf32> to vector<8x128xf32>
    %242 = arith.truncf %236 : vector<8x32xf32> to vector<8x32xbf16>
    %cst_72 = arith.constant dense<0.000000e+00> : vector<8x128xf32>
    %243 = tpu.matmul %242, %0, %cst_72 {dimension_numbers = #tpu.dot_dimension_numbers<[1], [0], [0], [1], [0, 0, 1, 1], [], []>} : vector<8x32xbf16>, vector<32x128xbf16>, vector<8x128xf32> -> vector<8x128xf32>
    %244 = arith.addf %241, %243 : vector<8x128xf32>
    %245 = arith.addf %244, %6 : vector<8x128xf32>
    %246 = vector.extract_strided_slice %245 {offsets = [0, 0], sizes = [8, 96], strides = [1, 1]} : vector<8x128xf32> to vector<8x96xf32>
    %247 = arith.negf %246 : vector<8x96xf32>
    %248 = math.exp %247 : vector<8x96xf32>
    %cst_73 = arith.constant 1.000000e+00 : f32
    %249 = vector.broadcast %cst_73 : f32 to vector<8x96xf32>
    %250 = arith.addf %249, %248 : vector<8x96xf32>
    %251 = arith.divf %249, %250 : vector<8x96xf32>
    %252 = vector.extract_strided_slice %251 {offsets = [0, 0], sizes = [8, 32], strides = [1, 1]} : vector<8x96xf32> to vector<8x32xf32>
    %253 = vector.extract_strided_slice %251 {offsets = [0, 32], sizes = [8, 32], strides = [1, 1]} : vector<8x96xf32> to vector<8x32xf32>
    %254 = vector.extract_strided_slice %251 {offsets = [0, 64], sizes = [8, 32], strides = [1, 1]} : vector<8x96xf32> to vector<8x32xf32>
    %255 = vector.extract_strided_slice %245 {offsets = [0, 96], sizes = [8, 32], strides = [1, 1]} : vector<8x128xf32> to vector<8x32xf32>
    %256 = math.tanh %255 : vector<8x32xf32>
    %257 = arith.mulf %253, %239 : vector<8x32xf32>
    %258 = arith.mulf %252, %256 : vector<8x32xf32>
    %259 = arith.addf %257, %258 : vector<8x32xf32>
    %260 = math.tanh %259 : vector<8x32xf32>
    %261 = arith.mulf %254, %260 : vector<8x32xf32>
    %c7_74 = arith.constant 7 : index
    %c0_75 = arith.constant 0 : index
    %c0_76 = arith.constant 0 : index
    %262 = vector.load %arg1[%c7_74, %c0_75, %c0_76] : memref<8x8x1xi32, #tpu.memory_space<vmem>>, vector<1x8x1xi32>
    %263 = vector.shape_cast %262 : vector<1x8x1xi32> to vector<8x1xi32>
    %c0_i32_77 = arith.constant 0 : i32
    %264 = vector.broadcast %c0_i32_77 : i32 to vector<8x1xi32>
    %265 = arith.cmpi ne, %263, %264 : vector<8x1xi32>
    %266 = vector.shape_cast %265 : vector<8x1xi1> to vector<8x1xi1>
    %267 = vector.broadcast %266 : vector<8x1xi1> to vector<8x32xi1>
    %268 = arith.select %267, %261, %236 : vector<8x32xi1>, vector<8x32xf32>
    %269 = vector.shape_cast %265 : vector<8x1xi1> to vector<8x1xi1>
    %270 = vector.broadcast %269 : vector<8x1xi1> to vector<8x32xi1>
    %271 = arith.select %270, %259, %239 : vector<8x32xi1>, vector<8x32xf32>
    %cst_78 = arith.constant 0.000000e+00 : f32
    %272 = vector.broadcast %cst_78 : f32 to vector<8x128xf32>
    %c0_79 = arith.constant 0 : index
    %c0_80 = arith.constant 0 : index
    %c0_81 = arith.constant 0 : index
    %273 = vector.load %arg11[%c0_79, %c0_80, %c0_81] : memref<8x8x128xf32, #tpu.memory_space<vmem>>, vector<1x8x128xf32>
    %274 = vector.shape_cast %273 : vector<1x8x128xf32> to vector<8x128xf32>
    %275 = vector.shape_cast %272 : vector<8x128xf32> to vector<1x8x128xf32>
    tpu.vector_store %arg11[%c0_79, %c0_80, %c0_81], %275 {strides = array<i32>} : memref<8x8x128xf32, #tpu.memory_space<vmem>>, vector<1x8x128xf32>,
    %c0_82 = arith.constant 0 : index
    %c0_83 = arith.constant 0 : index
    %c0_84 = arith.constant 0 : index
    %276 = vector.load %arg2[%c0_82, %c0_83, %c0_84] : memref<8x8x128xf32, #tpu.memory_space<vmem>>, vector<1x8x128xf32>
    %277 = vector.shape_cast %276 : vector<1x8x128xf32> to vector<8x128xf32>
    %c0_85 = arith.constant 0 : index
    %c0_86 = arith.constant 0 : index
    %278 = vector.load %arg12[%c0_85, %c0_86] : memref<8x128xf32, #tpu.memory_space<vmem>>, vector<8x128xf32>
    tpu.vector_store %arg12[%c0_85, %c0_86], %277 {strides = array<i32>} : memref<8x128xf32, #tpu.memory_space<vmem>>, vector<8x128xf32>,
    %c0_87 = arith.constant 0 : index
    %c0_88 = arith.constant 0 : index
    %279 = vector.load %arg12[%c0_87, %c0_88] : memref<8x128xf32, #tpu.memory_space<vmem>>, vector<8x128xf32>
    %280 = arith.truncf %268 : vector<8x32xf32> to vector<8x32xbf16>
    %cst_89 = arith.constant dense<0.000000e+00> : vector<8x128xf32>
    %281 = tpu.matmul %280, %1, %cst_89 {dimension_numbers = #tpu.dot_dimension_numbers<[1], [0], [0], [1], [0, 0, 1, 1], [], []>} : vector<8x32xbf16>, vector<32x128xbf16>, vector<8x128xf32> -> vector<8x128xf32>
    %282 = arith.addf %279, %281 : vector<8x128xf32>
    %283 = arith.addf %282, %9 : vector<8x128xf32>
    %284 = vector.extract_strided_slice %283 {offsets = [0, 0], sizes = [8, 96], strides = [1, 1]} : vector<8x128xf32> to vector<8x96xf32>
    %285 = arith.negf %284 : vector<8x96xf32>
    %286 = math.exp %285 : vector<8x96xf32>
    %cst_90 = arith.constant 1.000000e+00 : f32
    %287 = vector.broadcast %cst_90 : f32 to vector<8x96xf32>
    %288 = arith.addf %287, %286 : vector<8x96xf32>
    %289 = arith.divf %287, %288 : vector<8x96xf32>
    %290 = vector.extract_strided_slice %289 {offsets = [0, 0], sizes = [8, 32], strides = [1, 1]} : vector<8x96xf32> to vector<8x32xf32>
    %291 = vector.extract_strided_slice %289 {offsets = [0, 32], sizes = [8, 32], strides = [1, 1]} : vector<8x96xf32> to vector<8x32xf32>
    %292 = vector.extract_strided_slice %289 {offsets = [0, 64], sizes = [8, 32], strides = [1, 1]} : vector<8x96xf32> to vector<8x32xf32>
    %293 = vector.extract_strided_slice %283 {offsets = [0, 96], sizes = [8, 32], strides = [1, 1]} : vector<8x128xf32> to vector<8x32xf32>
    %294 = math.tanh %293 : vector<8x32xf32>
    %295 = arith.mulf %291, %271 : vector<8x32xf32>
    %296 = arith.mulf %290, %294 : vector<8x32xf32>
    %297 = arith.addf %295, %296 : vector<8x32xf32>
    %298 = math.tanh %297 : vector<8x32xf32>
    %299 = arith.mulf %292, %298 : vector<8x32xf32>
    %300 = arith.truncf %299 : vector<8x32xf32> to vector<8x32xbf16>
    %cst_91 = arith.constant dense<0.000000e+00> : vector<8x128xf32>
    %301 = tpu.matmul %300, %3, %cst_91 {dimension_numbers = #tpu.dot_dimension_numbers<[1], [0], [0], [1], [0, 0, 1, 1], [], []>} : vector<8x32xbf16>, vector<32x128xbf16>, vector<8x128xf32> -> vector<8x128xf32>
    %302 = arith.addf %301, %12 : vector<8x128xf32>
    %c1_92 = arith.constant 1 : index
    %c0_93 = arith.constant 0 : index
    %c0_94 = arith.constant 0 : index
    %303 = vector.load %arg11[%c1_92, %c0_93, %c0_94] : memref<8x8x128xf32, #tpu.memory_space<vmem>>, vector<1x8x128xf32>
    %304 = vector.shape_cast %303 : vector<1x8x128xf32> to vector<8x128xf32>
    %305 = vector.shape_cast %302 : vector<8x128xf32> to vector<1x8x128xf32>
    tpu.vector_store %arg11[%c1_92, %c0_93, %c0_94], %305 {strides = array<i32>} : memref<8x8x128xf32, #tpu.memory_space<vmem>>, vector<1x8x128xf32>,
    %c1_95 = arith.constant 1 : index
    %c0_96 = arith.constant 0 : index
    %c0_97 = arith.constant 0 : index
    %306 = vector.load %arg2[%c1_95, %c0_96, %c0_97] : memref<8x8x128xf32, #tpu.memory_space<vmem>>, vector<1x8x128xf32>
    %307 = vector.shape_cast %306 : vector<1x8x128xf32> to vector<8x128xf32>
    %c0_98 = arith.constant 0 : index
    %c0_99 = arith.constant 0 : index
    %308 = vector.load %arg12[%c0_98, %c0_99] : memref<8x128xf32, #tpu.memory_space<vmem>>, vector<8x128xf32>
    tpu.vector_store %arg12[%c0_98, %c0_99], %307 {strides = array<i32>} : memref<8x128xf32, #tpu.memory_space<vmem>>, vector<8x128xf32>,
    %c1_100 = arith.constant 1 : index
    %309 = memref.load %arg3[%c1_100] : memref<8xi32, #tpu.memory_space<smem>>
    %c0_i32_101 = arith.constant 0 : i32
    %310 = arith.cmpi eq, %309, %c0_i32_101 : i32
    %311 = arith.extui %310 : i1 to i32
    %c0_i32_102 = arith.constant 0 : i32
    %312 = arith.cmpi ne, %311, %c0_i32_102 : i32
    scf.if %312 {
      %cst_191 = arith.constant dense<0xFF800000> : vector<8xf32>
      %510 = vector.multi_reduction <maximumf>, %302, %cst_191 [1] : vector<8x128xf32> to vector<8xf32>
      %511 = vector.shape_cast %510 : vector<8xf32> to vector<8x1xf32>
      %512 = vector.broadcast %511 : vector<8x1xf32> to vector<8x128xf32>
      %513 = arith.cmpf oeq, %302, %512 : vector<8x128xf32>
      %c128_i32 = arith.constant 128 : i32
      %514 = vector.broadcast %c128_i32 : i32 to vector<8x128xi32>
      %515 = arith.select %513, %13, %514 : vector<8x128xi1>, vector<8x128xi32>
      %cst_192 = arith.constant dense<2147483647> : vector<8xi32>
      %516 = vector.multi_reduction <minsi>, %515, %cst_192 [1] : vector<8x128xi32> to vector<8xi32>
      %517 = vector.shape_cast %516 : vector<8xi32> to vector<8x1xi32>
      %518 = vector.broadcast %517 : vector<8x1xi32> to vector<8x128xi32>
      %519 = arith.cmpi eq, %13, %518 : vector<8x128xi32>
      %520 = arith.extui %519 : vector<8x128xi1> to vector<8x128xi32>
      %521 = arith.sitofp %520 : vector<8x128xi32> to vector<8x128xf32>
      %522 = arith.truncf %521 : vector<8x128xf32> to vector<8x128xbf16>
      %cst_193 = arith.constant dense<0.000000e+00> : vector<8x128xf32>
      %523 = tpu.matmul %522, %2, %cst_193 {dimension_numbers = #tpu.dot_dimension_numbers<[1], [0], [0], [1], [0, 0, 1, 1], [], []>} : vector<8x128xbf16>, vector<128x128xbf16>, vector<8x128xf32> -> vector<8x128xf32>
      %c0_194 = arith.constant 0 : index
      %c0_195 = arith.constant 0 : index
      %524 = vector.load %arg12[%c0_194, %c0_195] : memref<8x128xf32, #tpu.memory_space<vmem>>, vector<8x128xf32>
      tpu.vector_store %arg12[%c0_194, %c0_195], %523 {strides = array<i32>} : memref<8x128xf32, #tpu.memory_space<vmem>>, vector<8x128xf32>,
    } else {
    }
    %c0_103 = arith.constant 0 : index
    %c0_104 = arith.constant 0 : index
    %313 = vector.load %arg12[%c0_103, %c0_104] : memref<8x128xf32, #tpu.memory_space<vmem>>, vector<8x128xf32>
    %314 = arith.truncf %299 : vector<8x32xf32> to vector<8x32xbf16>
    %cst_105 = arith.constant dense<0.000000e+00> : vector<8x128xf32>
    %315 = tpu.matmul %314, %1, %cst_105 {dimension_numbers = #tpu.dot_dimension_numbers<[1], [0], [0], [1], [0, 0, 1, 1], [], []>} : vector<8x32xbf16>, vector<32x128xbf16>, vector<8x128xf32> -> vector<8x128xf32>
    %316 = arith.addf %313, %315 : vector<8x128xf32>
    %317 = arith.addf %316, %9 : vector<8x128xf32>
    %318 = vector.extract_strided_slice %317 {offsets = [0, 0], sizes = [8, 96], strides = [1, 1]} : vector<8x128xf32> to vector<8x96xf32>
    %319 = arith.negf %318 : vector<8x96xf32>
    %320 = math.exp %319 : vector<8x96xf32>
    %cst_106 = arith.constant 1.000000e+00 : f32
    %321 = vector.broadcast %cst_106 : f32 to vector<8x96xf32>
    %322 = arith.addf %321, %320 : vector<8x96xf32>
    %323 = arith.divf %321, %322 : vector<8x96xf32>
    %324 = vector.extract_strided_slice %323 {offsets = [0, 0], sizes = [8, 32], strides = [1, 1]} : vector<8x96xf32> to vector<8x32xf32>
    %325 = vector.extract_strided_slice %323 {offsets = [0, 32], sizes = [8, 32], strides = [1, 1]} : vector<8x96xf32> to vector<8x32xf32>
    %326 = vector.extract_strided_slice %323 {offsets = [0, 64], sizes = [8, 32], strides = [1, 1]} : vector<8x96xf32> to vector<8x32xf32>
    %327 = vector.extract_strided_slice %317 {offsets = [0, 96], sizes = [8, 32], strides = [1, 1]} : vector<8x128xf32> to vector<8x32xf32>
    %328 = math.tanh %327 : vector<8x32xf32>
    %329 = arith.mulf %325, %297 : vector<8x32xf32>
    %330 = arith.mulf %324, %328 : vector<8x32xf32>
    %331 = arith.addf %329, %330 : vector<8x32xf32>
    %332 = math.tanh %331 : vector<8x32xf32>
    %333 = arith.mulf %326, %332 : vector<8x32xf32>
    %334 = arith.truncf %333 : vector<8x32xf32> to vector<8x32xbf16>
    %cst_107 = arith.constant dense<0.000000e+00> : vector<8x128xf32>
    %335 = tpu.matmul %334, %3, %cst_107 {dimension_numbers = #tpu.dot_dimension_numbers<[1], [0], [0], [1], [0, 0, 1, 1], [], []>} : vector<8x32xbf16>, vector<32x128xbf16>, vector<8x128xf32> -> vector<8x128xf32>
    %336 = arith.addf %335, %12 : vector<8x128xf32>
    %c2_108 = arith.constant 2 : index
    %c0_109 = arith.constant 0 : index
    %c0_110 = arith.constant 0 : index
    %337 = vector.load %arg11[%c2_108, %c0_109, %c0_110] : memref<8x8x128xf32, #tpu.memory_space<vmem>>, vector<1x8x128xf32>
    %338 = vector.shape_cast %337 : vector<1x8x128xf32> to vector<8x128xf32>
    %339 = vector.shape_cast %336 : vector<8x128xf32> to vector<1x8x128xf32>
    tpu.vector_store %arg11[%c2_108, %c0_109, %c0_110], %339 {strides = array<i32>} : memref<8x8x128xf32, #tpu.memory_space<vmem>>, vector<1x8x128xf32>,
    %c2_111 = arith.constant 2 : index
    %c0_112 = arith.constant 0 : index
    %c0_113 = arith.constant 0 : index
    %340 = vector.load %arg2[%c2_111, %c0_112, %c0_113] : memref<8x8x128xf32, #tpu.memory_space<vmem>>, vector<1x8x128xf32>
    %341 = vector.shape_cast %340 : vector<1x8x128xf32> to vector<8x128xf32>
    %c0_114 = arith.constant 0 : index
    %c0_115 = arith.constant 0 : index
    %342 = vector.load %arg12[%c0_114, %c0_115] : memref<8x128xf32, #tpu.memory_space<vmem>>, vector<8x128xf32>
    tpu.vector_store %arg12[%c0_114, %c0_115], %341 {strides = array<i32>} : memref<8x128xf32, #tpu.memory_space<vmem>>, vector<8x128xf32>,
    %c2_116 = arith.constant 2 : index
    %343 = memref.load %arg3[%c2_116] : memref<8xi32, #tpu.memory_space<smem>>
    %c0_i32_117 = arith.constant 0 : i32
    %344 = arith.cmpi eq, %343, %c0_i32_117 : i32
    %345 = arith.extui %344 : i1 to i32
    %c0_i32_118 = arith.constant 0 : i32
    %346 = arith.cmpi ne, %345, %c0_i32_118 : i32
    scf.if %346 {
      %cst_191 = arith.constant dense<0xFF800000> : vector<8xf32>
      %510 = vector.multi_reduction <maximumf>, %336, %cst_191 [1] : vector<8x128xf32> to vector<8xf32>
      %511 = vector.shape_cast %510 : vector<8xf32> to vector<8x1xf32>
      %512 = vector.broadcast %511 : vector<8x1xf32> to vector<8x128xf32>
      %513 = arith.cmpf oeq, %336, %512 : vector<8x128xf32>
      %c128_i32 = arith.constant 128 : i32
      %514 = vector.broadcast %c128_i32 : i32 to vector<8x128xi32>
      %515 = arith.select %513, %13, %514 : vector<8x128xi1>, vector<8x128xi32>
      %cst_192 = arith.constant dense<2147483647> : vector<8xi32>
      %516 = vector.multi_reduction <minsi>, %515, %cst_192 [1] : vector<8x128xi32> to vector<8xi32>
      %517 = vector.shape_cast %516 : vector<8xi32> to vector<8x1xi32>
      %518 = vector.broadcast %517 : vector<8x1xi32> to vector<8x128xi32>
      %519 = arith.cmpi eq, %13, %518 : vector<8x128xi32>
      %520 = arith.extui %519 : vector<8x128xi1> to vector<8x128xi32>
      %521 = arith.sitofp %520 : vector<8x128xi32> to vector<8x128xf32>
      %522 = arith.truncf %521 : vector<8x128xf32> to vector<8x128xbf16>
      %cst_193 = arith.constant dense<0.000000e+00> : vector<8x128xf32>
      %523 = tpu.matmul %522, %2, %cst_193 {dimension_numbers = #tpu.dot_dimension_numbers<[1], [0], [0], [1], [0, 0, 1, 1], [], []>} : vector<8x128xbf16>, vector<128x128xbf16>, vector<8x128xf32> -> vector<8x128xf32>
      %c0_194 = arith.constant 0 : index
      %c0_195 = arith.constant 0 : index
      %524 = vector.load %arg12[%c0_194, %c0_195] : memref<8x128xf32, #tpu.memory_space<vmem>>, vector<8x128xf32>
      tpu.vector_store %arg12[%c0_194, %c0_195], %523 {strides = array<i32>} : memref<8x128xf32, #tpu.memory_space<vmem>>, vector<8x128xf32>,
    } else {
    }
    %c0_119 = arith.constant 0 : index
    %c0_120 = arith.constant 0 : index
    %347 = vector.load %arg12[%c0_119, %c0_120] : memref<8x128xf32, #tpu.memory_space<vmem>>, vector<8x128xf32>
    %348 = arith.truncf %333 : vector<8x32xf32> to vector<8x32xbf16>
    %cst_121 = arith.constant dense<0.000000e+00> : vector<8x128xf32>
    %349 = tpu.matmul %348, %1, %cst_121 {dimension_numbers = #tpu.dot_dimension_numbers<[1], [0], [0], [1], [0, 0, 1, 1], [], []>} : vector<8x32xbf16>, vector<32x128xbf16>, vector<8x128xf32> -> vector<8x128xf32>
    %350 = arith.addf %347, %349 : vector<8x128xf32>
    %351 = arith.addf %350, %9 : vector<8x128xf32>
    %352 = vector.extract_strided_slice %351 {offsets = [0, 0], sizes = [8, 96], strides = [1, 1]} : vector<8x128xf32> to vector<8x96xf32>
    %353 = arith.negf %352 : vector<8x96xf32>
    %354 = math.exp %353 : vector<8x96xf32>
    %cst_122 = arith.constant 1.000000e+00 : f32
    %355 = vector.broadcast %cst_122 : f32 to vector<8x96xf32>
    %356 = arith.addf %355, %354 : vector<8x96xf32>
    %357 = arith.divf %355, %356 : vector<8x96xf32>
    %358 = vector.extract_strided_slice %357 {offsets = [0, 0], sizes = [8, 32], strides = [1, 1]} : vector<8x96xf32> to vector<8x32xf32>
    %359 = vector.extract_strided_slice %357 {offsets = [0, 32], sizes = [8, 32], strides = [1, 1]} : vector<8x96xf32> to vector<8x32xf32>
    %360 = vector.extract_strided_slice %357 {offsets = [0, 64], sizes = [8, 32], strides = [1, 1]} : vector<8x96xf32> to vector<8x32xf32>
    %361 = vector.extract_strided_slice %351 {offsets = [0, 96], sizes = [8, 32], strides = [1, 1]} : vector<8x128xf32> to vector<8x32xf32>
    %362 = math.tanh %361 : vector<8x32xf32>
    %363 = arith.mulf %359, %331 : vector<8x32xf32>
    %364 = arith.mulf %358, %362 : vector<8x32xf32>
    %365 = arith.addf %363, %364 : vector<8x32xf32>
    %366 = math.tanh %365 : vector<8x32xf32>
    %367 = arith.mulf %360, %366 : vector<8x32xf32>
    %368 = arith.truncf %367 : vector<8x32xf32> to vector<8x32xbf16>
    %cst_123 = arith.constant dense<0.000000e+00> : vector<8x128xf32>
    %369 = tpu.matmul %368, %3, %cst_123 {dimension_numbers = #tpu.dot_dimension_numbers<[1], [0], [0], [1], [0, 0, 1, 1], [], []>} : vector<8x32xbf16>, vector<32x128xbf16>, vector<8x128xf32> -> vector<8x128xf32>
    %370 = arith.addf %369, %12 : vector<8x128xf32>
    %c3_124 = arith.constant 3 : index
    %c0_125 = arith.constant 0 : index
    %c0_126 = arith.constant 0 : index
    %371 = vector.load %arg11[%c3_124, %c0_125, %c0_126] : memref<8x8x128xf32, #tpu.memory_space<vmem>>, vector<1x8x128xf32>
    %372 = vector.shape_cast %371 : vector<1x8x128xf32> to vector<8x128xf32>
    %373 = vector.shape_cast %370 : vector<8x128xf32> to vector<1x8x128xf32>
    tpu.vector_store %arg11[%c3_124, %c0_125, %c0_126], %373 {strides = array<i32>} : memref<8x8x128xf32, #tpu.memory_space<vmem>>, vector<1x8x128xf32>,
    %c3_127 = arith.constant 3 : index
    %c0_128 = arith.constant 0 : index
    %c0_129 = arith.constant 0 : index
    %374 = vector.load %arg2[%c3_127, %c0_128, %c0_129] : memref<8x8x128xf32, #tpu.memory_space<vmem>>, vector<1x8x128xf32>
    %375 = vector.shape_cast %374 : vector<1x8x128xf32> to vector<8x128xf32>
    %c0_130 = arith.constant 0 : index
    %c0_131 = arith.constant 0 : index
    %376 = vector.load %arg12[%c0_130, %c0_131] : memref<8x128xf32, #tpu.memory_space<vmem>>, vector<8x128xf32>
    tpu.vector_store %arg12[%c0_130, %c0_131], %375 {strides = array<i32>} : memref<8x128xf32, #tpu.memory_space<vmem>>, vector<8x128xf32>,
    %c3_132 = arith.constant 3 : index
    %377 = memref.load %arg3[%c3_132] : memref<8xi32, #tpu.memory_space<smem>>
    %c0_i32_133 = arith.constant 0 : i32
    %378 = arith.cmpi eq, %377, %c0_i32_133 : i32
    %379 = arith.extui %378 : i1 to i32
    %c0_i32_134 = arith.constant 0 : i32
    %380 = arith.cmpi ne, %379, %c0_i32_134 : i32
    scf.if %380 {
      %cst_191 = arith.constant dense<0xFF800000> : vector<8xf32>
      %510 = vector.multi_reduction <maximumf>, %370, %cst_191 [1] : vector<8x128xf32> to vector<8xf32>
      %511 = vector.shape_cast %510 : vector<8xf32> to vector<8x1xf32>
      %512 = vector.broadcast %511 : vector<8x1xf32> to vector<8x128xf32>
      %513 = arith.cmpf oeq, %370, %512 : vector<8x128xf32>
      %c128_i32 = arith.constant 128 : i32
      %514 = vector.broadcast %c128_i32 : i32 to vector<8x128xi32>
      %515 = arith.select %513, %13, %514 : vector<8x128xi1>, vector<8x128xi32>
      %cst_192 = arith.constant dense<2147483647> : vector<8xi32>
      %516 = vector.multi_reduction <minsi>, %515, %cst_192 [1] : vector<8x128xi32> to vector<8xi32>
      %517 = vector.shape_cast %516 : vector<8xi32> to vector<8x1xi32>
      %518 = vector.broadcast %517 : vector<8x1xi32> to vector<8x128xi32>
      %519 = arith.cmpi eq, %13, %518 : vector<8x128xi32>
      %520 = arith.extui %519 : vector<8x128xi1> to vector<8x128xi32>
      %521 = arith.sitofp %520 : vector<8x128xi32> to vector<8x128xf32>
      %522 = arith.truncf %521 : vector<8x128xf32> to vector<8x128xbf16>
      %cst_193 = arith.constant dense<0.000000e+00> : vector<8x128xf32>
      %523 = tpu.matmul %522, %2, %cst_193 {dimension_numbers = #tpu.dot_dimension_numbers<[1], [0], [0], [1], [0, 0, 1, 1], [], []>} : vector<8x128xbf16>, vector<128x128xbf16>, vector<8x128xf32> -> vector<8x128xf32>
      %c0_194 = arith.constant 0 : index
      %c0_195 = arith.constant 0 : index
      %524 = vector.load %arg12[%c0_194, %c0_195] : memref<8x128xf32, #tpu.memory_space<vmem>>, vector<8x128xf32>
      tpu.vector_store %arg12[%c0_194, %c0_195], %523 {strides = array<i32>} : memref<8x128xf32, #tpu.memory_space<vmem>>, vector<8x128xf32>,
    } else {
    }
    %c0_135 = arith.constant 0 : index
    %c0_136 = arith.constant 0 : index
    %381 = vector.load %arg12[%c0_135, %c0_136] : memref<8x128xf32, #tpu.memory_space<vmem>>, vector<8x128xf32>
    %382 = arith.truncf %367 : vector<8x32xf32> to vector<8x32xbf16>
    %cst_137 = arith.constant dense<0.000000e+00> : vector<8x128xf32>
    %383 = tpu.matmul %382, %1, %cst_137 {dimension_numbers = #tpu.dot_dimension_numbers<[1], [0], [0], [1], [0, 0, 1, 1], [], []>} : vector<8x32xbf16>, vector<32x128xbf16>, vector<8x128xf32> -> vector<8x128xf32>
    %384 = arith.addf %381, %383 : vector<8x128xf32>
    %385 = arith.addf %384, %9 : vector<8x128xf32>
    %386 = vector.extract_strided_slice %385 {offsets = [0, 0], sizes = [8, 96], strides = [1, 1]} : vector<8x128xf32> to vector<8x96xf32>
    %387 = arith.negf %386 : vector<8x96xf32>
    %388 = math.exp %387 : vector<8x96xf32>
    %cst_138 = arith.constant 1.000000e+00 : f32
    %389 = vector.broadcast %cst_138 : f32 to vector<8x96xf32>
    %390 = arith.addf %389, %388 : vector<8x96xf32>
    %391 = arith.divf %389, %390 : vector<8x96xf32>
    %392 = vector.extract_strided_slice %391 {offsets = [0, 0], sizes = [8, 32], strides = [1, 1]} : vector<8x96xf32> to vector<8x32xf32>
    %393 = vector.extract_strided_slice %391 {offsets = [0, 32], sizes = [8, 32], strides = [1, 1]} : vector<8x96xf32> to vector<8x32xf32>
    %394 = vector.extract_strided_slice %391 {offsets = [0, 64], sizes = [8, 32], strides = [1, 1]} : vector<8x96xf32> to vector<8x32xf32>
    %395 = vector.extract_strided_slice %385 {offsets = [0, 96], sizes = [8, 32], strides = [1, 1]} : vector<8x128xf32> to vector<8x32xf32>
    %396 = math.tanh %395 : vector<8x32xf32>
    %397 = arith.mulf %393, %365 : vector<8x32xf32>
    %398 = arith.mulf %392, %396 : vector<8x32xf32>
    %399 = arith.addf %397, %398 : vector<8x32xf32>
    %400 = math.tanh %399 : vector<8x32xf32>
    %401 = arith.mulf %394, %400 : vector<8x32xf32>
    %402 = arith.truncf %401 : vector<8x32xf32> to vector<8x32xbf16>
    %cst_139 = arith.constant dense<0.000000e+00> : vector<8x128xf32>
    %403 = tpu.matmul %402, %3, %cst_139 {dimension_numbers = #tpu.dot_dimension_numbers<[1], [0], [0], [1], [0, 0, 1, 1], [], []>} : vector<8x32xbf16>, vector<32x128xbf16>, vector<8x128xf32> -> vector<8x128xf32>
    %404 = arith.addf %403, %12 : vector<8x128xf32>
    %c4_140 = arith.constant 4 : index
    %c0_141 = arith.constant 0 : index
    %c0_142 = arith.constant 0 : index
    %405 = vector.load %arg11[%c4_140, %c0_141, %c0_142] : memref<8x8x128xf32, #tpu.memory_space<vmem>>, vector<1x8x128xf32>
    %406 = vector.shape_cast %405 : vector<1x8x128xf32> to vector<8x128xf32>
    %407 = vector.shape_cast %404 : vector<8x128xf32> to vector<1x8x128xf32>
    tpu.vector_store %arg11[%c4_140, %c0_141, %c0_142], %407 {strides = array<i32>} : memref<8x8x128xf32, #tpu.memory_space<vmem>>, vector<1x8x128xf32>,
    %c4_143 = arith.constant 4 : index
    %c0_144 = arith.constant 0 : index
    %c0_145 = arith.constant 0 : index
    %408 = vector.load %arg2[%c4_143, %c0_144, %c0_145] : memref<8x8x128xf32, #tpu.memory_space<vmem>>, vector<1x8x128xf32>
    %409 = vector.shape_cast %408 : vector<1x8x128xf32> to vector<8x128xf32>
    %c0_146 = arith.constant 0 : index
    %c0_147 = arith.constant 0 : index
    %410 = vector.load %arg12[%c0_146, %c0_147] : memref<8x128xf32, #tpu.memory_space<vmem>>, vector<8x128xf32>
    tpu.vector_store %arg12[%c0_146, %c0_147], %409 {strides = array<i32>} : memref<8x128xf32, #tpu.memory_space<vmem>>, vector<8x128xf32>,
    %c4_148 = arith.constant 4 : index
    %411 = memref.load %arg3[%c4_148] : memref<8xi32, #tpu.memory_space<smem>>
    %c0_i32_149 = arith.constant 0 : i32
    %412 = arith.cmpi eq, %411, %c0_i32_149 : i32
    %413 = arith.extui %412 : i1 to i32
    %c0_i32_150 = arith.constant 0 : i32
    %414 = arith.cmpi ne, %413, %c0_i32_150 : i32
    scf.if %414 {
      %cst_191 = arith.constant dense<0xFF800000> : vector<8xf32>
      %510 = vector.multi_reduction <maximumf>, %404, %cst_191 [1] : vector<8x128xf32> to vector<8xf32>
      %511 = vector.shape_cast %510 : vector<8xf32> to vector<8x1xf32>
      %512 = vector.broadcast %511 : vector<8x1xf32> to vector<8x128xf32>
      %513 = arith.cmpf oeq, %404, %512 : vector<8x128xf32>
      %c128_i32 = arith.constant 128 : i32
      %514 = vector.broadcast %c128_i32 : i32 to vector<8x128xi32>
      %515 = arith.select %513, %13, %514 : vector<8x128xi1>, vector<8x128xi32>
      %cst_192 = arith.constant dense<2147483647> : vector<8xi32>
      %516 = vector.multi_reduction <minsi>, %515, %cst_192 [1] : vector<8x128xi32> to vector<8xi32>
      %517 = vector.shape_cast %516 : vector<8xi32> to vector<8x1xi32>
      %518 = vector.broadcast %517 : vector<8x1xi32> to vector<8x128xi32>
      %519 = arith.cmpi eq, %13, %518 : vector<8x128xi32>
      %520 = arith.extui %519 : vector<8x128xi1> to vector<8x128xi32>
      %521 = arith.sitofp %520 : vector<8x128xi32> to vector<8x128xf32>
      %522 = arith.truncf %521 : vector<8x128xf32> to vector<8x128xbf16>
      %cst_193 = arith.constant dense<0.000000e+00> : vector<8x128xf32>
      %523 = tpu.matmul %522, %2, %cst_193 {dimension_numbers = #tpu.dot_dimension_numbers<[1], [0], [0], [1], [0, 0, 1, 1], [], []>} : vector<8x128xbf16>, vector<128x128xbf16>, vector<8x128xf32> -> vector<8x128xf32>
      %c0_194 = arith.constant 0 : index
      %c0_195 = arith.constant 0 : index
      %524 = vector.load %arg12[%c0_194, %c0_195] : memref<8x128xf32, #tpu.memory_space<vmem>>, vector<8x128xf32>
      tpu.vector_store %arg12[%c0_194, %c0_195], %523 {strides = array<i32>} : memref<8x128xf32, #tpu.memory_space<vmem>>, vector<8x128xf32>,
    } else {
    }
    %c0_151 = arith.constant 0 : index
    %c0_152 = arith.constant 0 : index
    %415 = vector.load %arg12[%c0_151, %c0_152] : memref<8x128xf32, #tpu.memory_space<vmem>>, vector<8x128xf32>
    %416 = arith.truncf %401 : vector<8x32xf32> to vector<8x32xbf16>
    %cst_153 = arith.constant dense<0.000000e+00> : vector<8x128xf32>
    %417 = tpu.matmul %416, %1, %cst_153 {dimension_numbers = #tpu.dot_dimension_numbers<[1], [0], [0], [1], [0, 0, 1, 1], [], []>} : vector<8x32xbf16>, vector<32x128xbf16>, vector<8x128xf32> -> vector<8x128xf32>
    %418 = arith.addf %415, %417 : vector<8x128xf32>
    %419 = arith.addf %418, %9 : vector<8x128xf32>
    %420 = vector.extract_strided_slice %419 {offsets = [0, 0], sizes = [8, 96], strides = [1, 1]} : vector<8x128xf32> to vector<8x96xf32>
    %421 = arith.negf %420 : vector<8x96xf32>
    %422 = math.exp %421 : vector<8x96xf32>
    %cst_154 = arith.constant 1.000000e+00 : f32
    %423 = vector.broadcast %cst_154 : f32 to vector<8x96xf32>
    %424 = arith.addf %423, %422 : vector<8x96xf32>
    %425 = arith.divf %423, %424 : vector<8x96xf32>
    %426 = vector.extract_strided_slice %425 {offsets = [0, 0], sizes = [8, 32], strides = [1, 1]} : vector<8x96xf32> to vector<8x32xf32>
    %427 = vector.extract_strided_slice %425 {offsets = [0, 32], sizes = [8, 32], strides = [1, 1]} : vector<8x96xf32> to vector<8x32xf32>
    %428 = vector.extract_strided_slice %425 {offsets = [0, 64], sizes = [8, 32], strides = [1, 1]} : vector<8x96xf32> to vector<8x32xf32>
    %429 = vector.extract_strided_slice %419 {offsets = [0, 96], sizes = [8, 32], strides = [1, 1]} : vector<8x128xf32> to vector<8x32xf32>
    %430 = math.tanh %429 : vector<8x32xf32>
    %431 = arith.mulf %427, %399 : vector<8x32xf32>
    %432 = arith.mulf %426, %430 : vector<8x32xf32>
    %433 = arith.addf %431, %432 : vector<8x32xf32>
    %434 = math.tanh %433 : vector<8x32xf32>
    %435 = arith.mulf %428, %434 : vector<8x32xf32>
    %436 = arith.truncf %435 : vector<8x32xf32> to vector<8x32xbf16>
    %cst_155 = arith.constant dense<0.000000e+00> : vector<8x128xf32>
    %437 = tpu.matmul %436, %3, %cst_155 {dimension_numbers = #tpu.dot_dimension_numbers<[1], [0], [0], [1], [0, 0, 1, 1], [], []>} : vector<8x32xbf16>, vector<32x128xbf16>, vector<8x128xf32> -> vector<8x128xf32>
    %438 = arith.addf %437, %12 : vector<8x128xf32>
    %c5_156 = arith.constant 5 : index
    %c0_157 = arith.constant 0 : index
    %c0_158 = arith.constant 0 : index
    %439 = vector.load %arg11[%c5_156, %c0_157, %c0_158] : memref<8x8x128xf32, #tpu.memory_space<vmem>>, vector<1x8x128xf32>
    %440 = vector.shape_cast %439 : vector<1x8x128xf32> to vector<8x128xf32>
    %441 = vector.shape_cast %438 : vector<8x128xf32> to vector<1x8x128xf32>
    tpu.vector_store %arg11[%c5_156, %c0_157, %c0_158], %441 {strides = array<i32>} : memref<8x8x128xf32, #tpu.memory_space<vmem>>, vector<1x8x128xf32>,
    %c5_159 = arith.constant 5 : index
    %c0_160 = arith.constant 0 : index
    %c0_161 = arith.constant 0 : index
    %442 = vector.load %arg2[%c5_159, %c0_160, %c0_161] : memref<8x8x128xf32, #tpu.memory_space<vmem>>, vector<1x8x128xf32>
    %443 = vector.shape_cast %442 : vector<1x8x128xf32> to vector<8x128xf32>
    %c0_162 = arith.constant 0 : index
    %c0_163 = arith.constant 0 : index
    %444 = vector.load %arg12[%c0_162, %c0_163] : memref<8x128xf32, #tpu.memory_space<vmem>>, vector<8x128xf32>
    tpu.vector_store %arg12[%c0_162, %c0_163], %443 {strides = array<i32>} : memref<8x128xf32, #tpu.memory_space<vmem>>, vector<8x128xf32>,
    %c5_164 = arith.constant 5 : index
    %445 = memref.load %arg3[%c5_164] : memref<8xi32, #tpu.memory_space<smem>>
    %c0_i32_165 = arith.constant 0 : i32
    %446 = arith.cmpi eq, %445, %c0_i32_165 : i32
    %447 = arith.extui %446 : i1 to i32
    %c0_i32_166 = arith.constant 0 : i32
    %448 = arith.cmpi ne, %447, %c0_i32_166 : i32
    scf.if %448 {
      %cst_191 = arith.constant dense<0xFF800000> : vector<8xf32>
      %510 = vector.multi_reduction <maximumf>, %438, %cst_191 [1] : vector<8x128xf32> to vector<8xf32>
      %511 = vector.shape_cast %510 : vector<8xf32> to vector<8x1xf32>
      %512 = vector.broadcast %511 : vector<8x1xf32> to vector<8x128xf32>
      %513 = arith.cmpf oeq, %438, %512 : vector<8x128xf32>
      %c128_i32 = arith.constant 128 : i32
      %514 = vector.broadcast %c128_i32 : i32 to vector<8x128xi32>
      %515 = arith.select %513, %13, %514 : vector<8x128xi1>, vector<8x128xi32>
      %cst_192 = arith.constant dense<2147483647> : vector<8xi32>
      %516 = vector.multi_reduction <minsi>, %515, %cst_192 [1] : vector<8x128xi32> to vector<8xi32>
      %517 = vector.shape_cast %516 : vector<8xi32> to vector<8x1xi32>
      %518 = vector.broadcast %517 : vector<8x1xi32> to vector<8x128xi32>
      %519 = arith.cmpi eq, %13, %518 : vector<8x128xi32>
      %520 = arith.extui %519 : vector<8x128xi1> to vector<8x128xi32>
      %521 = arith.sitofp %520 : vector<8x128xi32> to vector<8x128xf32>
      %522 = arith.truncf %521 : vector<8x128xf32> to vector<8x128xbf16>
      %cst_193 = arith.constant dense<0.000000e+00> : vector<8x128xf32>
      %523 = tpu.matmul %522, %2, %cst_193 {dimension_numbers = #tpu.dot_dimension_numbers<[1], [0], [0], [1], [0, 0, 1, 1], [], []>} : vector<8x128xbf16>, vector<128x128xbf16>, vector<8x128xf32> -> vector<8x128xf32>
      %c0_194 = arith.constant 0 : index
      %c0_195 = arith.constant 0 : index
      %524 = vector.load %arg12[%c0_194, %c0_195] : memref<8x128xf32, #tpu.memory_space<vmem>>, vector<8x128xf32>
      tpu.vector_store %arg12[%c0_194, %c0_195], %523 {strides = array<i32>} : memref<8x128xf32, #tpu.memory_space<vmem>>, vector<8x128xf32>,
    } else {
    }
    %c0_167 = arith.constant 0 : index
    %c0_168 = arith.constant 0 : index
    %449 = vector.load %arg12[%c0_167, %c0_168] : memref<8x128xf32, #tpu.memory_space<vmem>>, vector<8x128xf32>
    %450 = arith.truncf %435 : vector<8x32xf32> to vector<8x32xbf16>
    %cst_169 = arith.constant dense<0.000000e+00> : vector<8x128xf32>
    %451 = tpu.matmul %450, %1, %cst_169 {dimension_numbers = #tpu.dot_dimension_numbers<[1], [0], [0], [1], [0, 0, 1, 1], [], []>} : vector<8x32xbf16>, vector<32x128xbf16>, vector<8x128xf32> -> vector<8x128xf32>
    %452 = arith.addf %449, %451 : vector<8x128xf32>
    %453 = arith.addf %452, %9 : vector<8x128xf32>
    %454 = vector.extract_strided_slice %453 {offsets = [0, 0], sizes = [8, 96], strides = [1, 1]} : vector<8x128xf32> to vector<8x96xf32>
    %455 = arith.negf %454 : vector<8x96xf32>
    %456 = math.exp %455 : vector<8x96xf32>
    %cst_170 = arith.constant 1.000000e+00 : f32
    %457 = vector.broadcast %cst_170 : f32 to vector<8x96xf32>
    %458 = arith.addf %457, %456 : vector<8x96xf32>
    %459 = arith.divf %457, %458 : vector<8x96xf32>
    %460 = vector.extract_strided_slice %459 {offsets = [0, 0], sizes = [8, 32], strides = [1, 1]} : vector<8x96xf32> to vector<8x32xf32>
    %461 = vector.extract_strided_slice %459 {offsets = [0, 32], sizes = [8, 32], strides = [1, 1]} : vector<8x96xf32> to vector<8x32xf32>
    %462 = vector.extract_strided_slice %459 {offsets = [0, 64], sizes = [8, 32], strides = [1, 1]} : vector<8x96xf32> to vector<8x32xf32>
    %463 = vector.extract_strided_slice %453 {offsets = [0, 96], sizes = [8, 32], strides = [1, 1]} : vector<8x128xf32> to vector<8x32xf32>
    %464 = math.tanh %463 : vector<8x32xf32>
    %465 = arith.mulf %461, %433 : vector<8x32xf32>
    %466 = arith.mulf %460, %464 : vector<8x32xf32>
    %467 = arith.addf %465, %466 : vector<8x32xf32>
    %468 = math.tanh %467 : vector<8x32xf32>
    %469 = arith.mulf %462, %468 : vector<8x32xf32>
    %470 = arith.truncf %469 : vector<8x32xf32> to vector<8x32xbf16>
    %cst_171 = arith.constant dense<0.000000e+00> : vector<8x128xf32>
    %471 = tpu.matmul %470, %3, %cst_171 {dimension_numbers = #tpu.dot_dimension_numbers<[1], [0], [0], [1], [0, 0, 1, 1], [], []>} : vector<8x32xbf16>, vector<32x128xbf16>, vector<8x128xf32> -> vector<8x128xf32>
    %472 = arith.addf %471, %12 : vector<8x128xf32>
    %c6_172 = arith.constant 6 : index
    %c0_173 = arith.constant 0 : index
    %c0_174 = arith.constant 0 : index
    %473 = vector.load %arg11[%c6_172, %c0_173, %c0_174] : memref<8x8x128xf32, #tpu.memory_space<vmem>>, vector<1x8x128xf32>
    %474 = vector.shape_cast %473 : vector<1x8x128xf32> to vector<8x128xf32>
    %475 = vector.shape_cast %472 : vector<8x128xf32> to vector<1x8x128xf32>
    tpu.vector_store %arg11[%c6_172, %c0_173, %c0_174], %475 {strides = array<i32>} : memref<8x8x128xf32, #tpu.memory_space<vmem>>, vector<1x8x128xf32>,
    %c6_175 = arith.constant 6 : index
    %c0_176 = arith.constant 0 : index
    %c0_177 = arith.constant 0 : index
    %476 = vector.load %arg2[%c6_175, %c0_176, %c0_177] : memref<8x8x128xf32, #tpu.memory_space<vmem>>, vector<1x8x128xf32>
    %477 = vector.shape_cast %476 : vector<1x8x128xf32> to vector<8x128xf32>
    %c0_178 = arith.constant 0 : index
    %c0_179 = arith.constant 0 : index
    %478 = vector.load %arg12[%c0_178, %c0_179] : memref<8x128xf32, #tpu.memory_space<vmem>>, vector<8x128xf32>
    tpu.vector_store %arg12[%c0_178, %c0_179], %477 {strides = array<i32>} : memref<8x128xf32, #tpu.memory_space<vmem>>, vector<8x128xf32>,
    %c6_180 = arith.constant 6 : index
    %479 = memref.load %arg3[%c6_180] : memref<8xi32, #tpu.memory_space<smem>>
    %c0_i32_181 = arith.constant 0 : i32
    %480 = arith.cmpi eq, %479, %c0_i32_181 : i32
    %481 = arith.extui %480 : i1 to i32
    %c0_i32_182 = arith.constant 0 : i32
    %482 = arith.cmpi ne, %481, %c0_i32_182 : i32
    scf.if %482 {
      %cst_191 = arith.constant dense<0xFF800000> : vector<8xf32>
      %510 = vector.multi_reduction <maximumf>, %472, %cst_191 [1] : vector<8x128xf32> to vector<8xf32>
      %511 = vector.shape_cast %510 : vector<8xf32> to vector<8x1xf32>
      %512 = vector.broadcast %511 : vector<8x1xf32> to vector<8x128xf32>
      %513 = arith.cmpf oeq, %472, %512 : vector<8x128xf32>
      %c128_i32 = arith.constant 128 : i32
      %514 = vector.broadcast %c128_i32 : i32 to vector<8x128xi32>
      %515 = arith.select %513, %13, %514 : vector<8x128xi1>, vector<8x128xi32>
      %cst_192 = arith.constant dense<2147483647> : vector<8xi32>
      %516 = vector.multi_reduction <minsi>, %515, %cst_192 [1] : vector<8x128xi32> to vector<8xi32>
      %517 = vector.shape_cast %516 : vector<8xi32> to vector<8x1xi32>
      %518 = vector.broadcast %517 : vector<8x1xi32> to vector<8x128xi32>
      %519 = arith.cmpi eq, %13, %518 : vector<8x128xi32>
      %520 = arith.extui %519 : vector<8x128xi1> to vector<8x128xi32>
      %521 = arith.sitofp %520 : vector<8x128xi32> to vector<8x128xf32>
      %522 = arith.truncf %521 : vector<8x128xf32> to vector<8x128xbf16>
      %cst_193 = arith.constant dense<0.000000e+00> : vector<8x128xf32>
      %523 = tpu.matmul %522, %2, %cst_193 {dimension_numbers = #tpu.dot_dimension_numbers<[1], [0], [0], [1], [0, 0, 1, 1], [], []>} : vector<8x128xbf16>, vector<128x128xbf16>, vector<8x128xf32> -> vector<8x128xf32>
      %c0_194 = arith.constant 0 : index
      %c0_195 = arith.constant 0 : index
      %524 = vector.load %arg12[%c0_194, %c0_195] : memref<8x128xf32, #tpu.memory_space<vmem>>, vector<8x128xf32>
      tpu.vector_store %arg12[%c0_194, %c0_195], %523 {strides = array<i32>} : memref<8x128xf32, #tpu.memory_space<vmem>>, vector<8x128xf32>,
    } else {
    }
    %c0_183 = arith.constant 0 : index
    %c0_184 = arith.constant 0 : index
    %483 = vector.load %arg12[%c0_183, %c0_184] : memref<8x128xf32, #tpu.memory_space<vmem>>, vector<8x128xf32>
    %484 = arith.truncf %469 : vector<8x32xf32> to vector<8x32xbf16>
    %cst_185 = arith.constant dense<0.000000e+00> : vector<8x128xf32>
    %485 = tpu.matmul %484, %1, %cst_185 {dimension_numbers = #tpu.dot_dimension_numbers<[1], [0], [0], [1], [0, 0, 1, 1], [], []>} : vector<8x32xbf16>, vector<32x128xbf16>, vector<8x128xf32> -> vector<8x128xf32>
    %486 = arith.addf %483, %485 : vector<8x128xf32>
    %487 = arith.addf %486, %9 : vector<8x128xf32>
    %488 = vector.extract_strided_slice %487 {offsets = [0, 0], sizes = [8, 96], strides = [1, 1]} : vector<8x128xf32> to vector<8x96xf32>
    %489 = arith.negf %488 : vector<8x96xf32>
    %490 = math.exp %489 : vector<8x96xf32>
    %cst_186 = arith.constant 1.000000e+00 : f32
    %491 = vector.broadcast %cst_186 : f32 to vector<8x96xf32>
    %492 = arith.addf %491, %490 : vector<8x96xf32>
    %493 = arith.divf %491, %492 : vector<8x96xf32>
    %494 = vector.extract_strided_slice %493 {offsets = [0, 0], sizes = [8, 32], strides = [1, 1]} : vector<8x96xf32> to vector<8x32xf32>
    %495 = vector.extract_strided_slice %493 {offsets = [0, 32], sizes = [8, 32], strides = [1, 1]} : vector<8x96xf32> to vector<8x32xf32>
    %496 = vector.extract_strided_slice %493 {offsets = [0, 64], sizes = [8, 32], strides = [1, 1]} : vector<8x96xf32> to vector<8x32xf32>
    %497 = vector.extract_strided_slice %487 {offsets = [0, 96], sizes = [8, 32], strides = [1, 1]} : vector<8x128xf32> to vector<8x32xf32>
    %498 = math.tanh %497 : vector<8x32xf32>
    %499 = arith.mulf %495, %467 : vector<8x32xf32>
    %500 = arith.mulf %494, %498 : vector<8x32xf32>
    %501 = arith.addf %499, %500 : vector<8x32xf32>
    %502 = math.tanh %501 : vector<8x32xf32>
    %503 = arith.mulf %496, %502 : vector<8x32xf32>
    %504 = arith.truncf %503 : vector<8x32xf32> to vector<8x32xbf16>
    %cst_187 = arith.constant dense<0.000000e+00> : vector<8x128xf32>
    %505 = tpu.matmul %504, %3, %cst_187 {dimension_numbers = #tpu.dot_dimension_numbers<[1], [0], [0], [1], [0, 0, 1, 1], [], []>} : vector<8x32xbf16>, vector<32x128xbf16>, vector<8x128xf32> -> vector<8x128xf32>
    %506 = arith.addf %505, %12 : vector<8x128xf32>
    %c7_188 = arith.constant 7 : index
    %c0_189 = arith.constant 0 : index
    %c0_190 = arith.constant 0 : index
    %507 = vector.load %arg11[%c7_188, %c0_189, %c0_190] : memref<8x8x128xf32, #tpu.memory_space<vmem>>, vector<1x8x128xf32>
    %508 = vector.shape_cast %507 : vector<1x8x128xf32> to vector<8x128xf32>
    %509 = vector.shape_cast %506 : vector<8x128xf32> to vector<1x8x128xf32>
    tpu.vector_store %arg11[%c7_188, %c0_189, %c0_190], %509 {strides = array<i32>} : memref<8x8x128xf32, #tpu.memory_space<vmem>>, vector<1x8x128xf32>,
    return
  }
}

</mosaic_0001>

<bundles_post_ra>
// kernel: seq2seq_forward.1
= control target key start
LH: loop header
LB: loop body
LE: loop exit
PB: predicated region body
PF: predicated region fallthrough
CT: control target
= control target key end

     0   :  { %16 = vsyncpa [#allocation4], 0  ;;  %s3813_s0 = inlined_call_operand.vmem [shape: f32[8,8,128], index: 0, kind: input, shape index: {}]   ;;  %s3814_s1 = inlined_call_operand.vmem [shape: s32[8,8,1], index: 1, kind: input, shape index: {}]   ;;  %s3815_s2 = inlined_call_operand.vmem [shape: f32[8,8,128], index: 2, kind: input, shape index: {}]   ;;  %s3816_s3 = inlined_call_operand.vmem [shape: s32[8], index: 3, kind: input, shape index: {}]   ;;  %s3817_s4 = inlined_call_operand.vmem [shape: bf16[32,128], index: 4, kind: input, shape index: {}]   ;;  %s3818_s5 = inlined_call_operand.vmem [shape: f32[1,128], index: 5, kind: input, shape index: {}]   ;;  %s3819_s6 = inlined_call_operand.vmem [shape: bf16[32,128], index: 6, kind: input, shape index: {}]   ;;  %s3820_s7 = inlined_call_operand.vmem [shape: f32[1,128], index: 7, kind: input, shape index: {}]   ;;  %s3821_s8 = inlined_call_operand.vmem [shape: bf16[128,128], index: 8, kind: input, shape index: {}]   ;;  %s3822_s9 = inlined_call_operand.vmem [shape: bf16[32,128], index: 9, kind: input, shape index: {}]   ;;  %s3823_s10 = inlined_call_operand.vmem [shape: f32[1,128], index: 10, kind: input, shape index: {}]   ;;  %s3824_s11 = inlined_call_operand.vmem [shape: f32[8,8,128], index: 11, kind: output, shape index: {}]  }
   0x1   :  { %s29_s19 = sshll.u32 %s3816_s3, 4  ;;  %s30_s19 = int_to_ptr.vmem [resolvable:$true] %s29_s19 }
   0x2   :  { %s3073_s20 = scalar_lea.vmem %s30_s19, 16  ;;  %p3078_p1 = scmp.lt.s32.totalorder %s30_s19, %s30_s19 }
   0x3   :  { %p3074_p0 = scmp.ne.s32.totalorder %s30_s19, %s3073_s20  ;;  %p3079_p2 = scmp.lt.s32.totalorder %s3073_s20, %s3073_s20 }
   0x5   :  { %p3080_p3 = por %p3079_p2, %p3078_p1 }
   0x7   :  { %p3081_p4 = pnand %p3080_p3, %p3074_p0 }
   0x9   :  { %3084 = shalt.err (!%p3081_p4)
}
   0xa   :  { %s3087_s21 = smov [#allocation3]  }
   0xb   :  { %32 = dma.vmem_to_smem %s30_s19, 16, %s3087_s21, [#allocation4]  }
   0xc   :  { %3085 = dma.done.wait [#allocation4], 16  }
   0xd   :  { %3086 = vsyncadd [#allocation4], 4294967280 }
   0xe   :  { %50 = sfence }
   0xf   :  { %v3177_v0 = vld [vmem:[%s3821_s8] sm:$0xf]  ;;  %v3182_v1 = vld [vmem:[%s3821_s8 + $0x4] sm:$0xf]  ;;  %v3187_v2 = vld [vmem:[%s3821_s8 + $0x8] sm:$0xf]  ;;  %v101_v6 = vlaneseq }
  0x10   :  { %v3192_v3 = vld [vmem:[%s3821_s8 + $0xc] sm:$0xf]  ;;  %v3197_v4 = vld [vmem:[%s3821_s8 + $0x10] sm:$0xf]  ;;  %v3202_v5 = vld [vmem:[%s3821_s8 + $0x14] sm:$0xf] }
  0x11   :  { %v3207_v7 = vld [vmem:[%s3821_s8 + $0x18] sm:$0xf]  ;;  %v3212_v8 = vld [vmem:[%s3821_s8 + $0x1c] sm:$0xf]  ;;  %v3217_v9 = vld [vmem:[%s3821_s8 + $0x20] sm:$0xf] }
  0x12   :  { %v3222_v10 = vld [vmem:[%s3821_s8 + $0x24] sm:$0xf]  ;;  %v3227_v11 = vld [vmem:[%s3821_s8 + $0x28] sm:$0xf]  ;;  %v3232_v12 = vld [vmem:[%s3821_s8 + $0x2c] sm:$0xf] }
  0x13   :  { %v3237_v13 = vld [vmem:[%s3821_s8 + $0x30] sm:$0xf]  ;;  %v3242_v14 = vld [vmem:[%s3821_s8 + $0x34] sm:$0xf]  ;;  %v3247_v15 = vld [vmem:[%s3821_s8 + $0x38] sm:$0xf] }
  0x14   :  { %v3252_v16 = vld [vmem:[%s3821_s8 + $0x3c] sm:$0xf]  ;;  %v3254_v17 = vand.u32 127, %v101_v6  ;;  %v3088_v18 = vmov 0.0   ;;  %v3264_v19 = vld [vmem:[%s3817_s4] sm:$0xff]   ;;  %vm3089_vm0 = vmmov 0  }
  0x15   :  { %2625 = vmatprep.subr.bf16.mxu0 %v3088_v18  ;;  %790 = vst [vmem:[%s3824_s11] sm:$0xff] %v3088_v18  ;;  %2633 = vmatprep.subr.bf16.mxu1 %v3088_v18  ;;  %v3275_v20 = vld [vmem:[%s3817_s4 + $0x8] sm:$0xff]   ;;  %v3090_v21 = vmov 0   ;;  %v186_v22 = vld [vmem:[%s3814_s1] sm:$0xff]  ;;  %s3091_s24 = smov 32   ;;  %vm116_vm3 = vcmask 261120   ;;  %s2398_s20 = sld [smem:[#allocation3 + $0x1]] }
  0x16   :  { %2629 = vmatprep.mubr.msk.bf16.mxu0 %vm3089_vm0, %v3088_v18  ;;  %2637 = vmatprep.mubr.msk.bf16.mxu1 %vm3089_vm0, %v3088_v18  ;;  %vm187_vm1 = vcmp.ne.s32.totalorder %v186_v22, 0  ;;  %v103_v24 = vld [vmem:[%s3813_s0] sm:$0xff]  ;;  %v2361_v49 = vld [vmem:[%s3813_s0 + $0x8] sm:$0xff] }
  0x17   :  { %2626 = vmatpush3.bf16.msra.mxu0 %v3264_v19  ;;  %2945 = vset.pattern.permute.xlu1 %v3090_v21  ;;  %v188_v23 = vsel %vm187_vm1, 1, %v3090_v21  ;;  %v3303_v25 = vld [vmem:[%s3818_s5] ss:$0 sm:$0xff]  ;;  %s3092_s5 = smov 64   ;;  %v2364_v56 = vld [vmem:[%s3814_s1 + $0x8] sm:$0xff] }
  0x18   :  { %2627 = vmatprep.subr.bf16.mxu0 %v3088_v18  ;;  %2634 = vmatpush3.bf16.msra.mxu1 %v3264_v19  ;;  %vm272_vm4 = vcmp.ne.s32.totalorder %v2364_v56, 0 }
  0x19   :  { %2635 = vmatprep.subr.bf16.mxu1 %v3088_v18  ;;  %2946 = vset.pattern.permute.xlu0 %v3090_v21  ;;  %v273_v58 = vsel %vm272_vm4, 1, %v3090_v21 }
  0x1a   :  { %190 = vperm.xlu1 %2945, %v188_v23  }
  0x1b   :  { %2628 = vmatpush3.bf16.msra.mxu0 %v3275_v20  ;;  %p2399_p5 = scmp.ne.s32.totalorder %s2398_s20, 0 }
  0x1c   :  { %2636 = vmatpush3.bf16.msra.mxu1 %v3275_v20  ;;  %2641 = vmatprep.subr.bf16.mxu0 %v3088_v18 }
  0x1d   :  { %2649 = vmatprep.subr.bf16.mxu1 %v3088_v18 }
  0x1e   :  { %2630 = vmatmul.mubr.bf16.vlgmr.msra.gmra.mrb[0].mxu0 %v3090_v21 }
  0x1f   :  { %2642 = vmatpush3.bf16.msra.mxu0 %v3264_v19  ;;  %2645 = vmatprep.mubr.msk.bf16.mxu0 %vm3089_vm0, %v3088_v18 }
  0x20   :  { %2643 = vmatprep.subr.bf16.mxu0 %v3088_v18 }
  0x23   :  { %2644 = vmatpush3.bf16.msra.mxu0 %v3275_v20 }
  0x24   :  { %2657 = vmatprep.subr.bf16.mxu0 %v3088_v18 }
  0x99   :  { %v191_v43 = vpop.permute.xlu1 %190 }
  0x9a   :  { %vm192_vm2 = vcmp.eq.s32.totalorder %v191_v43, 1 }
  0xf1   :  { %v154_v26 = vpop.f32.mrb[0].mxu0 }
  0xf2   :  { %v160_v27 = vadd.f32 %v154_v26, %v103_v24  ;;  %v2631_v28 = vpop.f32.mrb[1].mxu0 }
  0xf3   :  { %v157_v29 = vpop.f32.mrb[2].mxu0 }
  0xf4   :  { %v161_v30 = vadd.f32 %v3303_v25, %v160_v27  ;;  %v2632_v31 = vpop.f32.mrb[3].mxu0 }
  0xf6   :  { %2953 = vtanh.f32 %v161_v30  ;;  %v2360_v33 = vmul.f32 -1.442695, %v161_v30 }
  0xf8   :  { %2955 = vpow2.f32 %v2360_v33 }
 0x100   :  { %v2954_v32 = vpop.eup %2953 }
 0x101   :  { %171 = vrot.lane.b32.xlu0 %v2954_v32, %s3091_s24 }
 0x102   :  { %v2956_v34 = vpop.eup %2955 }
 0x103   :  { %v165_v35 = vadd.f32 1.0, %v2956_v34  ;;  %v2365_v34 = vld [vmem:[%s3813_s0 + $0x10] sm:$0xff] }
 0x105   :  { %2957 = vrcp.f32 %v165_v35 }
 0x10f   :  { %v2958_v36 = vpop.eup %2957 }
 0x110   :  { %v169_v39 = vmul.f32 0.0, %v2958_v36 }
 0x173   :  { %v172_v37 = vpop.permute.xlu0 %171 }
 0x174   :  { %v174_v38 = vmul.f32 %v2958_v36, %v172_v37 }
 0x176   :  { %176 = vrot.lane.b32.xlu0 %v174_v38, %s3091_s24 }
 0x1e8   :  { %v177_v40 = vpop.permute.xlu0 %176 }
 0x1e9   :  { %v179_v41 = vadd.f32 %v177_v40, %v169_v39 }
 0x1eb   :  { %2959 = vtanh.f32 %v179_v41  ;;  %v194_v22 = vsel %vm192_vm2, %v179_v41, 0.0  ;;  %v2368_v41 = vld [vmem:[%s3814_s1 + $0x10] sm:$0xff] }
 0x1ec   :  { %vm357_vm6 = vcmp.ne.s32.totalorder %v2368_v41, 0 }
 0x1ed   :  { %v358_v43 = vsel %vm357_vm6, 1, %v3090_v21  ;;  %vm3094_vm6 = vmmov (!%p2399_p5), 0  }
 0x1f5   :  { %v2960_v42 = vpop.eup %2959 }
 0x1f6   :  { %182 = vrot.lane.b32.xlu1 %v2960_v42, %s3091_s24 }
 0x268   :  { %v183_v44 = vpop.permute.xlu1 %182 }
 0x269   :  { %v185_v45 = vmul.f32 %v2958_v36, %v183_v44 }
 0x26b   :  { %v193_v46 = vsel %vm192_vm2, %v185_v45, 0.0 }
 0x26c   :  { %v197_v47 = vpack.c.bf16 %v193_v46, %v193_v46 }
 0x26e   :  { %199 = vrot.lane.b32.xlu0 %v197_v47, %s3092_s5 }
 0x2e0   :  { %v200_v48 = vpop.permute.xlu0 %199 }
 0x2e1   :  { %2638 = vmatmul.mubr.msk.bf16.vlgmr.msra.gmra.mrb[0].mxu1 %vm116_vm3, %v200_v48 }
 0x2e2   :  { %2650 = vmatpush3.bf16.msra.mxu1 %v3264_v19  ;;  %2653 = vmatprep.mubr.msk.bf16.mxu1 %vm3089_vm0, %v3088_v18 }
 0x2e3   :  { %2651 = vmatprep.subr.bf16.mxu1 %v3088_v18 }
 0x2e6   :  { %2652 = vmatpush3.bf16.msra.mxu1 %v3275_v20 }
 0x2e7   :  { %2665 = vmatprep.subr.bf16.mxu1 %v3088_v18 }
 0x3b4   :  { %v238_v50 = vpop.f32.mrb[0].mxu1 }
 0x3b5   :  { %v244_v51 = vadd.f32 %v2361_v49, %v238_v50  ;;  %v2639_v52 = vpop.f32.mrb[1].mxu1 }
 0x3b6   :  { %v241_v53 = vpop.f32.mrb[2].mxu1 }
 0x3b7   :  { %v245_v54 = vadd.f32 %v3303_v25, %v244_v51  ;;  %v2640_v55 = vpop.f32.mrb[3].mxu1 }
 0x3b9   :  { %2961 = vtanh.f32 %v245_v54  ;;  %v2363_v59 = vmul.f32 -1.442695, %v245_v54 }
 0x3bb   :  { %2963 = vpow2.f32 %v2363_v59 }
 0x3c3   :  { %v2962_v57 = vpop.eup %2961 }
 0x3c4   :  { %255 = vrot.lane.b32.xlu1 %v2962_v57, %s3091_s24 }
 0x3c5   :  { %v2964_v60 = vpop.eup %2963 }
 0x3c6   :  { %v249_v61 = vadd.f32 1.0, %v2964_v60 }
 0x3c8   :  { %275 = vperm.xlu1 %2945, %v273_v58   ;;  %2965 = vrcp.f32 %v249_v61  ;;  %v2369_v61 = vld [vmem:[%s3813_s0 + $0x18] sm:$0xff] }
 0x3d2   :  { %v2966_v62 = vpop.eup %2965 }
 0x3d3   :  { %v253_v23 = vmul.f32 %v2966_v62, %v194_v22 }
 0x436   :  { %v256_v63 = vpop.permute.xlu1 %255 }
 0x437   :  { %v258_v6 = vmul.f32 %v2966_v62, %v256_v63 }
 0x439   :  { %260 = vrot.lane.b32.xlu0 %v258_v6, %s3091_s24 }
 0x447   :  { %v276_v28 = vpop.permute.xlu1 %275 }
 0x448   :  { %vm277_vm5 = vcmp.eq.s32.totalorder %v276_v28, 1 }
 0x4ab   :  { %v261_v24 = vpop.permute.xlu0 %260 }
 0x4ac   :  { %v263_v26 = vadd.f32 %v261_v24, %v253_v23 }
 0x4ae   :  { %2967 = vtanh.f32 %v263_v26  ;;  %v279_v50 = vsel %vm277_vm5, %v263_v26, %v194_v22  ;;  %v2372_v26 = vld [vmem:[%s3814_s1 + $0x18] sm:$0xff] }
 0x4af   :  { %vm442_vm8 = vcmp.ne.s32.totalorder %v2372_v26, 0 }
 0x4b0   :  { %v443_v28 = vsel %vm442_vm8, 1, %v3090_v21 }
 0x4b8   :  { %v2968_v27 = vpop.eup %2967 }
 0x4b9   :  { %266 = vrot.lane.b32.xlu0 %v2968_v27, %s3091_s24 }
 0x52b   :  { %v267_v29 = vpop.permute.xlu0 %266 }
 0x52c   :  { %v269_v30 = vmul.f32 %v2966_v62, %v267_v29 }
 0x52e   :  { %v278_v31 = vsel %vm277_vm5, %v269_v30, %v193_v46 }
 0x52f   :  { %v282_v32 = vpack.c.bf16 %v278_v31, %v278_v31 }
 0x531   :  { %284 = vrot.lane.b32.xlu1 %v282_v32, %s3092_s5 }
 0x5a3   :  { %v285_v33 = vpop.permute.xlu1 %284 }
 0x5a4   :  { %2646 = vmatmul.mubr.msk.bf16.vlgmr.msra.gmra.mrb[4].mxu0 %vm116_vm3, %v285_v33 }
 0x5a5   :  { %2658 = vmatpush3.bf16.msra.mxu0 %v3264_v19  ;;  %2661 = vmatprep.mubr.msk.bf16.mxu0 %vm3089_vm0, %v3088_v18 }
 0x5a6   :  { %2659 = vmatprep.subr.bf16.mxu0 %v3088_v18 }
 0x5a9   :  { %2660 = vmatpush3.bf16.msra.mxu0 %v3275_v20 }
 0x5aa   :  { %2673 = vmatprep.subr.bf16.mxu0 %v3088_v18 }
 0x677   :  { %v323_v35 = vpop.f32.mrb[4].mxu0 }
 0x678   :  { %v329_v36 = vadd.f32 %v2365_v34, %v323_v35  ;;  %v2647_v37 = vpop.f32.mrb[5].mxu0 }
 0x679   :  { %v326_v38 = vpop.f32.mrb[6].mxu0 }
 0x67a   :  { %v330_v39 = vadd.f32 %v3303_v25, %v329_v36  ;;  %v2648_v40 = vpop.f32.mrb[7].mxu0 }
 0x67c   :  { %2969 = vtanh.f32 %v330_v39  ;;  %v2367_v44 = vmul.f32 -1.442695, %v330_v39 }
 0x67e   :  { %2971 = vpow2.f32 %v2367_v44 }
 0x686   :  { %v2970_v42 = vpop.eup %2969 }
 0x687   :  { %340 = vrot.lane.b32.xlu0 %v2970_v42, %s3091_s24 }
 0x688   :  { %v2972_v45 = vpop.eup %2971 }
 0x689   :  { %v334_v46 = vadd.f32 1.0, %v2972_v45 }
 0x68b   :  { %360 = vperm.xlu0 %2946, %v358_v43   ;;  %2973 = vrcp.f32 %v334_v46  ;;  %v2373_v46 = vld [vmem:[%s3813_s0 + $0x20] sm:$0xff] }
 0x695   :  { %v2974_v47 = vpop.eup %2973 }
 0x696   :  { %v338_v51 = vmul.f32 %v2974_v47, %v279_v50 }
 0x6f9   :  { %v341_v48 = vpop.permute.xlu0 %340 }
 0x6fa   :  { %v343_v49 = vmul.f32 %v2974_v47, %v341_v48 }
 0x6fc   :  { %345 = vrot.lane.b32.xlu1 %v343_v49, %s3091_s24 }
 0x70a   :  { %v361_v55 = vpop.permute.xlu0 %360 }
 0x70b   :  { %vm362_vm7 = vcmp.eq.s32.totalorder %v361_v55, 1 }
 0x76e   :  { %v346_v52 = vpop.permute.xlu1 %345 }
 0x76f   :  { %v348_v53 = vadd.f32 %v346_v52, %v338_v51 }
 0x771   :  { %2975 = vtanh.f32 %v348_v53  ;;  %v364_v35 = vsel %vm362_vm7, %v348_v53, %v279_v50  ;;  %v2376_v53 = vld [vmem:[%s3814_s1 + $0x20] sm:$0xff] }
 0x772   :  { %vm527_vm10 = vcmp.ne.s32.totalorder %v2376_v53, 0 }
 0x773   :  { %v528_v55 = vsel %vm527_vm10, 1, %v3090_v21 }
 0x77b   :  { %v2976_v54 = vpop.eup %2975 }
 0x77c   :  { %351 = vrot.lane.b32.xlu1 %v2976_v54, %s3091_s24 }
 0x7ee   :  { %v352_v56 = vpop.permute.xlu1 %351 }
 0x7ef   :  { %v354_v57 = vmul.f32 %v2974_v47, %v352_v56 }
 0x7f1   :  { %v363_v58 = vsel %vm362_vm7, %v354_v57, %v278_v31 }
 0x7f2   :  { %v367_v59 = vpack.c.bf16 %v363_v58, %v363_v58 }
 0x7f4   :  { %369 = vrot.lane.b32.xlu1 %v367_v59, %s3092_s5 }
 0x866   :  { %v370_v60 = vpop.permute.xlu1 %369 }
 0x867   :  { %2654 = vmatmul.mubr.msk.bf16.vlgmr.msra.gmra.mrb[4].mxu1 %vm116_vm3, %v370_v60 }
 0x868   :  { %2666 = vmatpush3.bf16.msra.mxu1 %v3264_v19  ;;  %2669 = vmatprep.mubr.msk.bf16.mxu1 %vm3089_vm0, %v3088_v18 }
 0x869   :  { %2667 = vmatprep.subr.bf16.mxu1 %v3088_v18 }
 0x86c   :  { %2668 = vmatpush3.bf16.msra.mxu1 %v3275_v20 }
 0x86d   :  { %2681 = vmatprep.subr.bf16.mxu1 %v3088_v18 }
 0x93a   :  { %v408_v62 = vpop.f32.mrb[4].mxu1 }
 0x93b   :  { %v414_v63 = vadd.f32 %v2369_v61, %v408_v62  ;;  %v2655_v6 = vpop.f32.mrb[5].mxu1 }
 0x93c   :  { %v411_v22 = vpop.f32.mrb[6].mxu1 }
 0x93d   :  { %v415_v23 = vadd.f32 %v3303_v25, %v414_v63  ;;  %v2656_v24 = vpop.f32.mrb[7].mxu1 }
 0x93f   :  { %2977 = vtanh.f32 %v415_v23  ;;  %v2371_v29 = vmul.f32 -1.442695, %v415_v23 }
 0x941   :  { %2979 = vpow2.f32 %v2371_v29 }
 0x949   :  { %v2978_v27 = vpop.eup %2977 }
 0x94a   :  { %425 = vrot.lane.b32.xlu0 %v2978_v27, %s3091_s24 }
 0x94b   :  { %v2980_v30 = vpop.eup %2979 }
 0x94c   :  { %v419_v31 = vadd.f32 1.0, %v2980_v30 }
 0x94e   :  { %445 = vperm.xlu0 %2946, %v443_v28   ;;  %2981 = vrcp.f32 %v419_v31  ;;  %v2377_v31 = vld [vmem:[%s3813_s0 + $0x28] sm:$0xff] }
 0x958   :  { %v2982_v32 = vpop.eup %2981 }
 0x959   :  { %v423_v36 = vmul.f32 %v2982_v32, %v364_v35 }
 0x9bc   :  { %v426_v33 = vpop.permute.xlu0 %425 }
 0x9bd   :  { %v428_v34 = vmul.f32 %v2982_v32, %v426_v33 }
 0x9bf   :  { %430 = vrot.lane.b32.xlu1 %v428_v34, %s3091_s24 }
 0x9cd   :  { %v446_v40 = vpop.permute.xlu0 %445 }
 0x9ce   :  { %vm447_vm9 = vcmp.eq.s32.totalorder %v446_v40, 1 }
 0xa31   :  { %v431_v37 = vpop.permute.xlu1 %430 }
 0xa32   :  { %v433_v38 = vadd.f32 %v431_v37, %v423_v36  ;;  %v2380_v37 = vld [vmem:[%s3814_s1 + $0x28] sm:$0xff] }
 0xa33   :  { %vm612_vm12 = vcmp.ne.s32.totalorder %v2380_v37, 0 }
 0xa34   :  { %2983 = vtanh.f32 %v433_v38  ;;  %v449_v62 = vsel %vm447_vm9, %v433_v38, %v364_v35  ;;  %v613_v38 = vsel %vm612_vm12, 1, %v3090_v21 }
 0xa3e   :  { %v2984_v39 = vpop.eup %2983 }
 0xa3f   :  { %436 = vrot.lane.b32.xlu1 %v2984_v39, %s3091_s24 }
 0xab1   :  { %v437_v41 = vpop.permute.xlu1 %436 }
 0xab2   :  { %v439_v42 = vmul.f32 %v2982_v32, %v437_v41 }
 0xab4   :  { %v448_v43 = vsel %vm447_vm9, %v439_v42, %v363_v58 }
 0xab5   :  { %v452_v44 = vpack.c.bf16 %v448_v43, %v448_v43 }
 0xab7   :  { %454 = vrot.lane.b32.xlu0 %v452_v44, %s3092_s5 }
 0xb29   :  { %v455_v45 = vpop.permute.xlu0 %454 }
 0xb2a   :  { %2662 = vmatmul.mubr.msk.bf16.vlgmr.msra.gmra.mrb[8].mxu0 %vm116_vm3, %v455_v45 }
 0xb2b   :  { %2674 = vmatpush3.bf16.msra.mxu0 %v3264_v19  ;;  %2677 = vmatprep.mubr.msk.bf16.mxu0 %vm3089_vm0, %v3088_v18 }
 0xb2c   :  { %2675 = vmatprep.subr.bf16.mxu0 %v3088_v18 }
 0xb2f   :  { %2676 = vmatpush3.bf16.msra.mxu0 %v3275_v20 }
 0xb30   :  { %2689 = vmatprep.subr.bf16.mxu0 %v3088_v18 }
 0xbfd   :  { %v493_v47 = vpop.f32.mrb[8].mxu0 }
 0xbfe   :  { %v499_v48 = vadd.f32 %v2373_v46, %v493_v47  ;;  %v2663_v49 = vpop.f32.mrb[9].mxu0 }
 0xbff   :  { %v496_v50 = vpop.f32.mrb[10].mxu0 }
 0xc00   :  { %v500_v51 = vadd.f32 %v3303_v25, %v499_v48  ;;  %v2664_v52 = vpop.f32.mrb[11].mxu0 }
 0xc02   :  { %2985 = vtanh.f32 %v500_v51  ;;  %v2375_v56 = vmul.f32 -1.442695, %v500_v51 }
 0xc04   :  { %2987 = vpow2.f32 %v2375_v56  ;;  %v2381_v56 = vld [vmem:[%s3813_s0 + $0x30] sm:$0xff] }
 0xc0c   :  { %v2986_v54 = vpop.eup %2985 }
 0xc0d   :  { %510 = vrot.lane.b32.xlu1 %v2986_v54, %s3091_s24 }
 0xc0e   :  { %v2988_v57 = vpop.eup %2987 }
 0xc0f   :  { %v504_v58 = vadd.f32 1.0, %v2988_v57 }
 0xc11   :  { %530 = vperm.xlu1 %2945, %v528_v55   ;;  %2989 = vrcp.f32 %v504_v58 }
 0xc1b   :  { %v2990_v59 = vpop.eup %2989 }
 0xc1c   :  { %v508_v63 = vmul.f32 %v2990_v59, %v449_v62 }
 0xc7f   :  { %v511_v60 = vpop.permute.xlu1 %510 }
 0xc80   :  { %v513_v61 = vmul.f32 %v2990_v59, %v511_v60 }
 0xc82   :  { %515 = vrot.lane.b32.xlu0 %v513_v61, %s3091_s24 }
 0xc90   :  { %v531_v24 = vpop.permute.xlu1 %530 }
 0xc91   :  { %vm532_vm11 = vcmp.eq.s32.totalorder %v531_v24, 1 }
 0xcf4   :  { %v516_v6 = vpop.permute.xlu0 %515 }
 0xcf5   :  { %v518_v22 = vadd.f32 %v516_v6, %v508_v63  ;;  %v2384_v63 = vld [vmem:[%s3814_s1 + $0x30] sm:$0xff] }
 0xcf6   :  { %vm697_vm14 = vcmp.ne.s32.totalorder %v2384_v63, 0 }
 0xcf7   :  { %2991 = vtanh.f32 %v518_v22  ;;  %v534_v45 = vsel %vm532_vm11, %v518_v22, %v449_v62  ;;  %v698_v22 = vsel %vm697_vm14, 1, %v3090_v21 }
 0xd01   :  { %v2992_v23 = vpop.eup %2991 }
 0xd02   :  { %521 = vrot.lane.b32.xlu0 %v2992_v23, %s3091_s24 }
 0xd74   :  { %v522_v26 = vpop.permute.xlu0 %521 }
 0xd75   :  { %v524_v27 = vmul.f32 %v2990_v59, %v522_v26 }
 0xd77   :  { %v533_v28 = vsel %vm532_vm11, %v524_v27, %v448_v43 }
 0xd78   :  { %v537_v29 = vpack.c.bf16 %v533_v28, %v533_v28 }
 0xd7a   :  { %539 = vrot.lane.b32.xlu1 %v537_v29, %s3092_s5 }
 0xdec   :  { %v540_v30 = vpop.permute.xlu1 %539 }
 0xded   :  { %2670 = vmatmul.mubr.msk.bf16.vlgmr.msra.gmra.mrb[8].mxu1 %vm116_vm3, %v540_v30 }
 0xdee   :  { %2682 = vmatpush3.bf16.msra.mxu1 %v3264_v19  ;;  %2685 = vmatprep.mubr.msk.bf16.mxu1 %vm3089_vm0, %v3088_v18 }
 0xdef   :  { %2683 = vmatprep.subr.bf16.mxu1 %v3088_v18 }
 0xdf2   :  { %2684 = vmatpush3.bf16.msra.mxu1 %v3275_v20 }
 0xdf3   :  { %2697 = vmatprep.subr.bf16.mxu1 %v3088_v18 }
 0xec0   :  { %v578_v32 = vpop.f32.mrb[8].mxu1 }
 0xec1   :  { %v584_v33 = vadd.f32 %v2377_v31, %v578_v32  ;;  %v2671_v34 = vpop.f32.mrb[9].mxu1 }
 0xec2   :  { %v581_v35 = vpop.f32.mrb[10].mxu1 }
 0xec3   :  { %v585_v36 = vadd.f32 %v3303_v25, %v584_v33  ;;  %v2672_v19 = vpop.f32.mrb[11].mxu1 }
 0xec5   :  { %2993 = vtanh.f32 %v585_v36  ;;  %v2379_v39 = vmul.f32 -1.442695, %v585_v36 }
 0xec7   :  { %2995 = vpow2.f32 %v2379_v39  ;;  %v2385_v39 = vld [vmem:[%s3813_s0 + $0x38] sm:$0xff] }
 0xecf   :  { %v2994_v20 = vpop.eup %2993 }
 0xed0   :  { %595 = vrot.lane.b32.xlu0 %v2994_v20, %s3091_s24 }
 0xed1   :  { %v2996_v40 = vpop.eup %2995 }
 0xed2   :  { %v589_v41 = vadd.f32 1.0, %v2996_v40 }
 0xed4   :  { %615 = vperm.xlu0 %2946, %v613_v38   ;;  %2997 = vrcp.f32 %v589_v41 }
 0xede   :  { %v2998_v42 = vpop.eup %2997 }
 0xedf   :  { %v593_v46 = vmul.f32 %v2998_v42, %v534_v45 }
 0xf42   :  { %v596_v43 = vpop.permute.xlu0 %595 }
 0xf43   :  { %v598_v44 = vmul.f32 %v2998_v42, %v596_v43 }
 0xf45   :  { %600 = vrot.lane.b32.xlu1 %v598_v44, %s3091_s24 }
 0xf53   :  { %v616_v50 = vpop.permute.xlu0 %615 }
 0xf54   :  { %vm617_vm13 = vcmp.eq.s32.totalorder %v616_v50, 1 }
 0xfb7   :  { %v601_v47 = vpop.permute.xlu1 %600 }
 0xfb8   :  { %v603_v48 = vadd.f32 %v601_v47, %v593_v46  ;;  %v2388_v46 = vld [vmem:[%s3814_s1 + $0x38] sm:$0xff] }
 0xfb9   :  { %vm782_vm1 = vcmp.ne.s32.totalorder %v2388_v46, 0 }
 0xfba   :  { %2999 = vtanh.f32 %v603_v48  ;;  %v619_v30 = vsel %vm617_vm13, %v603_v48, %v534_v45  ;;  %v783_v48 = vsel %vm782_vm1, 1, %v3090_v21  ;;  %v3450_v21 = vld [vmem:[%s3819_s6] sm:$0xff]  }
 0xfc4   :  { %v3000_v49 = vpop.eup %2999 }
 0xfc5   :  { %606 = vrot.lane.b32.xlu1 %v3000_v49, %s3091_s24 }
0x1037   :  { %v607_v51 = vpop.permute.xlu1 %606 }
0x1038   :  { %v609_v52 = vmul.f32 %v2998_v42, %v607_v51 }
0x103a   :  { %v618_v53 = vsel %vm617_vm13, %v609_v52, %v533_v28 }
0x103b   :  { %v622_v54 = vpack.c.bf16 %v618_v53, %v618_v53 }
0x103d   :  { %624 = vrot.lane.b32.xlu0 %v622_v54, %s3092_s5 }
0x10af   :  { %v625_v55 = vpop.permute.xlu0 %624 }
0x10b0   :  { %2678 = vmatmul.mubr.msk.bf16.vlgmr.msra.gmra.mrb[12].mxu0 %vm116_vm3, %v625_v55 }
0x10b1   :  { %2693 = vmatprep.mubr.msk.bf16.mxu0 %vm3089_vm0, %v3088_v18  ;;  %2690 = vmatpush3.bf16.msra.mxu0 %v3450_v21 }
0x10b2   :  { %2691 = vmatprep.subr.bf16.mxu0 %v3088_v18 }
0x1183   :  { %v663_v57 = vpop.f32.mrb[12].mxu0 }
0x1184   :  { %v669_v58 = vadd.f32 %v2381_v56, %v663_v57  ;;  %v2679_v59 = vpop.f32.mrb[13].mxu0 }
0x1185   :  { %v666_v60 = vpop.f32.mrb[14].mxu0 }
0x1186   :  { %v670_v61 = vadd.f32 %v3303_v25, %v669_v58  ;;  %v2680_v62 = vpop.f32.mrb[15].mxu0  ;;  %v3456_v58 = vld [vmem:[%s3819_s6 + $0x8] sm:$0xff]  }
0x1187   :  { %2692 = vmatpush3.bf16.msra.mxu0 %v3456_v58 }
0x1188   :  { %3001 = vtanh.f32 %v670_v61  ;;  %v2383_v23 = vmul.f32 -1.442695, %v670_v61 }
0x118a   :  { %3003 = vpow2.f32 %v2383_v23  ;;  %v2397_v23 = vld [vmem:[%s3815_s2 + $0x8] sm:$0xff] }
0x118b   :  { %942 = vst [vmem:[#allocation2] sm:$0xff] %v2397_v23 }
0x1192   :  { %v3002_v6 = vpop.eup %3001 }
0x1193   :  { %680 = vrot.lane.b32.xlu1 %v3002_v6, %s3091_s24 }
0x1194   :  { %v3004_v24 = vpop.eup %3003 }
0x1195   :  { %v674_v26 = vadd.f32 1.0, %v3004_v24  ;;  %v791_v24 = vld [vmem:[%s3815_s2] sm:$0xff] }
0x1197   :  { %700 = vperm.xlu1 %2945, %v698_v22   ;;  %3005 = vrcp.f32 %v674_v26  ;;  %v3473_v26 = vld [vmem:[%s3820_s7] ss:$0 sm:$0xff] }
0x11a1   :  { %v3006_v27 = vpop.eup %3005 }
0x11a2   :  { %v678_v31 = vmul.f32 %v3006_v27, %v619_v30 }
0x1205   :  { %v681_v28 = vpop.permute.xlu1 %680 }
0x1206   :  { %v683_v29 = vmul.f32 %v3006_v27, %v681_v28 }
0x1208   :  { %685 = vrot.lane.b32.xlu0 %v683_v29, %s3091_s24 }
0x1216   :  { %v701_v35 = vpop.permute.xlu1 %700 }
0x1217   :  { %vm702_vm15 = vcmp.eq.s32.totalorder %v701_v35, 1 }
0x127a   :  { %v686_v32 = vpop.permute.xlu0 %685 }
0x127b   :  { %v688_v33 = vadd.f32 %v686_v32, %v678_v31 }
0x127d   :  { %3007 = vtanh.f32 %v688_v33  ;;  %v704_v54 = vsel %vm702_vm15, %v688_v33, %v619_v30 }
0x1287   :  { %v3008_v34 = vpop.eup %3007 }
0x1288   :  { %691 = vrot.lane.b32.xlu0 %v3008_v34, %s3091_s24 }
0x12fa   :  { %v692_v36 = vpop.permute.xlu0 %691 }
0x12fb   :  { %v694_v19 = vmul.f32 %v3006_v27, %v692_v36 }
0x12fd   :  { %v703_v37 = vsel %vm702_vm15, %v694_v19, %v618_v53 }
0x12fe   :  { %v707_v20 = vpack.c.bf16 %v703_v37, %v703_v37 }
0x1300   :  { %709 = vrot.lane.b32.xlu1 %v707_v20, %s3092_s5 }
0x1372   :  { %v710_v38 = vpop.permute.xlu1 %709 }
0x1373   :  { %2686 = vmatmul.mubr.msk.bf16.vlgmr.msra.gmra.mrb[12].mxu1 %vm116_vm3, %v710_v38 }
0x1374   :  { %2701 = vmatprep.mubr.msk.bf16.mxu1 %vm3089_vm0, %v3088_v18 }
0x1446   :  { %v748_v40 = vpop.f32.mrb[12].mxu1 }
0x1447   :  { %v754_v41 = vadd.f32 %v2385_v39, %v748_v40  ;;  %v2687_v42 = vpop.f32.mrb[13].mxu1 }
0x1448   :  { %v751_v43 = vpop.f32.mrb[14].mxu1  ;;  %v3485_v42 = vld [vmem:[%s3822_s9] sm:$0xff]  }
0x1449   :  { %v755_v44 = vadd.f32 %v3303_v25, %v754_v41  ;;  %v2688_v45 = vpop.f32.mrb[15].mxu1  ;;  %2698 = vmatpush3.bf16.msra.mxu1 %v3485_v42  ;;  %v3491_v43 = vld [vmem:[%s3822_s9 + $0x8] sm:$0xff]  }
0x144a   :  { %2699 = vmatprep.subr.bf16.mxu1 %v3088_v18 }
0x144b   :  { %3009 = vtanh.f32 %v755_v44  ;;  %v2387_v49 = vmul.f32 -1.442695, %v755_v44 }
0x144d   :  { %3011 = vpow2.f32 %v2387_v49  ;;  %2700 = vmatpush3.bf16.msra.mxu1 %v3491_v43  ;;  %v3504_v49 = vld [vmem:[%s3823_s10] ss:$0 sm:$0xff] }
0x1455   :  { %v3010_v47 = vpop.eup %3009 }
0x1456   :  { %765 = vrot.lane.b32.xlu0 %v3010_v47, %s3091_s24 }
0x1457   :  { %v3012_v50 = vpop.eup %3011 }
0x1458   :  { %v759_v51 = vadd.f32 1.0, %v3012_v50 }
0x145a   :  { %785 = vperm.xlu0 %2946, %v783_v48   ;;  %3013 = vrcp.f32 %v759_v51 }
0x1464   :  { %v3014_v52 = vpop.eup %3013 }
0x1465   :  { %v763_v55 = vmul.f32 %v3014_v52, %v704_v54 }
0x14c8   :  { %v766_v25 = vpop.permute.xlu0 %765 }
0x14c9   :  { %v768_v53 = vmul.f32 %v3014_v52, %v766_v25 }
0x14cb   :  { %770 = vrot.lane.b32.xlu1 %v768_v53, %s3091_s24 }
0x14d9   :  { %v786_v60 = vpop.permute.xlu0 %785 }
0x14da   :  { %vm787_vm2 = vcmp.eq.s32.totalorder %v786_v60, 1  ;;  %v3093_v60 = vmov (!%p2399_p5), 0.0  }
0x14db   :  { %2705 = vmatprep.subr.bf16.mxu0 (!%p2399_p5), %v3093_v60 }
0x153d   :  { %v771_v56 = vpop.permute.xlu1 %770 }
0x153e   :  { %v773_v57 = vadd.f32 %v771_v56, %v763_v55 }
0x1540   :  { %3015 = vtanh.f32 %v773_v57  ;;  %v789_v38 = vsel %vm787_vm2, %v773_v57, %v704_v54 }
0x154a   :  { %v3016_v59 = vpop.eup %3015 }
0x154b   :  { %776 = vrot.lane.b32.xlu1 %v3016_v59, %s3091_s24  ;;  %v2401_v59 = vcombine.low (!%p2399_p5), %v3177_v0, %v3182_v1 }
0x15bd   :  { %v777_v61 = vpop.permute.xlu1 %776 }
0x15be   :  { %v779_v62 = vmul.f32 %v3014_v52, %v777_v61  ;;  %v2402_v61 = vcombine.low (!%p2399_p5), %v3187_v2, %v3192_v3 }
0x15c0   :  { %v788_v63 = vsel %vm787_vm2, %v779_v62, %v703_v37  ;;  %v2403_v62 = vcombine.low (!%p2399_p5), %v3197_v4, %v3202_v5 }
0x15c1   :  { %v794_v6 = vpack.c.bf16 %v788_v63, %v788_v63  ;;  %v2404_v63 = vcombine.low (!%p2399_p5), %v3207_v7, %v3212_v8 }
0x15c3   :  { %796 = vrot.lane.b32.xlu0 %v794_v6, %s3092_s5  ;;  %v2405_v6 = vcombine.low (!%p2399_p5), %v3217_v9, %v3222_v10 }
0x1635   :  { %v797_v22 = vpop.permute.xlu0 %796 }
0x1636   :  { %2694 = vmatmul.mubr.msk.bf16.vlgmr.msra.gmra.mrb[16].mxu0 %vm116_vm3, %v797_v22  ;;  %v2406_v22 = vcombine.low (!%p2399_p5), %v3227_v11, %v3232_v12 }
0x1637   :  { %2706 = vmatpush3.bf16.msra.mxu0 (!%p2399_p5), %v2401_v59  ;;  %2721 = vmatprep.mubr.msk.bf16.mxu0 (!%p2399_p5), %vm3094_vm6, %v3093_v60 }
0x1638   :  { %2707 = vmatprep.subr.bf16.mxu0 (!%p2399_p5), %v3093_v60 }
0x163b   :  { %2708 = vmatpush3.bf16.msra.mxu0 (!%p2399_p5), %v2402_v61 }
0x163c   :  { %2709 = vmatprep.subr.bf16.mxu0 (!%p2399_p5), %v3093_v60 }
0x163f   :  { %2710 = vmatpush3.bf16.msra.mxu0 (!%p2399_p5), %v2403_v62 }
0x1640   :  { %2711 = vmatprep.subr.bf16.mxu0 (!%p2399_p5), %v3093_v60 }
0x1643   :  { %2712 = vmatpush3.bf16.msra.mxu0 (!%p2399_p5), %v2404_v63 }
0x1644   :  { %2713 = vmatprep.subr.bf16.mxu0 (!%p2399_p5), %v3093_v60 }
0x1647   :  { %2714 = vmatpush3.bf16.msra.mxu0 (!%p2399_p5), %v2405_v6 }
0x1648   :  { %2715 = vmatprep.subr.bf16.mxu0 (!%p2399_p5), %v3093_v60 }
0x164b   :  { %2716 = vmatpush3.bf16.msra.mxu0 (!%p2399_p5), %v2406_v22 }
0x164c   :  { %2717 = vmatprep.subr.bf16.mxu0 (!%p2399_p5), %v3093_v60 }
0x1709   :  { %v847_v27 = vpop.f32.mrb[16].mxu0 }
0x170a   :  { %v853_v28 = vadd.f32 %v847_v27, %v791_v24  ;;  %v2695_v29 = vpop.f32.mrb[17].mxu0 }
0x170b   :  { %v850_v30 = vpop.f32.mrb[18].mxu0  ;;  %v2407_v29 = vcombine.low (!%p2399_p5), %v3237_v13, %v3242_v14 }
0x170c   :  { %v854_v31 = vadd.f32 %v3473_v26, %v853_v28  ;;  %v2696_v32 = vpop.f32.mrb[19].mxu0  ;;  %v2408_v30 = vcombine.low (!%p2399_p5), %v3247_v15, %v3252_v16 }
0x170d   :  { %2718 = vmatpush3.bf16.msra.mxu0 (!%p2399_p5), %v2407_v29 }
0x170e   :  { %3017 = vtanh.f32 %v854_v31  ;;  %v2392_v34 = vmul.f32 -1.442695, %v854_v31  ;;  %2719 = vmatprep.subr.bf16.mxu0 (!%p2399_p5), %v3093_v60 }
0x1710   :  { %3019 = vpow2.f32 %v2392_v34 }
0x1711   :  { %2720 = vmatpush3.bf16.msra.mxu0 (!%p2399_p5), %v2408_v30 }
0x1718   :  { %v3018_v33 = vpop.eup %3017 }
0x1719   :  { %864 = vrot.lane.b32.xlu1 %v3018_v33, %s3091_s24 }
0x171a   :  { %v3020_v35 = vpop.eup %3019 }
0x171b   :  { %v858_v36 = vadd.f32 1.0, %v3020_v35 }
0x171d   :  { %3021 = vrcp.f32 %v858_v36  ;;  %v3095_v36 = vmov (!%p2399_p5), 1.0|1.0  }
0x1727   :  { %v3022_v19 = vpop.eup %3021 }
0x1728   :  { %v862_v39 = vmul.f32 %v3022_v19, %v789_v38 }
0x178b   :  { %v865_v37 = vpop.permute.xlu1 %864 }
0x178c   :  { %v867_v20 = vmul.f32 %v3022_v19, %v865_v37 }
0x178e   :  { %869 = vrot.lane.b32.xlu0 %v867_v20, %s3091_s24 }
0x1800   :  { %v870_v40 = vpop.permute.xlu0 %869 }
0x1801   :  { %v3479_v41 = vadd.f32 %v870_v40, %v862_v39 }
0x1803   :  { %3023 = vtanh.f32 %v3479_v41 }
0x180d   :  { %v3024_v44 = vpop.eup %3023 }
0x180e   :  { %875 = vrot.lane.b32.xlu1 %v3024_v44, %s3091_s24 }
0x1880   :  { %v876_v45 = vpop.permute.xlu1 %875 }
0x1881   :  { %v878_v46 = vmul.f32 %v3022_v19, %v876_v45 }
0x1883   :  { %v879_v47 = vpack.c.bf16 %v878_v46, %v878_v46 }
0x1885   :  { %881 = vrot.lane.b32.xlu0 %v879_v47, %s3092_s5 }
0x18f7   :  { %v3497_v48 = vpop.permute.xlu0 %881 }
0x18f8   :  { %2702 = vmatmul.mubr.msk.bf16.vlgmr.msra.gmra.mrb[16].mxu1 %vm116_vm3, %v3497_v48 }
0x19c8   :  { %947 = sbr.rel (%p2399_p5) target bundleno = 7261 (0x1c5d), region = 53 }
0x19cb   :  { %v932_v50 = vpop.f32.mrb[16].mxu1 }
0x19cc   :  { %v933_v51 = vadd.f32 %v3504_v49, %v932_v50  ;;  %v2703_v52 = vpop.f32.mrb[17].mxu1 }
0x19cd   :  { %v935_v25 = vpop.f32.mrb[18].mxu1 }
0x19ce   :  { %2396 = vst [vmem:[%s3824_s11 + $0x8] sm:$0xff] %v933_v51  ;;  %v2704_v53 = vpop.f32.mrb[19].mxu1  ;;  %948 = vmax.xlane.f32.xlu0 (!%p2399_p5), %v933_v51 }
0x1a5b   :  { %v949_v54 = vpop.xlane.xlu0 %948 }
0x1a5c   :  { %vm950_vm4 = vcmp.eq.f32.partialorder %v933_v51, %v949_v54 }
0x1a5d   :  { %v951_v55 = vsel %vm950_vm4, %v3254_v17, 128 }
0x1a5e   :  { %v953_v56 = vshra.s32 %v951_v55, 16  ;;  %v952_v23 = vand.u32 65535, %v951_v55 }
0x1a60   :  { %v955_v57 = vcvt.s32.f32 %v953_v56  ;;  %v954_v27 = vcvt.s32.f32 %v952_v23 }
0x1a62   :  { %956 = vmin.xlane.f32.xlu0 %v955_v57 }
0x1aef   :  { %v957_v24 = vpop.xlane.xlu0 %956 }
0x1af0   :  { %vm958_vm5 = vcmp.eq.f32.partialorder %v955_v57, %v957_v24  ;;  %v963_v31 = vcvt.f32.s32 %v957_v24 }
0x1af1   :  { %v959_v28 = vsel %vm958_vm5, %v954_v27, inf }
0x1af2   :  { %960 = vmin.xlane.f32.xlu1 %v959_v28  ;;  %v964_v33 = vshll.u32 %v963_v31, 16 }
0x1b7f   :  { %v961_v32 = vpop.xlane.xlu1 %960 }
0x1b80   :  { %v962_v34 = vcvt.f32.s32 %v961_v32 }
0x1b82   :  { %v965_v35 = vadd.s32 %v964_v33, %v962_v34 }
0x1b84   :  { %vm966_vm7 = vcmp.eq.s32.totalorder %v3254_v17, %v965_v35 }
0x1b85   :  { %vm2409_vm8 = vmpackc.low %vm966_vm7, %vm966_vm7 }
0x1b86   :  { %2722 = vmatmul.mubr.msk.bf16.vlgmr.msra.gmra.mrb[0].mxu0 %vm2409_vm8, %v3095_v36 }
0x1c59   :  { %v1052_v19 = vpop.f32.mrb[0].mxu0 }
0x1c5a   :  { %1058 = vst [vmem:[#allocation2] sm:$0xff] %v1052_v19  ;;  %v2723_v37 = vpop.f32.mrb[1].mxu0 }
0x1c5b   :  { %v1055_v20 = vpop.f32.mrb[2].mxu0 }
0x1c5c   :  { %v2724_v38 = vpop.f32.mrb[3].mxu0 }
0x1c5d PF:  { %2725 = vmatprep.subr.bf16.mxu0 %v3088_v18  ;;  %2729 = vmatprep.mubr.msk.bf16.mxu0 %vm3089_vm0, %v3088_v18  ;;  %v2415_v40 = vld [vmem:[%s3815_s2 + $0x10] sm:$0xff]  ;;  %s2416_s25 = sld [smem:[#allocation3 + $0x2]] }
0x1c5e   :  { %2726 = vmatpush3.bf16.msra.mxu0 %v3450_v21  ;;  %2733 = vmatprep.subr.bf16.mxu1 %v3088_v18 }
0x1c5f   :  { %2727 = vmatprep.subr.bf16.mxu0 %v3088_v18  ;;  %2734 = vmatpush3.bf16.msra.mxu1 %v3485_v42 }
0x1c60   :  { %2735 = vmatprep.subr.bf16.mxu1 %v3088_v18  ;;  %2737 = vmatprep.mubr.msk.bf16.mxu1 %vm3089_vm0, %v3088_v18 }
0x1c61   :  { %v1059_v39 = vld [vmem:[#allocation2] sm:$0xff] }
0x1c62   :  { %2728 = vmatpush3.bf16.msra.mxu0 %v3456_v58  ;;  %1177 = vst [vmem:[#allocation2] sm:$0xff] %v2415_v40 }
0x1c63   :  { %2736 = vmatpush3.bf16.msra.mxu1 %v3491_v43  ;;  %p2417_p6 = scmp.ne.s32.totalorder %s2416_s25, 0 }
0x1c64   :  { %v2419_v33 = vcombine.low (!%p2417_p6), %v3177_v0, %v3182_v1  ;;  %v3096_v34 = vmov (!%p2417_p6), 0.0   ;;  %v2420_v35 = vcombine.low (!%p2417_p6), %v3187_v2, %v3192_v3  ;;  %v2421_v36 = vcombine.low (!%p2417_p6), %v3197_v4, %v3202_v5 }
0x1c65   :  { %2730 = vmatmul.mubr.msk.bf16.vlgmr.msra.gmra.mrb[0].mxu0 %vm116_vm3, %v3497_v48  ;;  %2741 = vmatprep.subr.bf16.mxu0 (!%p2417_p6), %v3096_v34  ;;  %v2422_v19 = vcombine.low (!%p2417_p6), %v3207_v7, %v3212_v8  ;;  %v2423_v37 = vcombine.low (!%p2417_p6), %v3217_v9, %v3222_v10  ;;  %v2424_v20 = vcombine.low (!%p2417_p6), %v3227_v11, %v3232_v12  ;;  %vm3097_vm11 = vmmov (!%p2417_p6), 0  }
0x1c66   :  { %2742 = vmatpush3.bf16.msra.mxu0 (!%p2417_p6), %v2419_v33  ;;  %2757 = vmatprep.mubr.msk.bf16.mxu0 (!%p2417_p6), %vm3097_vm11, %v3096_v34 }
0x1c67   :  { %2743 = vmatprep.subr.bf16.mxu0 (!%p2417_p6), %v3096_v34 }
0x1c6a   :  { %2744 = vmatpush3.bf16.msra.mxu0 (!%p2417_p6), %v2420_v35 }
0x1c6b   :  { %2745 = vmatprep.subr.bf16.mxu0 (!%p2417_p6), %v3096_v34 }
0x1c6e   :  { %2746 = vmatpush3.bf16.msra.mxu0 (!%p2417_p6), %v2421_v36 }
0x1c6f   :  { %2747 = vmatprep.subr.bf16.mxu0 (!%p2417_p6), %v3096_v34 }
0x1c72   :  { %2748 = vmatpush3.bf16.msra.mxu0 (!%p2417_p6), %v2422_v19 }
0x1c73   :  { %2749 = vmatprep.subr.bf16.mxu0 (!%p2417_p6), %v3096_v34 }
0x1c76   :  { %2750 = vmatpush3.bf16.msra.mxu0 (!%p2417_p6), %v2423_v37 }
0x1c77   :  { %2751 = vmatprep.subr.bf16.mxu0 (!%p2417_p6), %v3096_v34 }
0x1c7a   :  { %2752 = vmatpush3.bf16.msra.mxu0 (!%p2417_p6), %v2424_v20 }
0x1c7b   :  { %2753 = vmatprep.subr.bf16.mxu0 (!%p2417_p6), %v3096_v34 }
0x1d38   :  { %v1094_v44 = vpop.f32.mrb[0].mxu0 }
0x1d39   :  { %v1100_v45 = vadd.f32 %v1094_v44, %v1059_v39  ;;  %v2731_v46 = vpop.f32.mrb[1].mxu0 }
0x1d3a   :  { %v1097_v47 = vpop.f32.mrb[2].mxu0  ;;  %v2426_v46 = vcombine.low (!%p2417_p6), %v3247_v15, %v3252_v16 }
0x1d3b   :  { %v1101_v50 = vadd.f32 %v3473_v26, %v1100_v45  ;;  %v2732_v51 = vpop.f32.mrb[3].mxu0  ;;  %v2425_v45 = vcombine.low (!%p2417_p6), %v3237_v13, %v3242_v14 }
0x1d3d   :  { %3025 = vtanh.f32 %v1101_v50  ;;  %v2412_v25 = vmul.f32 -1.442695, %v1101_v50  ;;  %2754 = vmatpush3.bf16.msra.mxu0 (!%p2417_p6), %v2425_v45 }
0x1d3e   :  { %2755 = vmatprep.subr.bf16.mxu0 (!%p2417_p6), %v3096_v34 }
0x1d3f   :  { %3027 = vpow2.f32 %v2412_v25 }
0x1d41   :  { %2756 = vmatpush3.bf16.msra.mxu0 (!%p2417_p6), %v2426_v46 }
0x1d47   :  { %v3026_v52 = vpop.eup %3025 }
0x1d48   :  { %1111 = vrot.lane.b32.xlu0 %v3026_v52, %s3091_s24 }
0x1d49   :  { %v3028_v48 = vpop.eup %3027 }
0x1d4a   :  { %v1105_v53 = vadd.f32 1.0, %v3028_v48  ;;  %v3098_v48 = vmov (!%p2417_p6), 1.0|1.0  }
0x1d4c   :  { %3029 = vrcp.f32 %v1105_v53 }
0x1d56   :  { %v3030_v54 = vpop.eup %3029 }
0x1d57   :  { %v1109_v57 = vmul.f32 %v3030_v54, %v3479_v41 }
0x1dba   :  { %v1112_v55 = vpop.permute.xlu0 %1111 }
0x1dbb   :  { %v1114_v56 = vmul.f32 %v3030_v54, %v1112_v55 }
0x1dbd   :  { %1116 = vrot.lane.b32.xlu0 %v1114_v56, %s3091_s24 }
0x1e2f   :  { %v1117_v59 = vpop.permute.xlu0 %1116 }
0x1e30   :  { %v3549_v60 = vadd.f32 %v1117_v59, %v1109_v57 }
0x1e32   :  { %3031 = vtanh.f32 %v3549_v60 }
0x1e3c   :  { %v3032_v61 = vpop.eup %3031 }
0x1e3d   :  { %1122 = vrot.lane.b32.xlu1 %v3032_v61, %s3091_s24 }
0x1eaf   :  { %v1123_v62 = vpop.permute.xlu1 %1122 }
0x1eb0   :  { %v1125_v63 = vmul.f32 %v3030_v54, %v1123_v62 }
0x1eb2   :  { %v1126_v6 = vpack.c.bf16 %v1125_v63, %v1125_v63 }
0x1eb4   :  { %1128 = vrot.lane.b32.xlu1 %v1126_v6, %s3092_s5 }
0x1f26   :  { %v3554_v22 = vpop.permute.xlu1 %1128 }
0x1f27   :  { %2738 = vmatmul.mubr.msk.bf16.vlgmr.msra.gmra.mrb[0].mxu1 %vm116_vm3, %v3554_v22 }
0x1ff7   :  { %1182 = sbr.rel (%p2417_p6) target bundleno = 8844 (0x228c), region = 57 }
0x1ffa   :  { %v1167_v41 = vpop.f32.mrb[0].mxu1 }
0x1ffb   :  { %v1168_v23 = vadd.f32 %v3504_v49, %v1167_v41  ;;  %v2739_v24 = vpop.f32.mrb[1].mxu1 }
0x1ffc   :  { %v1170_v27 = vpop.f32.mrb[2].mxu1 }
0x1ffd   :  { %2414 = vst [vmem:[%s3824_s11 + $0x10] sm:$0xff] %v1168_v23  ;;  %v2740_v28 = vpop.f32.mrb[3].mxu1  ;;  %1183 = vmax.xlane.f32.xlu0 (!%p2417_p6), %v1168_v23 }
0x208a   :  { %v1184_v29 = vpop.xlane.xlu0 %1183 }
0x208b   :  { %vm1185_vm9 = vcmp.eq.f32.partialorder %v1168_v23, %v1184_v29 }
0x208c   :  { %v1186_v30 = vsel %vm1185_vm9, %v3254_v17, 128 }
0x208d   :  { %v1188_v31 = vshra.s32 %v1186_v30, 16  ;;  %v1187_v38 = vand.u32 65535, %v1186_v30 }
0x208f   :  { %v1190_v32 = vcvt.s32.f32 %v1188_v31  ;;  %v1189_v40 = vcvt.s32.f32 %v1187_v38 }
0x2091   :  { %1191 = vmin.xlane.f32.xlu0 %v1190_v32 }
0x211e   :  { %v1192_v39 = vpop.xlane.xlu0 %1191 }
0x211f   :  { %vm1193_vm10 = vcmp.eq.f32.partialorder %v1190_v32, %v1192_v39  ;;  %v1198_v47 = vcvt.f32.s32 %v1192_v39 }
0x2120   :  { %v1194_v44 = vsel %vm1193_vm10, %v1189_v40, inf }
0x2121   :  { %1195 = vmin.xlane.f32.xlu1 %v1194_v44  ;;  %v1199_v51 = vshll.u32 %v1198_v47, 16 }
0x21ae   :  { %v1196_v50 = vpop.xlane.xlu1 %1195 }
0x21af   :  { %v1197_v52 = vcvt.f32.s32 %v1196_v50 }
0x21b1   :  { %v1200_v25 = vadd.s32 %v1199_v51, %v1197_v52 }
0x21b3   :  { %vm1201_vm12 = vcmp.eq.s32.totalorder %v3254_v17, %v1200_v25 }
0x21b4   :  { %vm2427_vm13 = vmpackc.low %vm1201_vm12, %vm1201_vm12 }
0x21b5   :  { %2758 = vmatmul.mubr.msk.bf16.vlgmr.msra.gmra.mrb[0].mxu0 %vm2427_vm13, %v3098_v48 }
0x2288   :  { %v1287_v53 = vpop.f32.mrb[0].mxu0 }
0x2289   :  { %1293 = vst [vmem:[#allocation2] sm:$0xff] %v1287_v53  ;;  %v2759_v54 = vpop.f32.mrb[1].mxu0 }
0x228a   :  { %v1290_v55 = vpop.f32.mrb[2].mxu0 }
0x228b   :  { %v2760_v56 = vpop.f32.mrb[3].mxu0 }
0x228c PF:  { %2761 = vmatprep.subr.bf16.mxu0 %v3088_v18  ;;  %2765 = vmatprep.mubr.msk.bf16.mxu0 %vm3089_vm0, %v3088_v18  ;;  %v2433_v59 = vld [vmem:[%s3815_s2 + $0x18] sm:$0xff]  ;;  %s2434_s30 = sld [smem:[#allocation3 + $0x3]] }
0x228d   :  { %2762 = vmatpush3.bf16.msra.mxu0 %v3450_v21  ;;  %2769 = vmatprep.subr.bf16.mxu1 %v3088_v18 }
0x228e   :  { %2763 = vmatprep.subr.bf16.mxu0 %v3088_v18  ;;  %2770 = vmatpush3.bf16.msra.mxu1 %v3485_v42 }
0x228f   :  { %2771 = vmatprep.subr.bf16.mxu1 %v3088_v18  ;;  %2773 = vmatprep.mubr.msk.bf16.mxu1 %vm3089_vm0, %v3088_v18 }
0x2290   :  { %v1294_v57 = vld [vmem:[#allocation2] sm:$0xff] }
0x2291   :  { %2764 = vmatpush3.bf16.msra.mxu0 %v3456_v58  ;;  %1412 = vst [vmem:[#allocation2] sm:$0xff] %v2433_v59 }
0x2292   :  { %2772 = vmatpush3.bf16.msra.mxu1 %v3491_v43  ;;  %p2435_p7 = scmp.ne.s32.totalorder %s2434_s30, 0 }
0x2293   :  { %v2437_v51 = vcombine.low (!%p2435_p7), %v3177_v0, %v3182_v1  ;;  %v3099_v52 = vmov (!%p2435_p7), 0.0   ;;  %v2438_v25 = vcombine.low (!%p2435_p7), %v3187_v2, %v3192_v3  ;;  %v2439_v48 = vcombine.low (!%p2435_p7), %v3197_v4, %v3202_v5 }
0x2294   :  { %2766 = vmatmul.mubr.msk.bf16.vlgmr.msra.gmra.mrb[0].mxu0 %vm116_vm3, %v3554_v22  ;;  %2777 = vmatprep.subr.bf16.mxu0 (!%p2435_p7), %v3099_v52  ;;  %v2440_v53 = vcombine.low (!%p2435_p7), %v3207_v7, %v3212_v8  ;;  %v2441_v54 = vcombine.low (!%p2435_p7), %v3217_v9, %v3222_v10  ;;  %v2442_v55 = vcombine.low (!%p2435_p7), %v3227_v11, %v3232_v12  ;;  %vm3100_vm1 = vmmov (!%p2435_p7), 0  }
0x2295   :  { %2778 = vmatpush3.bf16.msra.mxu0 (!%p2435_p7), %v2437_v51  ;;  %2793 = vmatprep.mubr.msk.bf16.mxu0 (!%p2435_p7), %vm3100_vm1, %v3099_v52 }
0x2296   :  { %2779 = vmatprep.subr.bf16.mxu0 (!%p2435_p7), %v3099_v52 }
0x2299   :  { %2780 = vmatpush3.bf16.msra.mxu0 (!%p2435_p7), %v2438_v25 }
0x229a   :  { %2781 = vmatprep.subr.bf16.mxu0 (!%p2435_p7), %v3099_v52 }
0x229d   :  { %2782 = vmatpush3.bf16.msra.mxu0 (!%p2435_p7), %v2439_v48 }
0x229e   :  { %2783 = vmatprep.subr.bf16.mxu0 (!%p2435_p7), %v3099_v52 }
0x22a1   :  { %2784 = vmatpush3.bf16.msra.mxu0 (!%p2435_p7), %v2440_v53 }
0x22a2   :  { %2785 = vmatprep.subr.bf16.mxu0 (!%p2435_p7), %v3099_v52 }
0x22a5   :  { %2786 = vmatpush3.bf16.msra.mxu0 (!%p2435_p7), %v2441_v54 }
0x22a6   :  { %2787 = vmatprep.subr.bf16.mxu0 (!%p2435_p7), %v3099_v52 }
0x22a9   :  { %2788 = vmatpush3.bf16.msra.mxu0 (!%p2435_p7), %v2442_v55 }
0x22aa   :  { %2789 = vmatprep.subr.bf16.mxu0 (!%p2435_p7), %v3099_v52 }
0x2367   :  { %v1329_v61 = vpop.f32.mrb[0].mxu0 }
0x2368   :  { %v1335_v62 = vadd.f32 %v1329_v61, %v1294_v57  ;;  %v2767_v63 = vpop.f32.mrb[1].mxu0 }
0x2369   :  { %v1332_v6 = vpop.f32.mrb[2].mxu0  ;;  %v2444_v63 = vcombine.low (!%p2435_p7), %v3247_v15, %v3252_v16 }
0x236a   :  { %v1336_v41 = vadd.f32 %v3473_v26, %v1335_v62  ;;  %v2768_v23 = vpop.f32.mrb[3].mxu0  ;;  %v2443_v62 = vcombine.low (!%p2435_p7), %v3237_v13, %v3242_v14 }
0x236c   :  { %3033 = vtanh.f32 %v1336_v41  ;;  %v2430_v27 = vmul.f32 -1.442695, %v1336_v41  ;;  %2790 = vmatpush3.bf16.msra.mxu0 (!%p2435_p7), %v2443_v62 }
0x236d   :  { %2791 = vmatprep.subr.bf16.mxu0 (!%p2435_p7), %v3099_v52 }
0x236e   :  { %3035 = vpow2.f32 %v2430_v27 }
0x2370   :  { %2792 = vmatpush3.bf16.msra.mxu0 (!%p2435_p7), %v2444_v63 }
0x2376   :  { %v3034_v24 = vpop.eup %3033 }
0x2377   :  { %1346 = vrot.lane.b32.xlu0 %v3034_v24, %s3091_s24 }
0x2378   :  { %v3036_v22 = vpop.eup %3035 }
0x2379   :  { %v1340_v28 = vadd.f32 1.0, %v3036_v22  ;;  %v3101_v22 = vmov (!%p2435_p7), 1.0|1.0  }
0x237b   :  { %3037 = vrcp.f32 %v1340_v28 }
0x2385   :  { %v3038_v29 = vpop.eup %3037 }
0x2386   :  { %v1344_v32 = vmul.f32 %v3038_v29, %v3549_v60 }
0x23e9   :  { %v1347_v30 = vpop.permute.xlu0 %1346 }
0x23ea   :  { %v1349_v31 = vmul.f32 %v3038_v29, %v1347_v30 }
0x23ec   :  { %1351 = vrot.lane.b32.xlu0 %v1349_v31, %s3091_s24 }
0x245e   :  { %v1352_v33 = vpop.permute.xlu0 %1351 }
0x245f   :  { %v3601_v34 = vadd.f32 %v1352_v33, %v1344_v32 }
0x2461   :  { %3039 = vtanh.f32 %v3601_v34 }
0x246b   :  { %v3040_v35 = vpop.eup %3039 }
0x246c   :  { %1357 = vrot.lane.b32.xlu1 %v3040_v35, %s3091_s24 }
0x24de   :  { %v1358_v36 = vpop.permute.xlu1 %1357 }
0x24df   :  { %v1360_v19 = vmul.f32 %v3038_v29, %v1358_v36 }
0x24e1   :  { %v1361_v37 = vpack.c.bf16 %v1360_v19, %v1360_v19 }
0x24e3   :  { %1363 = vrot.lane.b32.xlu1 %v1361_v37, %s3092_s5 }
0x2555   :  { %v3606_v20 = vpop.permute.xlu1 %1363 }
0x2556   :  { %2774 = vmatmul.mubr.msk.bf16.vlgmr.msra.gmra.mrb[0].mxu1 %vm116_vm3, %v3606_v20 }
0x2626   :  { %1417 = sbr.rel (%p2435_p7) target bundleno = 10427 (0x28bb), region = 61 }
0x2629   :  { %v1402_v60 = vpop.f32.mrb[0].mxu1 }
0x262a   :  { %v1403_v38 = vadd.f32 %v3504_v49, %v1402_v60  ;;  %v2775_v39 = vpop.f32.mrb[1].mxu1 }
0x262b   :  { %v1405_v40 = vpop.f32.mrb[2].mxu1 }
0x262c   :  { %2432 = vst [vmem:[%s3824_s11 + $0x18] sm:$0xff] %v1403_v38  ;;  %v2776_v44 = vpop.f32.mrb[3].mxu1  ;;  %1418 = vmax.xlane.f32.xlu0 (!%p2435_p7), %v1403_v38 }
0x26b9   :  { %v1419_v45 = vpop.xlane.xlu0 %1418 }
0x26ba   :  { %vm1420_vm14 = vcmp.eq.f32.partialorder %v1403_v38, %v1419_v45 }
0x26bb   :  { %v1421_v46 = vsel %vm1420_vm14, %v3254_v17, 128 }
0x26bc   :  { %v1423_v47 = vshra.s32 %v1421_v46, 16  ;;  %v1422_v56 = vand.u32 65535, %v1421_v46 }
0x26be   :  { %v1425_v50 = vcvt.s32.f32 %v1423_v47  ;;  %v1424_v59 = vcvt.s32.f32 %v1422_v56 }
0x26c0   :  { %1426 = vmin.xlane.f32.xlu0 %v1425_v50 }
0x274d   :  { %v1427_v57 = vpop.xlane.xlu0 %1426 }
0x274e   :  { %vm1428_vm15 = vcmp.eq.f32.partialorder %v1425_v50, %v1427_v57  ;;  %v1433_v6 = vcvt.f32.s32 %v1427_v57 }
0x274f   :  { %v1429_v61 = vsel %vm1428_vm15, %v1424_v59, inf }
0x2750   :  { %1430 = vmin.xlane.f32.xlu1 %v1429_v61  ;;  %v1434_v23 = vshll.u32 %v1433_v6, 16 }
0x27dd   :  { %v1431_v41 = vpop.xlane.xlu1 %1430 }
0x27de   :  { %v1432_v24 = vcvt.f32.s32 %v1431_v41 }
0x27e0   :  { %v1435_v27 = vadd.s32 %v1434_v23, %v1432_v24 }
0x27e2   :  { %vm1436_vm2 = vcmp.eq.s32.totalorder %v3254_v17, %v1435_v27 }
0x27e3   :  { %vm2445_vm4 = vmpackc.low %vm1436_vm2, %vm1436_vm2 }
0x27e4   :  { %2794 = vmatmul.mubr.msk.bf16.vlgmr.msra.gmra.mrb[0].mxu0 %vm2445_vm4, %v3101_v22 }
0x28b7   :  { %v1522_v28 = vpop.f32.mrb[0].mxu0 }
0x28b8   :  { %1528 = vst [vmem:[#allocation2] sm:$0xff] %v1522_v28  ;;  %v2795_v29 = vpop.f32.mrb[1].mxu0 }
0x28b9   :  { %v1525_v30 = vpop.f32.mrb[2].mxu0 }
0x28ba   :  { %v2796_v31 = vpop.f32.mrb[3].mxu0 }
0x28bb PF:  { %2797 = vmatprep.subr.bf16.mxu0 %v3088_v18  ;;  %2801 = vmatprep.mubr.msk.bf16.mxu0 %vm3089_vm0, %v3088_v18  ;;  %v2451_v33 = vld [vmem:[%s3815_s2 + $0x20] sm:$0xff]  ;;  %s2452_s6 = sld [smem:[#allocation3 + $0x4]] }
0x28bc   :  { %2798 = vmatpush3.bf16.msra.mxu0 %v3450_v21  ;;  %2805 = vmatprep.subr.bf16.mxu1 %v3088_v18 }
0x28bd   :  { %2799 = vmatprep.subr.bf16.mxu0 %v3088_v18  ;;  %2806 = vmatpush3.bf16.msra.mxu1 %v3485_v42 }
0x28be   :  { %2807 = vmatprep.subr.bf16.mxu1 %v3088_v18  ;;  %2809 = vmatprep.mubr.msk.bf16.mxu1 %vm3089_vm0, %v3088_v18 }
0x28bf   :  { %v1529_v32 = vld [vmem:[#allocation2] sm:$0xff] }
0x28c0   :  { %2800 = vmatpush3.bf16.msra.mxu0 %v3456_v58  ;;  %1647 = vst [vmem:[#allocation2] sm:$0xff] %v2451_v33 }
0x28c1   :  { %2808 = vmatpush3.bf16.msra.mxu1 %v3491_v43  ;;  %p2453_p8 = scmp.ne.s32.totalorder %s2452_s6, 0 }
0x28c2   :  { %v2455_v23 = vcombine.low (!%p2453_p8), %v3177_v0, %v3182_v1  ;;  %v3102_v24 = vmov (!%p2453_p8), 0.0   ;;  %v2456_v27 = vcombine.low (!%p2453_p8), %v3187_v2, %v3192_v3  ;;  %v2457_v22 = vcombine.low (!%p2453_p8), %v3197_v4, %v3202_v5 }
0x28c3   :  { %2802 = vmatmul.mubr.msk.bf16.vlgmr.msra.gmra.mrb[0].mxu0 %vm116_vm3, %v3606_v20  ;;  %2813 = vmatprep.subr.bf16.mxu0 (!%p2453_p8), %v3102_v24  ;;  %v2458_v28 = vcombine.low (!%p2453_p8), %v3207_v7, %v3212_v8  ;;  %v2459_v29 = vcombine.low (!%p2453_p8), %v3217_v9, %v3222_v10  ;;  %v2460_v30 = vcombine.low (!%p2453_p8), %v3227_v11, %v3232_v12  ;;  %vm3103_vm7 = vmmov (!%p2453_p8), 0  }
0x28c4   :  { %2814 = vmatpush3.bf16.msra.mxu0 (!%p2453_p8), %v2455_v23  ;;  %2829 = vmatprep.mubr.msk.bf16.mxu0 (!%p2453_p8), %vm3103_vm7, %v3102_v24 }
0x28c5   :  { %2815 = vmatprep.subr.bf16.mxu0 (!%p2453_p8), %v3102_v24 }
0x28c8   :  { %2816 = vmatpush3.bf16.msra.mxu0 (!%p2453_p8), %v2456_v27 }
0x28c9   :  { %2817 = vmatprep.subr.bf16.mxu0 (!%p2453_p8), %v3102_v24 }
0x28cc   :  { %2818 = vmatpush3.bf16.msra.mxu0 (!%p2453_p8), %v2457_v22 }
0x28cd   :  { %2819 = vmatprep.subr.bf16.mxu0 (!%p2453_p8), %v3102_v24 }
0x28d0   :  { %2820 = vmatpush3.bf16.msra.mxu0 (!%p2453_p8), %v2458_v28 }
0x28d1   :  { %2821 = vmatprep.subr.bf16.mxu0 (!%p2453_p8), %v3102_v24 }
0x28d4   :  { %2822 = vmatpush3.bf16.msra.mxu0 (!%p2453_p8), %v2459_v29 }
0x28d5   :  { %2823 = vmatprep.subr.bf16.mxu0 (!%p2453_p8), %v3102_v24 }
0x28d8   :  { %2824 = vmatpush3.bf16.msra.mxu0 (!%p2453_p8), %v2460_v30 }
0x28d9   :  { %2825 = vmatprep.subr.bf16.mxu0 (!%p2453_p8), %v3102_v24 }
0x2996   :  { %v1564_v35 = vpop.f32.mrb[0].mxu0 }
0x2997   :  { %v1570_v36 = vadd.f32 %v1564_v35, %v1529_v32  ;;  %v2803_v19 = vpop.f32.mrb[1].mxu0 }
0x2998   :  { %v1567_v37 = vpop.f32.mrb[2].mxu0  ;;  %v2462_v19 = vcombine.low (!%p2453_p8), %v3247_v15, %v3252_v16 }
0x2999   :  { %v1571_v60 = vadd.f32 %v3473_v26, %v1570_v36  ;;  %v2804_v38 = vpop.f32.mrb[3].mxu0  ;;  %v2461_v36 = vcombine.low (!%p2453_p8), %v3237_v13, %v3242_v14 }
0x299b   :  { %3041 = vtanh.f32 %v1571_v60  ;;  %v2448_v40 = vmul.f32 -1.442695, %v1571_v60  ;;  %2826 = vmatpush3.bf16.msra.mxu0 (!%p2453_p8), %v2461_v36 }
0x299c   :  { %2827 = vmatprep.subr.bf16.mxu0 (!%p2453_p8), %v3102_v24 }
0x299d   :  { %3043 = vpow2.f32 %v2448_v40 }
0x299f   :  { %2828 = vmatpush3.bf16.msra.mxu0 (!%p2453_p8), %v2462_v19 }
0x29a5   :  { %v3042_v39 = vpop.eup %3041 }
0x29a6   :  { %1581 = vrot.lane.b32.xlu0 %v3042_v39, %s3091_s24 }
0x29a7   :  { %v3044_v20 = vpop.eup %3043 }
0x29a8   :  { %v1575_v44 = vadd.f32 1.0, %v3044_v20  ;;  %v3104_v20 = vmov (!%p2453_p8), 1.0|1.0  }
0x29aa   :  { %3045 = vrcp.f32 %v1575_v44 }
0x29b4   :  { %v3046_v45 = vpop.eup %3045 }
0x29b5   :  { %v1579_v50 = vmul.f32 %v3046_v45, %v3601_v34 }
0x2a18   :  { %v1582_v46 = vpop.permute.xlu0 %1581 }
0x2a19   :  { %v1584_v47 = vmul.f32 %v3046_v45, %v1582_v46 }
0x2a1b   :  { %1586 = vrot.lane.b32.xlu0 %v1584_v47, %s3091_s24 }
0x2a8d   :  { %v1587_v51 = vpop.permute.xlu0 %1586 }
0x2a8e   :  { %v3653_v52 = vadd.f32 %v1587_v51, %v1579_v50 }
0x2a90   :  { %3047 = vtanh.f32 %v3653_v52 }
0x2a9a   :  { %v3048_v25 = vpop.eup %3047 }
0x2a9b   :  { %1592 = vrot.lane.b32.xlu1 %v3048_v25, %s3091_s24 }
0x2b0d   :  { %v1593_v48 = vpop.permute.xlu1 %1592 }
0x2b0e   :  { %v1595_v53 = vmul.f32 %v3046_v45, %v1593_v48 }
0x2b10   :  { %v1596_v54 = vpack.c.bf16 %v1595_v53, %v1595_v53 }
0x2b12   :  { %1598 = vrot.lane.b32.xlu1 %v1596_v54, %s3092_s5 }
0x2b84   :  { %v3658_v55 = vpop.permute.xlu1 %1598 }
0x2b85   :  { %2810 = vmatmul.mubr.msk.bf16.vlgmr.msra.gmra.mrb[0].mxu1 %vm116_vm3, %v3658_v55 }
0x2c55   :  { %1652 = sbr.rel (%p2453_p8) target bundleno = 12010 (0x2eea), region = 65 }
0x2c58   :  { %v1637_v34 = vpop.f32.mrb[0].mxu1 }
0x2c59   :  { %v1638_v56 = vadd.f32 %v3504_v49, %v1637_v34  ;;  %v2811_v57 = vpop.f32.mrb[1].mxu1 }
0x2c5a   :  { %v1640_v59 = vpop.f32.mrb[2].mxu1 }
0x2c5b   :  { %2450 = vst [vmem:[%s3824_s11 + $0x20] sm:$0xff] %v1638_v56  ;;  %v2812_v61 = vpop.f32.mrb[3].mxu1  ;;  %1653 = vmax.xlane.f32.xlu0 (!%p2453_p8), %v1638_v56 }
0x2ce8   :  { %v1654_v62 = vpop.xlane.xlu0 %1653 }
0x2ce9   :  { %vm1655_vm5 = vcmp.eq.f32.partialorder %v1638_v56, %v1654_v62 }
0x2cea   :  { %v1656_v63 = vsel %vm1655_vm5, %v3254_v17, 128 }
0x2ceb   :  { %v1658_v6 = vshra.s32 %v1656_v63, 16  ;;  %v1657_v31 = vand.u32 65535, %v1656_v63 }
0x2ced   :  { %v1660_v41 = vcvt.s32.f32 %v1658_v6  ;;  %v1659_v33 = vcvt.s32.f32 %v1657_v31 }
0x2cef   :  { %1661 = vmin.xlane.f32.xlu0 %v1660_v41 }
0x2d7c   :  { %v1662_v32 = vpop.xlane.xlu0 %1661 }
0x2d7d   :  { %vm1663_vm6 = vcmp.eq.f32.partialorder %v1660_v41, %v1662_v32  ;;  %v1668_v37 = vcvt.f32.s32 %v1662_v32 }
0x2d7e   :  { %v1664_v35 = vsel %vm1663_vm6, %v1659_v33, inf }
0x2d7f   :  { %1665 = vmin.xlane.f32.xlu1 %v1664_v35  ;;  %v1669_v38 = vshll.u32 %v1668_v37, 16 }
0x2e0c   :  { %v1666_v60 = vpop.xlane.xlu1 %1665 }
0x2e0d   :  { %v1667_v39 = vcvt.f32.s32 %v1666_v60 }
0x2e0f   :  { %v1670_v40 = vadd.s32 %v1669_v38, %v1667_v39 }
0x2e11   :  { %vm1671_vm8 = vcmp.eq.s32.totalorder %v3254_v17, %v1670_v40 }
0x2e12   :  { %vm2463_vm9 = vmpackc.low %vm1671_vm8, %vm1671_vm8 }
0x2e13   :  { %2830 = vmatmul.mubr.msk.bf16.vlgmr.msra.gmra.mrb[0].mxu0 %vm2463_vm9, %v3104_v20 }
0x2ee6   :  { %v1757_v44 = vpop.f32.mrb[0].mxu0 }
0x2ee7   :  { %1763 = vst [vmem:[#allocation2] sm:$0xff] %v1757_v44  ;;  %v2831_v45 = vpop.f32.mrb[1].mxu0 }
0x2ee8   :  { %v1760_v46 = vpop.f32.mrb[2].mxu0 }
0x2ee9   :  { %v2832_v47 = vpop.f32.mrb[3].mxu0 }
0x2eea PF:  { %2833 = vmatprep.subr.bf16.mxu0 %v3088_v18  ;;  %2837 = vmatprep.mubr.msk.bf16.mxu0 %vm3089_vm0, %v3088_v18  ;;  %v2469_v51 = vld [vmem:[%s3815_s2 + $0x28] sm:$0xff]  ;;  %s2470_s8 = sld [smem:[#allocation3 + $0x5]] }
0x2eeb   :  { %2834 = vmatpush3.bf16.msra.mxu0 %v3450_v21  ;;  %2841 = vmatprep.subr.bf16.mxu1 %v3088_v18 }
0x2eec   :  { %2835 = vmatprep.subr.bf16.mxu0 %v3088_v18  ;;  %2842 = vmatpush3.bf16.msra.mxu1 %v3485_v42 }
0x2eed   :  { %2843 = vmatprep.subr.bf16.mxu1 %v3088_v18  ;;  %2845 = vmatprep.mubr.msk.bf16.mxu1 %vm3089_vm0, %v3088_v18 }
0x2eee   :  { %v1764_v50 = vld [vmem:[#allocation2] sm:$0xff] }
0x2eef   :  { %2836 = vmatpush3.bf16.msra.mxu0 %v3456_v58  ;;  %1882 = vst [vmem:[#allocation2] sm:$0xff] %v2469_v51 }
0x2ef0   :  { %2844 = vmatpush3.bf16.msra.mxu1 %v3491_v43  ;;  %p2471_p9 = scmp.ne.s32.totalorder %s2470_s8, 0 }
0x2ef1   :  { %v2473_v38 = vcombine.low (!%p2471_p9), %v3177_v0, %v3182_v1  ;;  %v3105_v39 = vmov (!%p2471_p9), 0.0   ;;  %v2474_v40 = vcombine.low (!%p2471_p9), %v3187_v2, %v3192_v3  ;;  %v2475_v20 = vcombine.low (!%p2471_p9), %v3197_v4, %v3202_v5 }
0x2ef2   :  { %2838 = vmatmul.mubr.msk.bf16.vlgmr.msra.gmra.mrb[0].mxu0 %vm116_vm3, %v3658_v55  ;;  %2849 = vmatprep.subr.bf16.mxu0 (!%p2471_p9), %v3105_v39  ;;  %v2476_v44 = vcombine.low (!%p2471_p9), %v3207_v7, %v3212_v8  ;;  %v2477_v45 = vcombine.low (!%p2471_p9), %v3217_v9, %v3222_v10  ;;  %v2478_v46 = vcombine.low (!%p2471_p9), %v3227_v11, %v3232_v12  ;;  %vm3106_vm12 = vmmov (!%p2471_p9), 0  }
0x2ef3   :  { %2850 = vmatpush3.bf16.msra.mxu0 (!%p2471_p9), %v2473_v38  ;;  %2865 = vmatprep.mubr.msk.bf16.mxu0 (!%p2471_p9), %vm3106_vm12, %v3105_v39 }
0x2ef4   :  { %2851 = vmatprep.subr.bf16.mxu0 (!%p2471_p9), %v3105_v39 }
0x2ef7   :  { %2852 = vmatpush3.bf16.msra.mxu0 (!%p2471_p9), %v2474_v40 }
0x2ef8   :  { %2853 = vmatprep.subr.bf16.mxu0 (!%p2471_p9), %v3105_v39 }
0x2efb   :  { %2854 = vmatpush3.bf16.msra.mxu0 (!%p2471_p9), %v2475_v20 }
0x2efc   :  { %2855 = vmatprep.subr.bf16.mxu0 (!%p2471_p9), %v3105_v39 }
0x2eff   :  { %2856 = vmatpush3.bf16.msra.mxu0 (!%p2471_p9), %v2476_v44 }
0x2f00   :  { %2857 = vmatprep.subr.bf16.mxu0 (!%p2471_p9), %v3105_v39 }
0x2f03   :  { %2858 = vmatpush3.bf16.msra.mxu0 (!%p2471_p9), %v2477_v45 }
0x2f04   :  { %2859 = vmatprep.subr.bf16.mxu0 (!%p2471_p9), %v3105_v39 }
0x2f07   :  { %2860 = vmatpush3.bf16.msra.mxu0 (!%p2471_p9), %v2478_v46 }
0x2f08   :  { %2861 = vmatprep.subr.bf16.mxu0 (!%p2471_p9), %v3105_v39 }
0x2fc5   :  { %v1799_v25 = vpop.f32.mrb[0].mxu0 }
0x2fc6   :  { %v1805_v48 = vadd.f32 %v1799_v25, %v1764_v50  ;;  %v2839_v53 = vpop.f32.mrb[1].mxu0 }
0x2fc7   :  { %v1802_v54 = vpop.f32.mrb[2].mxu0  ;;  %v2480_v53 = vcombine.low (!%p2471_p9), %v3247_v15, %v3252_v16 }
0x2fc8   :  { %v1806_v34 = vadd.f32 %v3473_v26, %v1805_v48  ;;  %v2840_v56 = vpop.f32.mrb[3].mxu0  ;;  %v2479_v48 = vcombine.low (!%p2471_p9), %v3237_v13, %v3242_v14 }
0x2fca   :  { %3049 = vtanh.f32 %v1806_v34  ;;  %v2466_v59 = vmul.f32 -1.442695, %v1806_v34  ;;  %2862 = vmatpush3.bf16.msra.mxu0 (!%p2471_p9), %v2479_v48 }
0x2fcb   :  { %2863 = vmatprep.subr.bf16.mxu0 (!%p2471_p9), %v3105_v39 }
0x2fcc   :  { %3051 = vpow2.f32 %v2466_v59 }
0x2fce   :  { %2864 = vmatpush3.bf16.msra.mxu0 (!%p2471_p9), %v2480_v53 }
0x2fd4   :  { %v3050_v57 = vpop.eup %3049 }
0x2fd5   :  { %1816 = vrot.lane.b32.xlu0 %v3050_v57, %s3091_s24 }
0x2fd6   :  { %v3052_v55 = vpop.eup %3051 }
0x2fd7   :  { %v1810_v61 = vadd.f32 1.0, %v3052_v55  ;;  %v3107_v55 = vmov (!%p2471_p9), 1.0|1.0  }
0x2fd9   :  { %3053 = vrcp.f32 %v1810_v61 }
0x2fe3   :  { %v3054_v62 = vpop.eup %3053 }
0x2fe4   :  { %v1814_v41 = vmul.f32 %v3054_v62, %v3653_v52 }
0x3047   :  { %v1817_v63 = vpop.permute.xlu0 %1816 }
0x3048   :  { %v1819_v6 = vmul.f32 %v3054_v62, %v1817_v63 }
0x304a   :  { %1821 = vrot.lane.b32.xlu0 %v1819_v6, %s3091_s24 }
0x30bc   :  { %v1822_v23 = vpop.permute.xlu0 %1821 }
0x30bd   :  { %v3705_v24 = vadd.f32 %v1822_v23, %v1814_v41 }
0x30bf   :  { %3055 = vtanh.f32 %v3705_v24 }
0x30c9   :  { %v3056_v27 = vpop.eup %3055 }
0x30ca   :  { %1827 = vrot.lane.b32.xlu1 %v3056_v27, %s3091_s24 }
0x313c   :  { %v1828_v22 = vpop.permute.xlu1 %1827 }
0x313d   :  { %v1830_v28 = vmul.f32 %v3054_v62, %v1828_v22 }
0x313f   :  { %v1831_v29 = vpack.c.bf16 %v1830_v28, %v1830_v28 }
0x3141   :  { %1833 = vrot.lane.b32.xlu1 %v1831_v29, %s3092_s5 }
0x31b3   :  { %v3710_v30 = vpop.permute.xlu1 %1833 }
0x31b4   :  { %2846 = vmatmul.mubr.msk.bf16.vlgmr.msra.gmra.mrb[0].mxu1 %vm116_vm3, %v3710_v30 }
0x3284   :  { %1887 = sbr.rel (%p2471_p9) target bundleno = 13593 (0x3519), region = 69 }
0x3287   :  { %v1872_v52 = vpop.f32.mrb[0].mxu1 }
0x3288   :  { %v1873_v31 = vadd.f32 %v3504_v49, %v1872_v52  ;;  %v2847_v32 = vpop.f32.mrb[1].mxu1 }
0x3289   :  { %v1875_v33 = vpop.f32.mrb[2].mxu1 }
0x328a   :  { %2468 = vst [vmem:[%s3824_s11 + $0x28] sm:$0xff] %v1873_v31  ;;  %v2848_v35 = vpop.f32.mrb[3].mxu1  ;;  %1888 = vmax.xlane.f32.xlu0 (!%p2471_p9), %v1873_v31 }
0x3317   :  { %v1889_v36 = vpop.xlane.xlu0 %1888 }
0x3318   :  { %vm1890_vm10 = vcmp.eq.f32.partialorder %v1873_v31, %v1889_v36 }
0x3319   :  { %v1891_v19 = vsel %vm1890_vm10, %v3254_v17, 128 }
0x331a   :  { %v1893_v37 = vshra.s32 %v1891_v19, 16  ;;  %v1892_v47 = vand.u32 65535, %v1891_v19 }
0x331c   :  { %v1895_v60 = vcvt.s32.f32 %v1893_v37  ;;  %v1894_v51 = vcvt.s32.f32 %v1892_v47 }
0x331e   :  { %1896 = vmin.xlane.f32.xlu0 %v1895_v60 }
0x33ab   :  { %v1897_v50 = vpop.xlane.xlu0 %1896 }
0x33ac   :  { %vm1898_vm11 = vcmp.eq.f32.partialorder %v1895_v60, %v1897_v50  ;;  %v1903_v54 = vcvt.f32.s32 %v1897_v50 }
0x33ad   :  { %v1899_v25 = vsel %vm1898_vm11, %v1894_v51, inf }
0x33ae   :  { %1900 = vmin.xlane.f32.xlu1 %v1899_v25  ;;  %v1904_v56 = vshll.u32 %v1903_v54, 16 }
0x343b   :  { %v1901_v34 = vpop.xlane.xlu1 %1900 }
0x343c   :  { %v1902_v57 = vcvt.f32.s32 %v1901_v34 }
0x343e   :  { %v1905_v59 = vadd.s32 %v1904_v56, %v1902_v57 }
0x3440   :  { %vm1906_vm13 = vcmp.eq.s32.totalorder %v3254_v17, %v1905_v59 }
0x3441   :  { %vm2481_vm14 = vmpackc.low %vm1906_vm13, %vm1906_vm13 }
0x3442   :  { %2866 = vmatmul.mubr.msk.bf16.vlgmr.msra.gmra.mrb[0].mxu0 %vm2481_vm14, %v3107_v55 }
0x3515   :  { %v1992_v61 = vpop.f32.mrb[0].mxu0 }
0x3516   :  { %1998 = vst [vmem:[#allocation2] sm:$0xff] %v1992_v61  ;;  %v2867_v62 = vpop.f32.mrb[1].mxu0 }
0x3517   :  { %v1995_v63 = vpop.f32.mrb[2].mxu0 }
0x3518   :  { %v2868_v6 = vpop.f32.mrb[3].mxu0 }
0x3519 PF:  { %2869 = vmatprep.subr.bf16.mxu0 %v3088_v18  ;;  %2873 = vmatprep.mubr.msk.bf16.mxu0 %vm3089_vm0, %v3088_v18  ;;  %v2487_v23 = vld [vmem:[%s3815_s2 + $0x30] sm:$0xff]  ;;  %s2488_s2 = sld [smem:[#allocation3 + $0x6]] }
0x351a   :  { %2870 = vmatpush3.bf16.msra.mxu0 %v3450_v21  ;;  %2877 = vmatprep.subr.bf16.mxu1 %v3088_v18 }
0x351b   :  { %2871 = vmatprep.subr.bf16.mxu0 %v3088_v18  ;;  %2878 = vmatpush3.bf16.msra.mxu1 %v3485_v42 }
0x351c   :  { %2879 = vmatprep.subr.bf16.mxu1 %v3088_v18  ;;  %2881 = vmatprep.mubr.msk.bf16.mxu1 %vm3089_vm0, %v3088_v18 }
0x351d   :  { %v1999_v41 = vld [vmem:[#allocation2] sm:$0xff] }
0x351e   :  { %2872 = vmatpush3.bf16.msra.mxu0 %v3456_v58  ;;  %2117 = vst [vmem:[#allocation2] sm:$0xff] %v2487_v23 }
0x351f   :  { %2880 = vmatpush3.bf16.msra.mxu1 %v3491_v43  ;;  %p2489_p10 = scmp.ne.s32.totalorder %s2488_s2, 0 }
0x3520   :  { %v2491_v56 = vcombine.low (!%p2489_p10), %v3177_v0, %v3182_v1  ;;  %v3108_v57 = vmov (!%p2489_p10), 0.0   ;;  %v2492_v59 = vcombine.low (!%p2489_p10), %v3187_v2, %v3192_v3  ;;  %v2493_v55 = vcombine.low (!%p2489_p10), %v3197_v4, %v3202_v5 }
0x3521   :  { %2874 = vmatmul.mubr.msk.bf16.vlgmr.msra.gmra.mrb[0].mxu0 %vm116_vm3, %v3710_v30  ;;  %2885 = vmatprep.subr.bf16.mxu0 (!%p2489_p10), %v3108_v57  ;;  %v2494_v61 = vcombine.low (!%p2489_p10), %v3207_v7, %v3212_v8  ;;  %v2495_v0 = vcombine.low (!%p2489_p10), %v3217_v9, %v3222_v10  ;;  %v2496_v1 = vcombine.low (!%p2489_p10), %v3227_v11, %v3232_v12  ;;  %vm3109_vm2 = vmmov (!%p2489_p10), 0  }
0x3522   :  { %2886 = vmatpush3.bf16.msra.mxu0 (!%p2489_p10), %v2491_v56  ;;  %v2497_v7 = vcombine.low (!%p2489_p10), %v3237_v13, %v3242_v14  ;;  %v2498_v8 = vcombine.low (!%p2489_p10), %v3247_v15, %v3252_v16  ;;  %2901 = vmatprep.mubr.msk.bf16.mxu0 (!%p2489_p10), %vm3109_vm2, %v3108_v57  ;;  %v3110_v63 = vmov (!%p2489_p10), 1.0|1.0  }
0x3523   :  { %2887 = vmatprep.subr.bf16.mxu0 (!%p2489_p10), %v3108_v57 }
0x3526   :  { %2888 = vmatpush3.bf16.msra.mxu0 (!%p2489_p10), %v2492_v59 }
0x3527   :  { %2889 = vmatprep.subr.bf16.mxu0 (!%p2489_p10), %v3108_v57 }
0x352a   :  { %2890 = vmatpush3.bf16.msra.mxu0 (!%p2489_p10), %v2493_v55 }
0x352b   :  { %2891 = vmatprep.subr.bf16.mxu0 (!%p2489_p10), %v3108_v57 }
0x352e   :  { %2892 = vmatpush3.bf16.msra.mxu0 (!%p2489_p10), %v2494_v61 }
0x352f   :  { %2893 = vmatprep.subr.bf16.mxu0 (!%p2489_p10), %v3108_v57 }
0x3532   :  { %2894 = vmatpush3.bf16.msra.mxu0 (!%p2489_p10), %v2495_v0 }
0x3533   :  { %2895 = vmatprep.subr.bf16.mxu0 (!%p2489_p10), %v3108_v57 }
0x3536   :  { %2896 = vmatpush3.bf16.msra.mxu0 (!%p2489_p10), %v2496_v1 }
0x3537   :  { %2897 = vmatprep.subr.bf16.mxu0 (!%p2489_p10), %v3108_v57 }
0x353a   :  { %2898 = vmatpush3.bf16.msra.mxu0 (!%p2489_p10), %v2497_v7 }
0x353b   :  { %2899 = vmatprep.subr.bf16.mxu0 (!%p2489_p10), %v3108_v57 }
0x353e   :  { %2900 = vmatpush3.bf16.msra.mxu0 (!%p2489_p10), %v2498_v8 }
0x35f4   :  { %v2034_v27 = vpop.f32.mrb[0].mxu0 }
0x35f5   :  { %v2040_v22 = vadd.f32 %v2034_v27, %v1999_v41  ;;  %v2875_v28 = vpop.f32.mrb[1].mxu0 }
0x35f6   :  { %v2037_v29 = vpop.f32.mrb[2].mxu0 }
0x35f7   :  { %v2041_v52 = vadd.f32 %v3473_v26, %v2040_v22  ;;  %v2876_v31 = vpop.f32.mrb[3].mxu0 }
0x35f9   :  { %3057 = vtanh.f32 %v2041_v52  ;;  %v2484_v33 = vmul.f32 -1.442695, %v2041_v52 }
0x35fb   :  { %3059 = vpow2.f32 %v2484_v33 }
0x3603   :  { %v3058_v32 = vpop.eup %3057 }
0x3604   :  { %2051 = vrot.lane.b32.xlu0 %v3058_v32, %s3091_s24 }
0x3605   :  { %v3060_v30 = vpop.eup %3059 }
0x3606   :  { %v2045_v35 = vadd.f32 1.0, %v3060_v30 }
0x3608   :  { %3061 = vrcp.f32 %v2045_v35 }
0x3612   :  { %v3062_v36 = vpop.eup %3061 }
0x3613   :  { %v2049_v60 = vmul.f32 %v3062_v36, %v3705_v24 }
0x3676   :  { %v2052_v19 = vpop.permute.xlu0 %2051 }
0x3677   :  { %v2054_v37 = vmul.f32 %v3062_v36, %v2052_v19 }
0x3679   :  { %2056 = vrot.lane.b32.xlu0 %v2054_v37, %s3091_s24 }
0x36eb   :  { %v2057_v38 = vpop.permute.xlu0 %2056 }
0x36ec   :  { %v3757_v39 = vadd.f32 %v2057_v38, %v2049_v60 }
0x36ee   :  { %3063 = vtanh.f32 %v3757_v39 }
0x36f8   :  { %v3064_v40 = vpop.eup %3063 }
0x36f9   :  { %2062 = vrot.lane.b32.xlu1 %v3064_v40, %s3091_s24 }
0x376b   :  { %v2063_v20 = vpop.permute.xlu1 %2062 }
0x376c   :  { %v2065_v44 = vmul.f32 %v3062_v36, %v2063_v20 }
0x376e   :  { %v2066_v45 = vpack.c.bf16 %v2065_v44, %v2065_v44 }
0x3770   :  { %2068 = vrot.lane.b32.xlu1 %v2066_v45, %s3092_s5 }
0x37e2   :  { %v3762_v46 = vpop.permute.xlu1 %2068 }
0x37e3   :  { %2882 = vmatmul.mubr.msk.bf16.vlgmr.msra.gmra.mrb[0].mxu1 %vm116_vm3, %v3762_v46 }
0x38b3   :  { %2122 = sbr.rel (%p2489_p10) target bundleno = 15176 (0x3b48), region = 73 }
0x38b6   :  { %v2107_v24 = vpop.f32.mrb[0].mxu1 }
0x38b7   :  { %v2108_v47 = vadd.f32 %v3504_v49, %v2107_v24  ;;  %v2883_v50 = vpop.f32.mrb[1].mxu1 }
0x38b8   :  { %v2110_v51 = vpop.f32.mrb[2].mxu1 }
0x38b9   :  { %2486 = vst [vmem:[%s3824_s11 + $0x30] sm:$0xff] %v2108_v47  ;;  %v2884_v25 = vpop.f32.mrb[3].mxu1  ;;  %2123 = vmax.xlane.f32.xlu0 (!%p2489_p10), %v2108_v47 }
0x3946   :  { %v2124_v48 = vpop.xlane.xlu0 %2123 }
0x3947   :  { %vm2125_vm15 = vcmp.eq.f32.partialorder %v2108_v47, %v2124_v48 }
0x3948   :  { %v2126_v53 = vsel %vm2125_vm15, %v3254_v17, 128 }
0x3949   :  { %v2128_v54 = vshra.s32 %v2126_v53, 16  ;;  %v2127_v2 = vand.u32 65535, %v2126_v53 }
0x394b   :  { %v2130_v34 = vcvt.s32.f32 %v2128_v54  ;;  %v2129_v4 = vcvt.s32.f32 %v2127_v2 }
0x394d   :  { %2131 = vmin.xlane.f32.xlu0 %v2130_v34 }
0x39da   :  { %v2132_v3 = vpop.xlane.xlu0 %2131 }
0x39db   :  { %vm2133_vm1 = vcmp.eq.f32.partialorder %v2130_v34, %v2132_v3  ;;  %v2138_v9 = vcvt.f32.s32 %v2132_v3 }
0x39dc   :  { %v2134_v5 = vsel %vm2133_vm1, %v2129_v4, inf }
0x39dd   :  { %2135 = vmin.xlane.f32.xlu1 %v2134_v5  ;;  %v2139_v11 = vshll.u32 %v2138_v9, 16 }
0x3a6a   :  { %v2136_v10 = vpop.xlane.xlu1 %2135 }
0x3a6b   :  { %v2137_v12 = vcvt.f32.s32 %v2136_v10 }
0x3a6d   :  { %v2140_v62 = vadd.s32 %v2139_v11, %v2137_v12 }
0x3a6f   :  { %vm2141_vm4 = vcmp.eq.s32.totalorder %v3254_v17, %v2140_v62 }
0x3a70   :  { %vm2499_vm5 = vmpackc.low %vm2141_vm4, %vm2141_vm4 }
0x3a71   :  { %2902 = vmatmul.mubr.msk.bf16.vlgmr.msra.gmra.mrb[0].mxu0 %vm2499_vm5, %v3110_v63 }
0x3b44   :  { %v2227_v6 = vpop.f32.mrb[0].mxu0 }
0x3b45   :  { %2233 = vst [vmem:[#allocation2] sm:$0xff] %v2227_v6  ;;  %v2903_v13 = vpop.f32.mrb[1].mxu0 }
0x3b46   :  { %v2230_v14 = vpop.f32.mrb[2].mxu0 }
0x3b47   :  { %v2904_v41 = vpop.f32.mrb[3].mxu0 }
0x3b48 PF:  { %2905 = vmatprep.subr.bf16.mxu0 %v3088_v18  ;;  %2909 = vmatprep.mubr.msk.bf16.mxu0 %vm3089_vm0, %v3088_v18 }
0x3b49   :  { %2906 = vmatpush3.bf16.msra.mxu0 %v3450_v21  ;;  %2913 = vmatprep.subr.bf16.mxu1 %v3088_v18 }
0x3b4a   :  { %2907 = vmatprep.subr.bf16.mxu0 %v3088_v18  ;;  %2914 = vmatpush3.bf16.msra.mxu1 %v3485_v42 }
0x3b4b   :  { %2915 = vmatprep.subr.bf16.mxu1 %v3088_v18  ;;  %2917 = vmatprep.mubr.msk.bf16.mxu1 %vm3089_vm0, %v3088_v18 }
0x3b4c   :  { %v2234_v15 = vld [vmem:[#allocation2] sm:$0xff] }
0x3b4d   :  { %2908 = vmatpush3.bf16.msra.mxu0 %v3456_v58 }
0x3b4e   :  { %2916 = vmatpush3.bf16.msra.mxu1 %v3491_v43 }
0x3b50   :  { %2910 = vmatmul.mubr.msk.bf16.vlgmr.msra.gmra.mrb[0].mxu0 %vm116_vm3, %v3762_v46 }
0x3c23   :  { %v2269_v16 = vpop.f32.mrb[0].mxu0 }
0x3c24   :  { %v2275_v17 = vadd.f32 %v2269_v16, %v2234_v15  ;;  %v2911_v21 = vpop.f32.mrb[1].mxu0 }
0x3c25   :  { %v2272_v23 = vpop.f32.mrb[2].mxu0 }
0x3c26   :  { %v2276_v27 = vadd.f32 %v3473_v26, %v2275_v17  ;;  %v2912_v42 = vpop.f32.mrb[3].mxu0 }
0x3c28   :  { %3065 = vtanh.f32 %v2276_v27  ;;  %v2502_v18 = vmul.f32 -1.442695, %v2276_v27 }
0x3c2a   :  { %3067 = vpow2.f32 %v2502_v18 }
0x3c32   :  { %v3066_v22 = vpop.eup %3065 }
0x3c33   :  { %2286 = vrot.lane.b32.xlu0 %v3066_v22, %s3091_s24 }
0x3c34   :  { %v3068_v58 = vpop.eup %3067 }
0x3c35   :  { %v2280_v28 = vadd.f32 1.0, %v3068_v58 }
0x3c37   :  { %3069 = vrcp.f32 %v2280_v28 }
0x3c41   :  { %v3070_v43 = vpop.eup %3069 }
0x3c42   :  { %v2284_v31 = vmul.f32 %v3070_v43, %v3757_v39 }
0x3ca5   :  { %v2287_v29 = vpop.permute.xlu0 %2286 }
0x3ca6   :  { %v2289_v52 = vmul.f32 %v3070_v43, %v2287_v29 }
0x3ca8   :  { %2291 = vrot.lane.b32.xlu0 %v2289_v52, %s3091_s24 }
0x3d1a   :  { %v2292_v32 = vpop.permute.xlu0 %2291 }
0x3d1b   :  { %v2294_v33 = vadd.f32 %v2292_v32, %v2284_v31 }
0x3d1d   :  { %3071 = vtanh.f32 %v2294_v33 }
0x3d27   :  { %v3072_v26 = vpop.eup %3071 }
0x3d28   :  { %2297 = vrot.lane.b32.xlu1 %v3072_v26, %s3091_s24 }
0x3d9a   :  { %v2298_v30 = vpop.permute.xlu1 %2297 }
0x3d9b   :  { %v2300_v35 = vmul.f32 %v3070_v43, %v2298_v30 }
0x3d9d   :  { %v2301_v36 = vpack.c.bf16 %v2300_v35, %v2300_v35 }
0x3d9f   :  { %2303 = vrot.lane.b32.xlu1 %v2301_v36, %s3092_s5 }
0x3e11   :  { %v2304_v19 = vpop.permute.xlu1 %2303 }
0x3e12   :  { %2918 = vmatmul.mubr.msk.bf16.vlgmr.msra.gmra.mrb[0].mxu1 %vm116_vm3, %v2304_v19 }
0x3ee5   :  { %v2342_v37 = vpop.f32.mrb[0].mxu1 }
0x3ee6   :  { %v2343_v60 = vadd.f32 %v3504_v49, %v2342_v37  ;;  %v2919_v38 = vpop.f32.mrb[1].mxu1 }
0x3ee7   :  { %v2345_v40 = vpop.f32.mrb[2].mxu1 }
0x3ee8   :  { %2504 = vst [vmem:[%s3824_s11 + $0x38] sm:$0xff] %v2343_v60  ;;  %v2920_v39 = vpop.f32.mrb[3].mxu1 }
0x3ee9   :  { %2354 = vsyncpa [#allocation4], 1 }

</bundles_post_ra>
